<compile_context>
chip_gen: v7x
topology: tpu7x:2x2x1
jax: 0.10.0
libtpu: 0.0.40
codegen_flags: <defaults>
</compile_context>

<pallas_src>
import jax
import jax.numpy as jnp
from jax.experimental import pallas as pl
from jax.experimental.pallas import tpu as pltpu

GNN_INP_DIM = 3
GNN_FILTERS = [16, 16, 16]
GNN_HEADS = [3, 3, 3]
FC_LAYERS = [8, 40]
JK_NUM_LAYERS = len(GNN_FILTERS) + 1                  # 4 (input + 3 GAT layers)
JK_HIDDEN = (JK_NUM_LAYERS * GNN_FILTERS[-1]) // 2    # 32 (PyG JumpingKnowledge 'lstm')
BN_EPS = 1e-5
LEAKY_SLOPE = 0.01        # nn.LeakyReLU default
GAT_ATT_SLOPE = 0.2       # GATConv attention leaky-relu slope

# ---- static layout of the packed parameter slabs (all f32, 128 lanes wide) ----
HEADS = GNN_HEADS[0]
C = GNN_FILTERS[0]
INP = GNN_INP_DIM
HC = HEADS * C                                  # 48
GAT_COLS = HC + 2 * HEADS                       # 54: [per-head feats | a_src | a_dst]
W0_COLS = GAT_COLS + 2 * C                      # 86: + [skip(16) | jk-proj0(16)]
HDIM = JK_HIDDEN
SLAB_W = 128                                    # lane width of both slabs (= 4*HDIM)

# weight slab row offsets
R_W0, N_W0 = 0, 8                               # fused layer-0 weight [3, 86]
R_W1, N_W1 = R_W0 + N_W0, C                     # folded GAT layer 1 [16, 54]
R_W2, N_W2 = R_W1 + N_W1, C                     # folded GAT layer 2 [16, 54]
R_WIHF, N_WIH = R_W2 + N_W2, C                  # LSTM w_ih fwd [16, 128]
R_WIHB = R_WIHF + N_WIH                         # LSTM w_ih bwd [16, 128]
R_WHHF, N_WHH = R_WIHB + N_WIH, HDIM            # LSTM w_hh fwd [32, 128]
R_WHHB = R_WHHF + N_WHH                         # LSTM w_hh bwd [32, 128]
R_ATTW, N_ATT = R_WHHB + N_WHH, 2 * HDIM        # JK attention vector [64, 1]
R_FC1, N_FC1 = R_ATTW + N_ATT, C                # fc1 [16, 8]
R_FC2, N_FC2 = R_FC1 + N_FC1, FC_LAYERS[0]      # fc2 [8, 128] (40 real cols)
W_SLAB_ROWS = R_FC2 + N_FC2                     # 224

# vector slab row indices (GAT biases are folded into BN shifts on the host)
V_PROJ0B = 0
V_BF, V_BB = 1, 2
V_ATTB = 3
V_FC1B, V_FC2B = 4, 5
V_BN0S, V_BN0B = 6, 7
V_BN1S, V_BN1B = 8, 9
V_BN2S, V_BN2B = 10, 11
V_FCBNS, V_FCBNB = 12, 13
V_SLAB_ROWS = 16                                # padded to a multiple of 8


def _leaky(v, slope):
    return jnp.where(v >= 0, v, slope * v)


def arxiv_classifier_kernel(x_ref, nb_ref, w_ref, v_ref, out_ref):
    n = x_ref.shape[0]

    def vrow(r, width=SLAB_W):
        return v_ref[r:r + 1, :width]

    def gat_attention(proj, neg_bias):
        # proj: [n, GAT_COLS] = [per-head feats (48, pre-scaled by 1/heads)
        #                        | a_src (3) | a_dst (3)]
        # (per-head projection + score dots were folded into one matmul upstream)
        feats = proj[:, :HC]
        a_src = proj[:, HC:HC + HEADS]
        a_dst = proj[:, HC + HEADS:HC + 2 * HEADS]
        acc = None
        for h in range(HEADS):
            # tiny (n,1)->(1,n) relayout per head (kept in this known-good form;
            # the expensive per-head matmuls are already folded away).
            src_row = a_src[:, h:h + 1].T
            e = _leaky(a_dst[:, h:h + 1] + src_row, GAT_ATT_SLOPE) + neg_bias
            m = jnp.max(e, axis=-1, keepdims=True)
            p = jnp.exp(e - m)                       # masked entries underflow to 0
            inv = pl.reciprocal(jnp.sum(p, axis=-1, keepdims=True), approx=True)
            contrib = jnp.dot(p * inv, feats[:, h * C:(h + 1) * C],
                              preferred_element_type=jnp.float32)
            acc = contrib if acc is None else acc + contrib
        return acc          # 1/heads and the GAT bias are folded on the host

    x = x_ref[...]

    # ---- layer 0: one fused matmul -> per-head feats, att scores, skip, JK proj ----
    p0 = jnp.dot(x, w_ref[R_W0:R_W0 + INP, :W0_COLS],
                 preferred_element_type=jnp.float32)                      # [n, 86]
    jk0 = p0[:, GAT_COLS + C:W0_COLS] + vrow(V_PROJ0B, C)                 # JK proj_lyrs[0]
    h0 = gat_attention(p0[:, :GAT_COLS], nb_ref[0]) \
        + p0[:, GAT_COLS:GAT_COLS + C]                                    # + Linear skip
    # BN shift already contains scale * gat_bias (host fold)
    h0 = _leaky(h0 * vrow(V_BN0S, C) + vrow(V_BN0B, C), LEAKY_SLOPE)
    # TODO(synk): Dropout / edge-dropout are eval-mode identities (no RNG replicated).

    # ---- layer 1 (identity skip, identity JK proj) ----
    p1 = jnp.dot(h0, w_ref[R_W1:R_W1 + C, :GAT_COLS],
                 preferred_element_type=jnp.float32)
    h1 = gat_attention(p1, nb_ref[1]) + h0
    h1 = _leaky(h1 * vrow(V_BN1S, C) + vrow(V_BN1B, C), LEAKY_SLOPE)

    # ---- layer 2 ----
    p2 = jnp.dot(h1, w_ref[R_W2:R_W2 + C, :GAT_COLS],
                 preferred_element_type=jnp.float32)
    h2 = gat_attention(p2, nb_ref[2]) + h1
    h2 = _leaky(h2 * vrow(V_BN2S, C) + vrow(V_BN2B, C), LEAKY_SLOPE)

    jk = [jk0, h0, h1, h2]

    # ---- JumpingKnowledge('lstm'): batch all 8 input projections into 2 matmuls ----
    xstack = jnp.concatenate(jk, axis=0)                                  # [4n, 16]
    pre_f = (jnp.dot(xstack, w_ref[R_WIHF:R_WIHF + C, :],
                     preferred_element_type=jnp.float32) + vrow(V_BF))    # [4n, 128]
    pre_b = (jnp.dot(xstack, w_ref[R_WIHB:R_WIHB + C, :],
                     preferred_element_type=jnp.float32) + vrow(V_BB))

    def lstm_dir(pre, whh, order):
        hcur = jnp.zeros((n, HDIM), jnp.float32)
        ccur = jnp.zeros((n, HDIM), jnp.float32)
        outs = [None] * JK_NUM_LAYERS
        for t in order:
            g = pre[t * n:(t + 1) * n, :] + jnp.dot(
                hcur, whh, preferred_element_type=jnp.float32)
            i = jax.nn.sigmoid(g[:, :HDIM])
            f = jax.nn.sigmoid(g[:, HDIM:2 * HDIM])
            gg = jnp.tanh(g[:, 2 * HDIM:3 * HDIM])
            o = jax.nn.sigmoid(g[:, 3 * HDIM:])
            ccur = f * ccur + i * gg
            hcur = o * jnp.tanh(ccur)
            outs[t] = hcur
        return outs

    fwd = lstm_dir(pre_f, w_ref[R_WHHF:R_WHHF + HDIM, :], range(JK_NUM_LAYERS))
    bwd = lstm_dir(pre_b, w_ref[R_WHHB:R_WHHB + HDIM, :],
                   range(JK_NUM_LAYERS - 1, -1, -1))

    # ---- JK attention: all 4 timestep scores via 2 matmuls ----
    f_rows = jnp.concatenate(fwd, axis=0)                                 # [4n, 32]
    b_rows = jnp.concatenate(bwd, axis=0)
    s_all = (jnp.dot(f_rows, w_ref[R_ATTW:R_ATTW + HDIM, 0:1],
                     preferred_element_type=jnp.float32)
             + jnp.dot(b_rows, w_ref[R_ATTW + HDIM:R_ATTW + 2 * HDIM, 0:1],
                       preferred_element_type=jnp.float32)
             + vrow(V_ATTB, 1))                                           # [4n, 1]
    scores = [s_all[t * n:(t + 1) * n, :] for t in range(JK_NUM_LAYERS)]
    m = scores[0]
    for s in scores[1:]:
        m = jnp.maximum(m, s)
    exps = [jnp.exp(s - m) for s in scores]
    den = exps[0]
    for e in exps[1:]:
        den = den + e
    inv_den = pl.reciprocal(den, approx=True)
    gnn_out = exps[0] * jk[0]
    for t in range(1, JK_NUM_LAYERS):
        gnn_out = gnn_out + exps[t] * jk[t]
    gnn_out = gnn_out * inv_den                                           # [n, 16]

    # ---- Fcn: Linear(16,8) -> LeakyReLU -> BN(eval) -> Linear(8,40 padded to 128) ----
    f1 = (jnp.dot(gnn_out, w_ref[R_FC1:R_FC1 + C, :FC_LAYERS[0]],
                  preferred_element_type=jnp.float32) + vrow(V_FC1B, FC_LAYERS[0]))
    f1 = _leaky(f1, LEAKY_SLOPE)
    f1 = f1 * vrow(V_FCBNS, FC_LAYERS[0]) + vrow(V_FCBNB, FC_LAYERS[0])
    out_ref[...] = (jnp.dot(f1, w_ref[R_FC2:R_FC2 + FC_LAYERS[0], :],
                            preferred_element_type=jnp.float32) + vrow(V_FC2B))


# ---------------------------------------------------------------------------
# Host-side packing (done once per parameter set in a real deployment).
# ---------------------------------------------------------------------------
def _pad_to(a, rows, cols):
    return jnp.pad(a, ((0, rows - a.shape[0]), (0, cols - a.shape[1])))


def _fold_gat(params, i):
    # Fold att_src / att_dst into the projection: one matmul per layer emits
    # per-head features AND both attention scores. The 1/heads head-average is
    # folded into the feature columns (attention-score columns stay unscaled).
    w = params[f"g{i}_w"]                                   # [Fin, heads*c]
    w3 = w.reshape(w.shape[0], HEADS, C)
    a_s = jnp.einsum("fhc,ch->fh", w3, params[f"g{i}_att_src"])   # [Fin, heads]
    a_d = jnp.einsum("fhc,ch->fh", w3, params[f"g{i}_att_dst"])
    return jnp.concatenate([w * (1.0 / HEADS), a_s, a_d], axis=1)  # [Fin, 54]


def _bn_fold(bn):
    # eval BatchNorm -> per-channel scale/shift
    w, b, mean, var = bn[0:1], bn[1:2], bn[2:3], bn[3:4]
    scale = w * jax.lax.rsqrt(var + BN_EPS)
    shift = b - mean * scale
    return scale, shift


def pack_params(params):
    w0 = jnp.concatenate([_fold_gat(params, 0),
                          params["skip0_w"], params["proj0_w"]], axis=1)  # [3, 86]
    w_blocks = [
        _pad_to(w0, N_W0, SLAB_W),
        _pad_to(_fold_gat(params, 1), N_W1, SLAB_W),
        _pad_to(_fold_gat(params, 2), N_W2, SLAB_W),
        _pad_to(params["lstm_wih_f"], N_WIH, SLAB_W),
        _pad_to(params["lstm_wih_b"], N_WIH, SLAB_W),
        _pad_to(params["lstm_whh_f"], N_WHH, SLAB_W),
        _pad_to(params["lstm_whh_b"], N_WHH, SLAB_W),
        _pad_to(params["jk_att_w"], N_ATT, SLAB_W),
        _pad_to(params["fc1_w"], N_FC1, SLAB_W),
        _pad_to(params["fc2_w"], N_FC2, SLAB_W),
    ]
    w_slab = jnp.concatenate(w_blocks, axis=0).astype(jnp.float32)        # [224, 128]

    def row(v):
        return _pad_to(v, 1, SLAB_W)

    rows = [row(params["proj0_b"]),
            row(params["lstm_b_f"]), row(params["lstm_b_b"]),
            row(params["jk_att_b"]),
            row(params["fc1_b"]), row(params["fc2_b"])]
    for i in range(len(GNN_FILTERS)):
        s, sh = _bn_fold(params[f"bn{i}"])
        sh = sh + s * params[f"g{i}_b"]          # fold GAT output bias into BN shift
        rows += [row(s), row(sh)]
    s, sh = _bn_fold(params["fc_bn"])
    rows += [row(s), row(sh)]
    v_slab = jnp.concatenate(rows, axis=0)
    v_slab = _pad_to(v_slab, V_SLAB_ROWS, SLAB_W).astype(jnp.float32)     # [16, 128]
    return w_slab, v_slab


def pack_adjs(adj_masks, n):
    # Additive attention bias per hop, padded to [n, n]; padded rows get a
    # self-loop so their (discarded) softmax stays well-defined.
    nb = []
    for a in adj_masks:
        k = a.shape[0]
        ap = jnp.zeros((n, n), jnp.float32).at[:k, :k].set(a)
        ap = jnp.maximum(ap, jnp.eye(n, dtype=jnp.float32))
        nb.append(jnp.where(ap > 0, 0.0, -1e30))
    return jnp.stack(nb, axis=0)                                          # [3, n, n]


def arxiv_classifier_forward(x, adj_masks, dst_sizes, params):
    n = x.shape[0]
    n_out = dst_sizes[-1]
    num_classes = params["fc2_b"].shape[1]
    w_slab, v_slab = pack_params(params)
    neg_bias = pack_adjs(adj_masks, n)

    # Single ungridded invocation (one sampled subgraph). For a batched
    # deployment add a leading grid axis over subgraphs with
    # dimension_semantics=("parallel",) to use both v7x TensorCores.
    out = pl.pallas_call(
        arxiv_classifier_kernel,
        out_shape=jax.ShapeDtypeStruct((n, SLAB_W), jnp.float32),
        in_specs=[pl.BlockSpec(memory_space=pltpu.MemorySpace.VMEM)] * 4,
        out_specs=pl.BlockSpec(memory_space=pltpu.MemorySpace.VMEM),
    )(x, neg_bias, w_slab, v_slab)
    return out[:n_out, :num_classes]


def init_params(key):
    def nrm(k, shape, scale=0.2):
        return (scale * jax.random.normal(k, shape)).astype(jnp.float32)

    keys = iter(jax.random.split(key, 64))
    p = {}
    heads, c, inp = GNN_HEADS[0], GNN_FILTERS[0], GNN_INP_DIM
    dims = [inp] + GNN_FILTERS
    for i in range(len(GNN_FILTERS)):
        p[f"g{i}_w"] = nrm(next(keys), (dims[i], heads * c))        # lin weight (pre-transposed)
        p[f"g{i}_att_src"] = nrm(next(keys), (c, heads))            # att_src^T
        p[f"g{i}_att_dst"] = nrm(next(keys), (c, heads))            # att_dst^T
        p[f"g{i}_b"] = nrm(next(keys), (1, c))
        w = nrm(next(keys), (1, c)) + 1.0
        b = nrm(next(keys), (1, c))
        mean = nrm(next(keys), (1, c))
        var = jnp.abs(nrm(next(keys), (1, c))) + 1.0
        p[f"bn{i}"] = jnp.concatenate([w, b, mean, var], axis=0)    # [4, c]
    p["skip0_w"] = nrm(next(keys), (inp, c))                        # Linear(3,16,bias=False)
    p["proj0_w"] = nrm(next(keys), (inp, c))                        # JK input projection
    p["proj0_b"] = nrm(next(keys), (1, c))
    hdim = JK_HIDDEN
    for d in ("f", "b"):                                            # fwd / bwd LSTM directions
        p[f"lstm_wih_{d}"] = nrm(next(keys), (c, 4 * hdim))         # gate order [i|f|g|o]
        p[f"lstm_whh_{d}"] = nrm(next(keys), (hdim, 4 * hdim))
        p[f"lstm_b_{d}"] = nrm(next(keys), (1, 4 * hdim))           # bias_ih + bias_hh combined
    p["jk_att_w"] = nrm(next(keys), (2 * hdim, 1))
    p["jk_att_b"] = nrm(next(keys), (1, 1))
    fdims = [GNN_FILTERS[-1]] + FC_LAYERS
    p["fc1_w"] = nrm(next(keys), (fdims[0], fdims[1]))
    p["fc1_b"] = nrm(next(keys), (1, fdims[1]))
    w = nrm(next(keys), (1, fdims[1])) + 1.0
    b = nrm(next(keys), (1, fdims[1]))
    mean = nrm(next(keys), (1, fdims[1]))
    var = jnp.abs(nrm(next(keys), (1, fdims[1]))) + 1.0
    p["fc_bn"] = jnp.concatenate([w, b, mean, var], axis=0)         # [4, 8]
    p["fc2_w"] = nrm(next(keys), (fdims[1], fdims[2]))
    p["fc2_b"] = nrm(next(keys), (1, fdims[2]))
    return p


if __name__ == "__main__":
    key = jax.random.PRNGKey(0)
    k_x, k_p, k_a0, k_a1, k_a2 = jax.random.split(key, 5)

    # NeighborSampler-style hop sizes: 16 sampled nodes -> 12 -> 10 -> 8 batch nodes.
    sizes = [16, 12, 10, 8]
    x = jax.random.normal(k_x, (sizes[0], GNN_INP_DIM), dtype=jnp.float32)

    def make_adj(k, n_src, n_dst):
        # dense mask: edges only target the first n_dst nodes (sampler semantics),
        # plus self-loops for every node (GATConv add_self_loops=True).
        m = jax.random.bernoulli(k, 0.35, (n_src, n_src)).astype(jnp.float32)
        m = jnp.where(jnp.arange(n_src)[:, None] < n_dst, m, 0.0)
        return jnp.maximum(m, jnp.eye(n_src, dtype=jnp.float32))

    adj_masks = [make_adj(k_a0, sizes[0], sizes[1]),
                 make_adj(k_a1, sizes[1], sizes[2]),
                 make_adj(k_a2, sizes[2], sizes[3])]
    dst_sizes = sizes[1:]

    params = init_params(k_p)
    out = arxiv_classifier_forward(x, adj_masks, dst_sizes, params)
    out = jax.block_until_ready(out)
    assert out.shape == (sizes[-1], FC_LAYERS[-1])
    assert bool(jnp.all(jnp.isfinite(out)))
    print("KERNEL_OK")
</pallas_src>

<mosaic_0001>
module attributes {stable_mosaic.version = 11 : i64} {
  func.func @arxiv_classifier_kernel(%arg0: memref<16x3xf32, #tpu.memory_space<vmem>>, %arg1: memref<3x16x16xf32, #tpu.memory_space<vmem>>, %arg2: memref<224x128xf32, #tpu.memory_space<vmem>>, %arg3: memref<16x128xf32, #tpu.memory_space<vmem>>, %arg4: memref<16x128xf32, #tpu.memory_space<vmem>>) attributes {dimension_semantics = [], scalar_prefetch = 0 : i64, scratch_operands = 0 : i64, tpu.core_type = #tpu.core_type<tc>} {
    %c0 = arith.constant 0 : index
    %c0_0 = arith.constant 0 : index
    %0 = vector.load %arg0[%c0, %c0_0] : memref<16x3xf32, #tpu.memory_space<vmem>>, vector<16x3xf32>
    %c0_1 = arith.constant 0 : index
    %c0_2 = arith.constant 0 : index
    %1 = vector.load %arg2[%c0_1, %c0_2] : memref<224x128xf32, #tpu.memory_space<vmem>>, vector<3x86xf32>
    %cst = arith.constant dense<0.000000e+00> : vector<16x86xf32>
    %2 = tpu.matmul %0, %1, %cst {dimension_numbers = #tpu.dot_dimension_numbers<[1], [0], [0], [1], [0, 0, 1, 1], [], []>} : vector<16x3xf32>, vector<3x86xf32>, vector<16x86xf32> -> vector<16x86xf32>
    %3 = vector.extract_strided_slice %2 {offsets = [0, 70], sizes = [16, 16], strides = [1, 1]} : vector<16x86xf32> to vector<16x16xf32>
    %c0_3 = arith.constant 0 : index
    %c0_4 = arith.constant 0 : index
    %4 = vector.load %arg3[%c0_3, %c0_4] : memref<16x128xf32, #tpu.memory_space<vmem>>, vector<1x16xf32>
    %5 = vector.broadcast %4 : vector<1x16xf32> to vector<16x16xf32>
    %6 = arith.addf %3, %5 : vector<16x16xf32>
    %7 = vector.extract_strided_slice %2 {offsets = [0, 0], sizes = [16, 54], strides = [1, 1]} : vector<16x86xf32> to vector<16x54xf32>
    %c0_5 = arith.constant 0 : index
    %c0_6 = arith.constant 0 : index
    %c0_7 = arith.constant 0 : index
    %8 = vector.load %arg1[%c0_5, %c0_6, %c0_7] : memref<3x16x16xf32, #tpu.memory_space<vmem>>, vector<1x16x16xf32>
    %9 = vector.shape_cast %8 : vector<1x16x16xf32> to vector<16x16xf32>
    %10 = vector.extract_strided_slice %7 {offsets = [0, 0], sizes = [16, 48], strides = [1, 1]} : vector<16x54xf32> to vector<16x48xf32>
    %11 = vector.extract_strided_slice %7 {offsets = [0, 48], sizes = [16, 3], strides = [1, 1]} : vector<16x54xf32> to vector<16x3xf32>
    %12 = vector.extract_strided_slice %7 {offsets = [0, 51], sizes = [16, 3], strides = [1, 1]} : vector<16x54xf32> to vector<16x3xf32>
    %13 = vector.extract_strided_slice %11 {offsets = [0, 0], sizes = [16, 1], strides = [1, 1]} : vector<16x3xf32> to vector<16x1xf32>
    %14 = tpu.transpose %13, [1, 0] : vector<16x1xf32> -> vector<1x16xf32>
    %15 = vector.extract_strided_slice %12 {offsets = [0, 0], sizes = [16, 1], strides = [1, 1]} : vector<16x3xf32> to vector<16x1xf32>
    %16 = vector.broadcast %15 : vector<16x1xf32> to vector<16x16xf32>
    %17 = vector.broadcast %14 : vector<1x16xf32> to vector<16x16xf32>
    %18 = arith.addf %16, %17 : vector<16x16xf32>
    %cst_8 = arith.constant 0.000000e+00 : f32
    %19 = vector.broadcast %cst_8 : f32 to vector<16x16xf32>
    %20 = arith.cmpf oge, %18, %19 : vector<16x16xf32>
    %cst_9 = arith.constant 2.000000e-01 : f32
    %21 = vector.broadcast %cst_9 : f32 to vector<16x16xf32>
    %22 = arith.mulf %21, %18 : vector<16x16xf32>
    %23 = arith.select %20, %18, %22 : vector<16x16xi1>, vector<16x16xf32>
    %24 = arith.addf %23, %9 : vector<16x16xf32>
    %cst_10 = arith.constant dense<0xFF800000> : vector<16xf32>
    %25 = vector.multi_reduction <maximumf>, %24, %cst_10 [1] : vector<16x16xf32> to vector<16xf32>
    %26 = vector.shape_cast %25 : vector<16xf32> to vector<16x1xf32>
    %27 = vector.broadcast %26 : vector<16x1xf32> to vector<16x16xf32>
    %28 = arith.subf %24, %27 : vector<16x16xf32>
    %29 = math.exp %28 : vector<16x16xf32>
    %cst_11 = arith.constant dense<0.000000e+00> : vector<16xf32>
    %30 = vector.multi_reduction <add>, %29, %cst_11 [1] : vector<16x16xf32> to vector<16xf32>
    %31 = vector.shape_cast %30 : vector<16xf32> to vector<16x1xf32>
    %32 = tpu.reciprocal %31 {approx = true} : vector<16x1xf32> -> vector<16x1xf32>
    %33 = vector.broadcast %32 : vector<16x1xf32> to vector<16x16xf32>
    %34 = arith.mulf %29, %33 : vector<16x16xf32>
    %35 = vector.extract_strided_slice %10 {offsets = [0, 0], sizes = [16, 16], strides = [1, 1]} : vector<16x48xf32> to vector<16x16xf32>
    %cst_12 = arith.constant dense<0.000000e+00> : vector<16x16xf32>
    %36 = tpu.matmul %34, %35, %cst_12 {dimension_numbers = #tpu.dot_dimension_numbers<[1], [0], [0], [1], [0, 0, 1, 1], [], []>} : vector<16x16xf32>, vector<16x16xf32>, vector<16x16xf32> -> vector<16x16xf32>
    %37 = vector.extract_strided_slice %11 {offsets = [0, 1], sizes = [16, 1], strides = [1, 1]} : vector<16x3xf32> to vector<16x1xf32>
    %38 = tpu.transpose %37, [1, 0] : vector<16x1xf32> -> vector<1x16xf32>
    %39 = vector.extract_strided_slice %12 {offsets = [0, 1], sizes = [16, 1], strides = [1, 1]} : vector<16x3xf32> to vector<16x1xf32>
    %40 = vector.broadcast %39 : vector<16x1xf32> to vector<16x16xf32>
    %41 = vector.broadcast %38 : vector<1x16xf32> to vector<16x16xf32>
    %42 = arith.addf %40, %41 : vector<16x16xf32>
    %cst_13 = arith.constant 0.000000e+00 : f32
    %43 = vector.broadcast %cst_13 : f32 to vector<16x16xf32>
    %44 = arith.cmpf oge, %42, %43 : vector<16x16xf32>
    %cst_14 = arith.constant 2.000000e-01 : f32
    %45 = vector.broadcast %cst_14 : f32 to vector<16x16xf32>
    %46 = arith.mulf %45, %42 : vector<16x16xf32>
    %47 = arith.select %44, %42, %46 : vector<16x16xi1>, vector<16x16xf32>
    %48 = arith.addf %47, %9 : vector<16x16xf32>
    %cst_15 = arith.constant dense<0xFF800000> : vector<16xf32>
    %49 = vector.multi_reduction <maximumf>, %48, %cst_15 [1] : vector<16x16xf32> to vector<16xf32>
    %50 = vector.shape_cast %49 : vector<16xf32> to vector<16x1xf32>
    %51 = vector.broadcast %50 : vector<16x1xf32> to vector<16x16xf32>
    %52 = arith.subf %48, %51 : vector<16x16xf32>
    %53 = math.exp %52 : vector<16x16xf32>
    %cst_16 = arith.constant dense<0.000000e+00> : vector<16xf32>
    %54 = vector.multi_reduction <add>, %53, %cst_16 [1] : vector<16x16xf32> to vector<16xf32>
    %55 = vector.shape_cast %54 : vector<16xf32> to vector<16x1xf32>
    %56 = tpu.reciprocal %55 {approx = true} : vector<16x1xf32> -> vector<16x1xf32>
    %57 = vector.broadcast %56 : vector<16x1xf32> to vector<16x16xf32>
    %58 = arith.mulf %53, %57 : vector<16x16xf32>
    %59 = vector.extract_strided_slice %10 {offsets = [0, 16], sizes = [16, 16], strides = [1, 1]} : vector<16x48xf32> to vector<16x16xf32>
    %cst_17 = arith.constant dense<0.000000e+00> : vector<16x16xf32>
    %60 = tpu.matmul %58, %59, %cst_17 {dimension_numbers = #tpu.dot_dimension_numbers<[1], [0], [0], [1], [0, 0, 1, 1], [], []>} : vector<16x16xf32>, vector<16x16xf32>, vector<16x16xf32> -> vector<16x16xf32>
    %61 = arith.addf %36, %60 : vector<16x16xf32>
    %62 = vector.extract_strided_slice %11 {offsets = [0, 2], sizes = [16, 1], strides = [1, 1]} : vector<16x3xf32> to vector<16x1xf32>
    %63 = tpu.transpose %62, [1, 0] : vector<16x1xf32> -> vector<1x16xf32>
    %64 = vector.extract_strided_slice %12 {offsets = [0, 2], sizes = [16, 1], strides = [1, 1]} : vector<16x3xf32> to vector<16x1xf32>
    %65 = vector.broadcast %64 : vector<16x1xf32> to vector<16x16xf32>
    %66 = vector.broadcast %63 : vector<1x16xf32> to vector<16x16xf32>
    %67 = arith.addf %65, %66 : vector<16x16xf32>
    %cst_18 = arith.constant 0.000000e+00 : f32
    %68 = vector.broadcast %cst_18 : f32 to vector<16x16xf32>
    %69 = arith.cmpf oge, %67, %68 : vector<16x16xf32>
    %cst_19 = arith.constant 2.000000e-01 : f32
    %70 = vector.broadcast %cst_19 : f32 to vector<16x16xf32>
    %71 = arith.mulf %70, %67 : vector<16x16xf32>
    %72 = arith.select %69, %67, %71 : vector<16x16xi1>, vector<16x16xf32>
    %73 = arith.addf %72, %9 : vector<16x16xf32>
    %cst_20 = arith.constant dense<0xFF800000> : vector<16xf32>
    %74 = vector.multi_reduction <maximumf>, %73, %cst_20 [1] : vector<16x16xf32> to vector<16xf32>
    %75 = vector.shape_cast %74 : vector<16xf32> to vector<16x1xf32>
    %76 = vector.broadcast %75 : vector<16x1xf32> to vector<16x16xf32>
    %77 = arith.subf %73, %76 : vector<16x16xf32>
    %78 = math.exp %77 : vector<16x16xf32>
    %cst_21 = arith.constant dense<0.000000e+00> : vector<16xf32>
    %79 = vector.multi_reduction <add>, %78, %cst_21 [1] : vector<16x16xf32> to vector<16xf32>
    %80 = vector.shape_cast %79 : vector<16xf32> to vector<16x1xf32>
    %81 = tpu.reciprocal %80 {approx = true} : vector<16x1xf32> -> vector<16x1xf32>
    %82 = vector.broadcast %81 : vector<16x1xf32> to vector<16x16xf32>
    %83 = arith.mulf %78, %82 : vector<16x16xf32>
    %84 = vector.extract_strided_slice %10 {offsets = [0, 32], sizes = [16, 16], strides = [1, 1]} : vector<16x48xf32> to vector<16x16xf32>
    %cst_22 = arith.constant dense<0.000000e+00> : vector<16x16xf32>
    %85 = tpu.matmul %83, %84, %cst_22 {dimension_numbers = #tpu.dot_dimension_numbers<[1], [0], [0], [1], [0, 0, 1, 1], [], []>} : vector<16x16xf32>, vector<16x16xf32>, vector<16x16xf32> -> vector<16x16xf32>
    %86 = arith.addf %61, %85 : vector<16x16xf32>
    %87 = vector.extract_strided_slice %2 {offsets = [0, 54], sizes = [16, 16], strides = [1, 1]} : vector<16x86xf32> to vector<16x16xf32>
    %88 = arith.addf %86, %87 : vector<16x16xf32>
    %c6 = arith.constant 6 : index
    %c0_23 = arith.constant 0 : index
    %89 = vector.load %arg3[%c6, %c0_23] : memref<16x128xf32, #tpu.memory_space<vmem>>, vector<1x16xf32>
    %90 = vector.broadcast %89 : vector<1x16xf32> to vector<16x16xf32>
    %91 = arith.mulf %88, %90 : vector<16x16xf32>
    %c7 = arith.constant 7 : index
    %c0_24 = arith.constant 0 : index
    %92 = vector.load %arg3[%c7, %c0_24] : memref<16x128xf32, #tpu.memory_space<vmem>>, vector<1x16xf32>
    %93 = vector.broadcast %92 : vector<1x16xf32> to vector<16x16xf32>
    %94 = arith.addf %91, %93 : vector<16x16xf32>
    %cst_25 = arith.constant 0.000000e+00 : f32
    %95 = vector.broadcast %cst_25 : f32 to vector<16x16xf32>
    %96 = arith.cmpf oge, %94, %95 : vector<16x16xf32>
    %cst_26 = arith.constant 0.00999999977 : f32
    %97 = vector.broadcast %cst_26 : f32 to vector<16x16xf32>
    %98 = arith.mulf %97, %94 : vector<16x16xf32>
    %99 = arith.select %96, %94, %98 : vector<16x16xi1>, vector<16x16xf32>
    %c8 = arith.constant 8 : index
    %c0_27 = arith.constant 0 : index
    %100 = vector.load %arg2[%c8, %c0_27] : memref<224x128xf32, #tpu.memory_space<vmem>>, vector<16x54xf32>
    %cst_28 = arith.constant dense<0.000000e+00> : vector<16x54xf32>
    %101 = tpu.matmul %99, %100, %cst_28 {dimension_numbers = #tpu.dot_dimension_numbers<[1], [0], [0], [1], [0, 0, 1, 1], [], []>} : vector<16x16xf32>, vector<16x54xf32>, vector<16x54xf32> -> vector<16x54xf32>
    %c1 = arith.constant 1 : index
    %c0_29 = arith.constant 0 : index
    %c0_30 = arith.constant 0 : index
    %102 = vector.load %arg1[%c1, %c0_29, %c0_30] : memref<3x16x16xf32, #tpu.memory_space<vmem>>, vector<1x16x16xf32>
    %103 = vector.shape_cast %102 : vector<1x16x16xf32> to vector<16x16xf32>
    %104 = vector.extract_strided_slice %101 {offsets = [0, 0], sizes = [16, 48], strides = [1, 1]} : vector<16x54xf32> to vector<16x48xf32>
    %105 = vector.extract_strided_slice %101 {offsets = [0, 48], sizes = [16, 3], strides = [1, 1]} : vector<16x54xf32> to vector<16x3xf32>
    %106 = vector.extract_strided_slice %101 {offsets = [0, 51], sizes = [16, 3], strides = [1, 1]} : vector<16x54xf32> to vector<16x3xf32>
    %107 = vector.extract_strided_slice %105 {offsets = [0, 0], sizes = [16, 1], strides = [1, 1]} : vector<16x3xf32> to vector<16x1xf32>
    %108 = tpu.transpose %107, [1, 0] : vector<16x1xf32> -> vector<1x16xf32>
    %109 = vector.extract_strided_slice %106 {offsets = [0, 0], sizes = [16, 1], strides = [1, 1]} : vector<16x3xf32> to vector<16x1xf32>
    %110 = vector.broadcast %109 : vector<16x1xf32> to vector<16x16xf32>
    %111 = vector.broadcast %108 : vector<1x16xf32> to vector<16x16xf32>
    %112 = arith.addf %110, %111 : vector<16x16xf32>
    %cst_31 = arith.constant 0.000000e+00 : f32
    %113 = vector.broadcast %cst_31 : f32 to vector<16x16xf32>
    %114 = arith.cmpf oge, %112, %113 : vector<16x16xf32>
    %cst_32 = arith.constant 2.000000e-01 : f32
    %115 = vector.broadcast %cst_32 : f32 to vector<16x16xf32>
    %116 = arith.mulf %115, %112 : vector<16x16xf32>
    %117 = arith.select %114, %112, %116 : vector<16x16xi1>, vector<16x16xf32>
    %118 = arith.addf %117, %103 : vector<16x16xf32>
    %cst_33 = arith.constant dense<0xFF800000> : vector<16xf32>
    %119 = vector.multi_reduction <maximumf>, %118, %cst_33 [1] : vector<16x16xf32> to vector<16xf32>
    %120 = vector.shape_cast %119 : vector<16xf32> to vector<16x1xf32>
    %121 = vector.broadcast %120 : vector<16x1xf32> to vector<16x16xf32>
    %122 = arith.subf %118, %121 : vector<16x16xf32>
    %123 = math.exp %122 : vector<16x16xf32>
    %cst_34 = arith.constant dense<0.000000e+00> : vector<16xf32>
    %124 = vector.multi_reduction <add>, %123, %cst_34 [1] : vector<16x16xf32> to vector<16xf32>
    %125 = vector.shape_cast %124 : vector<16xf32> to vector<16x1xf32>
    %126 = tpu.reciprocal %125 {approx = true} : vector<16x1xf32> -> vector<16x1xf32>
    %127 = vector.broadcast %126 : vector<16x1xf32> to vector<16x16xf32>
    %128 = arith.mulf %123, %127 : vector<16x16xf32>
    %129 = vector.extract_strided_slice %104 {offsets = [0, 0], sizes = [16, 16], strides = [1, 1]} : vector<16x48xf32> to vector<16x16xf32>
    %cst_35 = arith.constant dense<0.000000e+00> : vector<16x16xf32>
    %130 = tpu.matmul %128, %129, %cst_35 {dimension_numbers = #tpu.dot_dimension_numbers<[1], [0], [0], [1], [0, 0, 1, 1], [], []>} : vector<16x16xf32>, vector<16x16xf32>, vector<16x16xf32> -> vector<16x16xf32>
    %131 = vector.extract_strided_slice %105 {offsets = [0, 1], sizes = [16, 1], strides = [1, 1]} : vector<16x3xf32> to vector<16x1xf32>
    %132 = tpu.transpose %131, [1, 0] : vector<16x1xf32> -> vector<1x16xf32>
    %133 = vector.extract_strided_slice %106 {offsets = [0, 1], sizes = [16, 1], strides = [1, 1]} : vector<16x3xf32> to vector<16x1xf32>
    %134 = vector.broadcast %133 : vector<16x1xf32> to vector<16x16xf32>
    %135 = vector.broadcast %132 : vector<1x16xf32> to vector<16x16xf32>
    %136 = arith.addf %134, %135 : vector<16x16xf32>
    %cst_36 = arith.constant 0.000000e+00 : f32
    %137 = vector.broadcast %cst_36 : f32 to vector<16x16xf32>
    %138 = arith.cmpf oge, %136, %137 : vector<16x16xf32>
    %cst_37 = arith.constant 2.000000e-01 : f32
    %139 = vector.broadcast %cst_37 : f32 to vector<16x16xf32>
    %140 = arith.mulf %139, %136 : vector<16x16xf32>
    %141 = arith.select %138, %136, %140 : vector<16x16xi1>, vector<16x16xf32>
    %142 = arith.addf %141, %103 : vector<16x16xf32>
    %cst_38 = arith.constant dense<0xFF800000> : vector<16xf32>
    %143 = vector.multi_reduction <maximumf>, %142, %cst_38 [1] : vector<16x16xf32> to vector<16xf32>
    %144 = vector.shape_cast %143 : vector<16xf32> to vector<16x1xf32>
    %145 = vector.broadcast %144 : vector<16x1xf32> to vector<16x16xf32>
    %146 = arith.subf %142, %145 : vector<16x16xf32>
    %147 = math.exp %146 : vector<16x16xf32>
    %cst_39 = arith.constant dense<0.000000e+00> : vector<16xf32>
    %148 = vector.multi_reduction <add>, %147, %cst_39 [1] : vector<16x16xf32> to vector<16xf32>
    %149 = vector.shape_cast %148 : vector<16xf32> to vector<16x1xf32>
    %150 = tpu.reciprocal %149 {approx = true} : vector<16x1xf32> -> vector<16x1xf32>
    %151 = vector.broadcast %150 : vector<16x1xf32> to vector<16x16xf32>
    %152 = arith.mulf %147, %151 : vector<16x16xf32>
    %153 = vector.extract_strided_slice %104 {offsets = [0, 16], sizes = [16, 16], strides = [1, 1]} : vector<16x48xf32> to vector<16x16xf32>
    %cst_40 = arith.constant dense<0.000000e+00> : vector<16x16xf32>
    %154 = tpu.matmul %152, %153, %cst_40 {dimension_numbers = #tpu.dot_dimension_numbers<[1], [0], [0], [1], [0, 0, 1, 1], [], []>} : vector<16x16xf32>, vector<16x16xf32>, vector<16x16xf32> -> vector<16x16xf32>
    %155 = arith.addf %130, %154 : vector<16x16xf32>
    %156 = vector.extract_strided_slice %105 {offsets = [0, 2], sizes = [16, 1], strides = [1, 1]} : vector<16x3xf32> to vector<16x1xf32>
    %157 = tpu.transpose %156, [1, 0] : vector<16x1xf32> -> vector<1x16xf32>
    %158 = vector.extract_strided_slice %106 {offsets = [0, 2], sizes = [16, 1], strides = [1, 1]} : vector<16x3xf32> to vector<16x1xf32>
    %159 = vector.broadcast %158 : vector<16x1xf32> to vector<16x16xf32>
    %160 = vector.broadcast %157 : vector<1x16xf32> to vector<16x16xf32>
    %161 = arith.addf %159, %160 : vector<16x16xf32>
    %cst_41 = arith.constant 0.000000e+00 : f32
    %162 = vector.broadcast %cst_41 : f32 to vector<16x16xf32>
    %163 = arith.cmpf oge, %161, %162 : vector<16x16xf32>
    %cst_42 = arith.constant 2.000000e-01 : f32
    %164 = vector.broadcast %cst_42 : f32 to vector<16x16xf32>
    %165 = arith.mulf %164, %161 : vector<16x16xf32>
    %166 = arith.select %163, %161, %165 : vector<16x16xi1>, vector<16x16xf32>
    %167 = arith.addf %166, %103 : vector<16x16xf32>
    %cst_43 = arith.constant dense<0xFF800000> : vector<16xf32>
    %168 = vector.multi_reduction <maximumf>, %167, %cst_43 [1] : vector<16x16xf32> to vector<16xf32>
    %169 = vector.shape_cast %168 : vector<16xf32> to vector<16x1xf32>
    %170 = vector.broadcast %169 : vector<16x1xf32> to vector<16x16xf32>
    %171 = arith.subf %167, %170 : vector<16x16xf32>
    %172 = math.exp %171 : vector<16x16xf32>
    %cst_44 = arith.constant dense<0.000000e+00> : vector<16xf32>
    %173 = vector.multi_reduction <add>, %172, %cst_44 [1] : vector<16x16xf32> to vector<16xf32>
    %174 = vector.shape_cast %173 : vector<16xf32> to vector<16x1xf32>
    %175 = tpu.reciprocal %174 {approx = true} : vector<16x1xf32> -> vector<16x1xf32>
    %176 = vector.broadcast %175 : vector<16x1xf32> to vector<16x16xf32>
    %177 = arith.mulf %172, %176 : vector<16x16xf32>
    %178 = vector.extract_strided_slice %104 {offsets = [0, 32], sizes = [16, 16], strides = [1, 1]} : vector<16x48xf32> to vector<16x16xf32>
    %cst_45 = arith.constant dense<0.000000e+00> : vector<16x16xf32>
    %179 = tpu.matmul %177, %178, %cst_45 {dimension_numbers = #tpu.dot_dimension_numbers<[1], [0], [0], [1], [0, 0, 1, 1], [], []>} : vector<16x16xf32>, vector<16x16xf32>, vector<16x16xf32> -> vector<16x16xf32>
    %180 = arith.addf %155, %179 : vector<16x16xf32>
    %181 = arith.addf %180, %99 : vector<16x16xf32>
    %c8_46 = arith.constant 8 : index
    %c0_47 = arith.constant 0 : index
    %182 = vector.load %arg3[%c8_46, %c0_47] : memref<16x128xf32, #tpu.memory_space<vmem>>, vector<1x16xf32>
    %183 = vector.broadcast %182 : vector<1x16xf32> to vector<16x16xf32>
    %184 = arith.mulf %181, %183 : vector<16x16xf32>
    %c9 = arith.constant 9 : index
    %c0_48 = arith.constant 0 : index
    %185 = vector.load %arg3[%c9, %c0_48] : memref<16x128xf32, #tpu.memory_space<vmem>>, vector<1x16xf32>
    %186 = vector.broadcast %185 : vector<1x16xf32> to vector<16x16xf32>
    %187 = arith.addf %184, %186 : vector<16x16xf32>
    %cst_49 = arith.constant 0.000000e+00 : f32
    %188 = vector.broadcast %cst_49 : f32 to vector<16x16xf32>
    %189 = arith.cmpf oge, %187, %188 : vector<16x16xf32>
    %cst_50 = arith.constant 0.00999999977 : f32
    %190 = vector.broadcast %cst_50 : f32 to vector<16x16xf32>
    %191 = arith.mulf %190, %187 : vector<16x16xf32>
    %192 = arith.select %189, %187, %191 : vector<16x16xi1>, vector<16x16xf32>
    %c24 = arith.constant 24 : index
    %c0_51 = arith.constant 0 : index
    %193 = vector.load %arg2[%c24, %c0_51] : memref<224x128xf32, #tpu.memory_space<vmem>>, vector<16x54xf32>
    %cst_52 = arith.constant dense<0.000000e+00> : vector<16x54xf32>
    %194 = tpu.matmul %192, %193, %cst_52 {dimension_numbers = #tpu.dot_dimension_numbers<[1], [0], [0], [1], [0, 0, 1, 1], [], []>} : vector<16x16xf32>, vector<16x54xf32>, vector<16x54xf32> -> vector<16x54xf32>
    %c2 = arith.constant 2 : index
    %c0_53 = arith.constant 0 : index
    %c0_54 = arith.constant 0 : index
    %195 = vector.load %arg1[%c2, %c0_53, %c0_54] : memref<3x16x16xf32, #tpu.memory_space<vmem>>, vector<1x16x16xf32>
    %196 = vector.shape_cast %195 : vector<1x16x16xf32> to vector<16x16xf32>
    %197 = vector.extract_strided_slice %194 {offsets = [0, 0], sizes = [16, 48], strides = [1, 1]} : vector<16x54xf32> to vector<16x48xf32>
    %198 = vector.extract_strided_slice %194 {offsets = [0, 48], sizes = [16, 3], strides = [1, 1]} : vector<16x54xf32> to vector<16x3xf32>
    %199 = vector.extract_strided_slice %194 {offsets = [0, 51], sizes = [16, 3], strides = [1, 1]} : vector<16x54xf32> to vector<16x3xf32>
    %200 = vector.extract_strided_slice %198 {offsets = [0, 0], sizes = [16, 1], strides = [1, 1]} : vector<16x3xf32> to vector<16x1xf32>
    %201 = tpu.transpose %200, [1, 0] : vector<16x1xf32> -> vector<1x16xf32>
    %202 = vector.extract_strided_slice %199 {offsets = [0, 0], sizes = [16, 1], strides = [1, 1]} : vector<16x3xf32> to vector<16x1xf32>
    %203 = vector.broadcast %202 : vector<16x1xf32> to vector<16x16xf32>
    %204 = vector.broadcast %201 : vector<1x16xf32> to vector<16x16xf32>
    %205 = arith.addf %203, %204 : vector<16x16xf32>
    %cst_55 = arith.constant 0.000000e+00 : f32
    %206 = vector.broadcast %cst_55 : f32 to vector<16x16xf32>
    %207 = arith.cmpf oge, %205, %206 : vector<16x16xf32>
    %cst_56 = arith.constant 2.000000e-01 : f32
    %208 = vector.broadcast %cst_56 : f32 to vector<16x16xf32>
    %209 = arith.mulf %208, %205 : vector<16x16xf32>
    %210 = arith.select %207, %205, %209 : vector<16x16xi1>, vector<16x16xf32>
    %211 = arith.addf %210, %196 : vector<16x16xf32>
    %cst_57 = arith.constant dense<0xFF800000> : vector<16xf32>
    %212 = vector.multi_reduction <maximumf>, %211, %cst_57 [1] : vector<16x16xf32> to vector<16xf32>
    %213 = vector.shape_cast %212 : vector<16xf32> to vector<16x1xf32>
    %214 = vector.broadcast %213 : vector<16x1xf32> to vector<16x16xf32>
    %215 = arith.subf %211, %214 : vector<16x16xf32>
    %216 = math.exp %215 : vector<16x16xf32>
    %cst_58 = arith.constant dense<0.000000e+00> : vector<16xf32>
    %217 = vector.multi_reduction <add>, %216, %cst_58 [1] : vector<16x16xf32> to vector<16xf32>
    %218 = vector.shape_cast %217 : vector<16xf32> to vector<16x1xf32>
    %219 = tpu.reciprocal %218 {approx = true} : vector<16x1xf32> -> vector<16x1xf32>
    %220 = vector.broadcast %219 : vector<16x1xf32> to vector<16x16xf32>
    %221 = arith.mulf %216, %220 : vector<16x16xf32>
    %222 = vector.extract_strided_slice %197 {offsets = [0, 0], sizes = [16, 16], strides = [1, 1]} : vector<16x48xf32> to vector<16x16xf32>
    %cst_59 = arith.constant dense<0.000000e+00> : vector<16x16xf32>
    %223 = tpu.matmul %221, %222, %cst_59 {dimension_numbers = #tpu.dot_dimension_numbers<[1], [0], [0], [1], [0, 0, 1, 1], [], []>} : vector<16x16xf32>, vector<16x16xf32>, vector<16x16xf32> -> vector<16x16xf32>
    %224 = vector.extract_strided_slice %198 {offsets = [0, 1], sizes = [16, 1], strides = [1, 1]} : vector<16x3xf32> to vector<16x1xf32>
    %225 = tpu.transpose %224, [1, 0] : vector<16x1xf32> -> vector<1x16xf32>
    %226 = vector.extract_strided_slice %199 {offsets = [0, 1], sizes = [16, 1], strides = [1, 1]} : vector<16x3xf32> to vector<16x1xf32>
    %227 = vector.broadcast %226 : vector<16x1xf32> to vector<16x16xf32>
    %228 = vector.broadcast %225 : vector<1x16xf32> to vector<16x16xf32>
    %229 = arith.addf %227, %228 : vector<16x16xf32>
    %cst_60 = arith.constant 0.000000e+00 : f32
    %230 = vector.broadcast %cst_60 : f32 to vector<16x16xf32>
    %231 = arith.cmpf oge, %229, %230 : vector<16x16xf32>
    %cst_61 = arith.constant 2.000000e-01 : f32
    %232 = vector.broadcast %cst_61 : f32 to vector<16x16xf32>
    %233 = arith.mulf %232, %229 : vector<16x16xf32>
    %234 = arith.select %231, %229, %233 : vector<16x16xi1>, vector<16x16xf32>
    %235 = arith.addf %234, %196 : vector<16x16xf32>
    %cst_62 = arith.constant dense<0xFF800000> : vector<16xf32>
    %236 = vector.multi_reduction <maximumf>, %235, %cst_62 [1] : vector<16x16xf32> to vector<16xf32>
    %237 = vector.shape_cast %236 : vector<16xf32> to vector<16x1xf32>
    %238 = vector.broadcast %237 : vector<16x1xf32> to vector<16x16xf32>
    %239 = arith.subf %235, %238 : vector<16x16xf32>
    %240 = math.exp %239 : vector<16x16xf32>
    %cst_63 = arith.constant dense<0.000000e+00> : vector<16xf32>
    %241 = vector.multi_reduction <add>, %240, %cst_63 [1] : vector<16x16xf32> to vector<16xf32>
    %242 = vector.shape_cast %241 : vector<16xf32> to vector<16x1xf32>
    %243 = tpu.reciprocal %242 {approx = true} : vector<16x1xf32> -> vector<16x1xf32>
    %244 = vector.broadcast %243 : vector<16x1xf32> to vector<16x16xf32>
    %245 = arith.mulf %240, %244 : vector<16x16xf32>
    %246 = vector.extract_strided_slice %197 {offsets = [0, 16], sizes = [16, 16], strides = [1, 1]} : vector<16x48xf32> to vector<16x16xf32>
    %cst_64 = arith.constant dense<0.000000e+00> : vector<16x16xf32>
    %247 = tpu.matmul %245, %246, %cst_64 {dimension_numbers = #tpu.dot_dimension_numbers<[1], [0], [0], [1], [0, 0, 1, 1], [], []>} : vector<16x16xf32>, vector<16x16xf32>, vector<16x16xf32> -> vector<16x16xf32>
    %248 = arith.addf %223, %247 : vector<16x16xf32>
    %249 = vector.extract_strided_slice %198 {offsets = [0, 2], sizes = [16, 1], strides = [1, 1]} : vector<16x3xf32> to vector<16x1xf32>
    %250 = tpu.transpose %249, [1, 0] : vector<16x1xf32> -> vector<1x16xf32>
    %251 = vector.extract_strided_slice %199 {offsets = [0, 2], sizes = [16, 1], strides = [1, 1]} : vector<16x3xf32> to vector<16x1xf32>
    %252 = vector.broadcast %251 : vector<16x1xf32> to vector<16x16xf32>
    %253 = vector.broadcast %250 : vector<1x16xf32> to vector<16x16xf32>
    %254 = arith.addf %252, %253 : vector<16x16xf32>
    %cst_65 = arith.constant 0.000000e+00 : f32
    %255 = vector.broadcast %cst_65 : f32 to vector<16x16xf32>
    %256 = arith.cmpf oge, %254, %255 : vector<16x16xf32>
    %cst_66 = arith.constant 2.000000e-01 : f32
    %257 = vector.broadcast %cst_66 : f32 to vector<16x16xf32>
    %258 = arith.mulf %257, %254 : vector<16x16xf32>
    %259 = arith.select %256, %254, %258 : vector<16x16xi1>, vector<16x16xf32>
    %260 = arith.addf %259, %196 : vector<16x16xf32>
    %cst_67 = arith.constant dense<0xFF800000> : vector<16xf32>
    %261 = vector.multi_reduction <maximumf>, %260, %cst_67 [1] : vector<16x16xf32> to vector<16xf32>
    %262 = vector.shape_cast %261 : vector<16xf32> to vector<16x1xf32>
    %263 = vector.broadcast %262 : vector<16x1xf32> to vector<16x16xf32>
    %264 = arith.subf %260, %263 : vector<16x16xf32>
    %265 = math.exp %264 : vector<16x16xf32>
    %cst_68 = arith.constant dense<0.000000e+00> : vector<16xf32>
    %266 = vector.multi_reduction <add>, %265, %cst_68 [1] : vector<16x16xf32> to vector<16xf32>
    %267 = vector.shape_cast %266 : vector<16xf32> to vector<16x1xf32>
    %268 = tpu.reciprocal %267 {approx = true} : vector<16x1xf32> -> vector<16x1xf32>
    %269 = vector.broadcast %268 : vector<16x1xf32> to vector<16x16xf32>
    %270 = arith.mulf %265, %269 : vector<16x16xf32>
    %271 = vector.extract_strided_slice %197 {offsets = [0, 32], sizes = [16, 16], strides = [1, 1]} : vector<16x48xf32> to vector<16x16xf32>
    %cst_69 = arith.constant dense<0.000000e+00> : vector<16x16xf32>
    %272 = tpu.matmul %270, %271, %cst_69 {dimension_numbers = #tpu.dot_dimension_numbers<[1], [0], [0], [1], [0, 0, 1, 1], [], []>} : vector<16x16xf32>, vector<16x16xf32>, vector<16x16xf32> -> vector<16x16xf32>
    %273 = arith.addf %248, %272 : vector<16x16xf32>
    %274 = arith.addf %273, %192 : vector<16x16xf32>
    %c10 = arith.constant 10 : index
    %c0_70 = arith.constant 0 : index
    %275 = vector.load %arg3[%c10, %c0_70] : memref<16x128xf32, #tpu.memory_space<vmem>>, vector<1x16xf32>
    %276 = vector.broadcast %275 : vector<1x16xf32> to vector<16x16xf32>
    %277 = arith.mulf %274, %276 : vector<16x16xf32>
    %c11 = arith.constant 11 : index
    %c0_71 = arith.constant 0 : index
    %278 = vector.load %arg3[%c11, %c0_71] : memref<16x128xf32, #tpu.memory_space<vmem>>, vector<1x16xf32>
    %279 = vector.broadcast %278 : vector<1x16xf32> to vector<16x16xf32>
    %280 = arith.addf %277, %279 : vector<16x16xf32>
    %cst_72 = arith.constant 0.000000e+00 : f32
    %281 = vector.broadcast %cst_72 : f32 to vector<16x16xf32>
    %282 = arith.cmpf oge, %280, %281 : vector<16x16xf32>
    %cst_73 = arith.constant 0.00999999977 : f32
    %283 = vector.broadcast %cst_73 : f32 to vector<16x16xf32>
    %284 = arith.mulf %283, %280 : vector<16x16xf32>
    %285 = arith.select %282, %280, %284 : vector<16x16xi1>, vector<16x16xf32>
    %286 = tpu.concatenate %6, %99, %192, %285 in 0 : vector<16x16xf32>, vector<16x16xf32>, vector<16x16xf32>, vector<16x16xf32> -> vector<64x16xf32>
    %c40 = arith.constant 40 : index
    %c0_74 = arith.constant 0 : index
    %287 = vector.load %arg2[%c40, %c0_74] : memref<224x128xf32, #tpu.memory_space<vmem>>, vector<16x128xf32>
    %cst_75 = arith.constant dense<0.000000e+00> : vector<64x128xf32>
    %288 = tpu.matmul %286, %287, %cst_75 {dimension_numbers = #tpu.dot_dimension_numbers<[1], [0], [0], [1], [0, 0, 1, 1], [], []>} : vector<64x16xf32>, vector<16x128xf32>, vector<64x128xf32> -> vector<64x128xf32>
    %c1_76 = arith.constant 1 : index
    %c0_77 = arith.constant 0 : index
    %289 = vector.load %arg3[%c1_76, %c0_77] : memref<16x128xf32, #tpu.memory_space<vmem>>, vector<1x128xf32>
    %290 = vector.broadcast %289 : vector<1x128xf32> to vector<64x128xf32>
    %291 = arith.addf %288, %290 : vector<64x128xf32>
    %c56 = arith.constant 56 : index
    %c0_78 = arith.constant 0 : index
    %292 = vector.load %arg2[%c56, %c0_78] : memref<224x128xf32, #tpu.memory_space<vmem>>, vector<16x128xf32>
    %cst_79 = arith.constant dense<0.000000e+00> : vector<64x128xf32>
    %293 = tpu.matmul %286, %292, %cst_79 {dimension_numbers = #tpu.dot_dimension_numbers<[1], [0], [0], [1], [0, 0, 1, 1], [], []>} : vector<64x16xf32>, vector<16x128xf32>, vector<64x128xf32> -> vector<64x128xf32>
    %c2_80 = arith.constant 2 : index
    %c0_81 = arith.constant 0 : index
    %294 = vector.load %arg3[%c2_80, %c0_81] : memref<16x128xf32, #tpu.memory_space<vmem>>, vector<1x128xf32>
    %295 = vector.broadcast %294 : vector<1x128xf32> to vector<64x128xf32>
    %296 = arith.addf %293, %295 : vector<64x128xf32>
    %c72 = arith.constant 72 : index
    %c0_82 = arith.constant 0 : index
    %297 = vector.load %arg2[%c72, %c0_82] : memref<224x128xf32, #tpu.memory_space<vmem>>, vector<32x128xf32>
    %cst_83 = arith.constant 0.000000e+00 : f32
    %298 = vector.broadcast %cst_83 : f32 to vector<16x32xf32>
    %cst_84 = arith.constant 0.000000e+00 : f32
    %299 = vector.broadcast %cst_84 : f32 to vector<16x32xf32>
    %300 = vector.extract_strided_slice %291 {offsets = [0, 0], sizes = [16, 128], strides = [1, 1]} : vector<64x128xf32> to vector<16x128xf32>
    %cst_85 = arith.constant dense<0.000000e+00> : vector<16x128xf32>
    %301 = tpu.matmul %298, %297, %cst_85 {dimension_numbers = #tpu.dot_dimension_numbers<[1], [0], [0], [1], [0, 0, 1, 1], [], []>} : vector<16x32xf32>, vector<32x128xf32>, vector<16x128xf32> -> vector<16x128xf32>
    %302 = arith.addf %300, %301 : vector<16x128xf32>
    %303 = vector.extract_strided_slice %302 {offsets = [0, 0], sizes = [16, 32], strides = [1, 1]} : vector<16x128xf32> to vector<16x32xf32>
    %304 = arith.negf %303 : vector<16x32xf32>
    %305 = math.exp %304 : vector<16x32xf32>
    %cst_86 = arith.constant 1.000000e+00 : f32
    %306 = vector.broadcast %cst_86 : f32 to vector<16x32xf32>
    %307 = arith.addf %306, %305 : vector<16x32xf32>
    %308 = arith.divf %306, %307 : vector<16x32xf32>
    %309 = vector.extract_strided_slice %302 {offsets = [0, 32], sizes = [16, 32], strides = [1, 1]} : vector<16x128xf32> to vector<16x32xf32>
    %310 = arith.negf %309 : vector<16x32xf32>
    %311 = math.exp %310 : vector<16x32xf32>
    %cst_87 = arith.constant 1.000000e+00 : f32
    %312 = vector.broadcast %cst_87 : f32 to vector<16x32xf32>
    %313 = arith.addf %312, %311 : vector<16x32xf32>
    %314 = arith.divf %312, %313 : vector<16x32xf32>
    %315 = vector.extract_strided_slice %302 {offsets = [0, 64], sizes = [16, 32], strides = [1, 1]} : vector<16x128xf32> to vector<16x32xf32>
    %316 = math.tanh %315 : vector<16x32xf32>
    %317 = vector.extract_strided_slice %302 {offsets = [0, 96], sizes = [16, 32], strides = [1, 1]} : vector<16x128xf32> to vector<16x32xf32>
    %318 = arith.negf %317 : vector<16x32xf32>
    %319 = math.exp %318 : vector<16x32xf32>
    %cst_88 = arith.constant 1.000000e+00 : f32
    %320 = vector.broadcast %cst_88 : f32 to vector<16x32xf32>
    %321 = arith.addf %320, %319 : vector<16x32xf32>
    %322 = arith.divf %320, %321 : vector<16x32xf32>
    %323 = arith.mulf %314, %299 : vector<16x32xf32>
    %324 = arith.mulf %308, %316 : vector<16x32xf32>
    %325 = arith.addf %323, %324 : vector<16x32xf32>
    %326 = math.tanh %325 : vector<16x32xf32>
    %327 = arith.mulf %322, %326 : vector<16x32xf32>
    %328 = vector.extract_strided_slice %291 {offsets = [16, 0], sizes = [16, 128], strides = [1, 1]} : vector<64x128xf32> to vector<16x128xf32>
    %cst_89 = arith.constant dense<0.000000e+00> : vector<16x128xf32>
    %329 = tpu.matmul %327, %297, %cst_89 {dimension_numbers = #tpu.dot_dimension_numbers<[1], [0], [0], [1], [0, 0, 1, 1], [], []>} : vector<16x32xf32>, vector<32x128xf32>, vector<16x128xf32> -> vector<16x128xf32>
    %330 = arith.addf %328, %329 : vector<16x128xf32>
    %331 = vector.extract_strided_slice %330 {offsets = [0, 0], sizes = [16, 32], strides = [1, 1]} : vector<16x128xf32> to vector<16x32xf32>
    %332 = arith.negf %331 : vector<16x32xf32>
    %333 = math.exp %332 : vector<16x32xf32>
    %cst_90 = arith.constant 1.000000e+00 : f32
    %334 = vector.broadcast %cst_90 : f32 to vector<16x32xf32>
    %335 = arith.addf %334, %333 : vector<16x32xf32>
    %336 = arith.divf %334, %335 : vector<16x32xf32>
    %337 = vector.extract_strided_slice %330 {offsets = [0, 32], sizes = [16, 32], strides = [1, 1]} : vector<16x128xf32> to vector<16x32xf32>
    %338 = arith.negf %337 : vector<16x32xf32>
    %339 = math.exp %338 : vector<16x32xf32>
    %cst_91 = arith.constant 1.000000e+00 : f32
    %340 = vector.broadcast %cst_91 : f32 to vector<16x32xf32>
    %341 = arith.addf %340, %339 : vector<16x32xf32>
    %342 = arith.divf %340, %341 : vector<16x32xf32>
    %343 = vector.extract_strided_slice %330 {offsets = [0, 64], sizes = [16, 32], strides = [1, 1]} : vector<16x128xf32> to vector<16x32xf32>
    %344 = math.tanh %343 : vector<16x32xf32>
    %345 = vector.extract_strided_slice %330 {offsets = [0, 96], sizes = [16, 32], strides = [1, 1]} : vector<16x128xf32> to vector<16x32xf32>
    %346 = arith.negf %345 : vector<16x32xf32>
    %347 = math.exp %346 : vector<16x32xf32>
    %cst_92 = arith.constant 1.000000e+00 : f32
    %348 = vector.broadcast %cst_92 : f32 to vector<16x32xf32>
    %349 = arith.addf %348, %347 : vector<16x32xf32>
    %350 = arith.divf %348, %349 : vector<16x32xf32>
    %351 = arith.mulf %342, %325 : vector<16x32xf32>
    %352 = arith.mulf %336, %344 : vector<16x32xf32>
    %353 = arith.addf %351, %352 : vector<16x32xf32>
    %354 = math.tanh %353 : vector<16x32xf32>
    %355 = arith.mulf %350, %354 : vector<16x32xf32>
    %356 = vector.extract_strided_slice %291 {offsets = [32, 0], sizes = [16, 128], strides = [1, 1]} : vector<64x128xf32> to vector<16x128xf32>
    %cst_93 = arith.constant dense<0.000000e+00> : vector<16x128xf32>
    %357 = tpu.matmul %355, %297, %cst_93 {dimension_numbers = #tpu.dot_dimension_numbers<[1], [0], [0], [1], [0, 0, 1, 1], [], []>} : vector<16x32xf32>, vector<32x128xf32>, vector<16x128xf32> -> vector<16x128xf32>
    %358 = arith.addf %356, %357 : vector<16x128xf32>
    %359 = vector.extract_strided_slice %358 {offsets = [0, 0], sizes = [16, 32], strides = [1, 1]} : vector<16x128xf32> to vector<16x32xf32>
    %360 = arith.negf %359 : vector<16x32xf32>
    %361 = math.exp %360 : vector<16x32xf32>
    %cst_94 = arith.constant 1.000000e+00 : f32
    %362 = vector.broadcast %cst_94 : f32 to vector<16x32xf32>
    %363 = arith.addf %362, %361 : vector<16x32xf32>
    %364 = arith.divf %362, %363 : vector<16x32xf32>
    %365 = vector.extract_strided_slice %358 {offsets = [0, 32], sizes = [16, 32], strides = [1, 1]} : vector<16x128xf32> to vector<16x32xf32>
    %366 = arith.negf %365 : vector<16x32xf32>
    %367 = math.exp %366 : vector<16x32xf32>
    %cst_95 = arith.constant 1.000000e+00 : f32
    %368 = vector.broadcast %cst_95 : f32 to vector<16x32xf32>
    %369 = arith.addf %368, %367 : vector<16x32xf32>
    %370 = arith.divf %368, %369 : vector<16x32xf32>
    %371 = vector.extract_strided_slice %358 {offsets = [0, 64], sizes = [16, 32], strides = [1, 1]} : vector<16x128xf32> to vector<16x32xf32>
    %372 = math.tanh %371 : vector<16x32xf32>
    %373 = vector.extract_strided_slice %358 {offsets = [0, 96], sizes = [16, 32], strides = [1, 1]} : vector<16x128xf32> to vector<16x32xf32>
    %374 = arith.negf %373 : vector<16x32xf32>
    %375 = math.exp %374 : vector<16x32xf32>
    %cst_96 = arith.constant 1.000000e+00 : f32
    %376 = vector.broadcast %cst_96 : f32 to vector<16x32xf32>
    %377 = arith.addf %376, %375 : vector<16x32xf32>
    %378 = arith.divf %376, %377 : vector<16x32xf32>
    %379 = arith.mulf %370, %353 : vector<16x32xf32>
    %380 = arith.mulf %364, %372 : vector<16x32xf32>
    %381 = arith.addf %379, %380 : vector<16x32xf32>
    %382 = math.tanh %381 : vector<16x32xf32>
    %383 = arith.mulf %378, %382 : vector<16x32xf32>
    %384 = vector.extract_strided_slice %291 {offsets = [48, 0], sizes = [16, 128], strides = [1, 1]} : vector<64x128xf32> to vector<16x128xf32>
    %cst_97 = arith.constant dense<0.000000e+00> : vector<16x128xf32>
    %385 = tpu.matmul %383, %297, %cst_97 {dimension_numbers = #tpu.dot_dimension_numbers<[1], [0], [0], [1], [0, 0, 1, 1], [], []>} : vector<16x32xf32>, vector<32x128xf32>, vector<16x128xf32> -> vector<16x128xf32>
    %386 = arith.addf %384, %385 : vector<16x128xf32>
    %387 = vector.extract_strided_slice %386 {offsets = [0, 0], sizes = [16, 32], strides = [1, 1]} : vector<16x128xf32> to vector<16x32xf32>
    %388 = arith.negf %387 : vector<16x32xf32>
    %389 = math.exp %388 : vector<16x32xf32>
    %cst_98 = arith.constant 1.000000e+00 : f32
    %390 = vector.broadcast %cst_98 : f32 to vector<16x32xf32>
    %391 = arith.addf %390, %389 : vector<16x32xf32>
    %392 = arith.divf %390, %391 : vector<16x32xf32>
    %393 = vector.extract_strided_slice %386 {offsets = [0, 32], sizes = [16, 32], strides = [1, 1]} : vector<16x128xf32> to vector<16x32xf32>
    %394 = arith.negf %393 : vector<16x32xf32>
    %395 = math.exp %394 : vector<16x32xf32>
    %cst_99 = arith.constant 1.000000e+00 : f32
    %396 = vector.broadcast %cst_99 : f32 to vector<16x32xf32>
    %397 = arith.addf %396, %395 : vector<16x32xf32>
    %398 = arith.divf %396, %397 : vector<16x32xf32>
    %399 = vector.extract_strided_slice %386 {offsets = [0, 64], sizes = [16, 32], strides = [1, 1]} : vector<16x128xf32> to vector<16x32xf32>
    %400 = math.tanh %399 : vector<16x32xf32>
    %401 = vector.extract_strided_slice %386 {offsets = [0, 96], sizes = [16, 32], strides = [1, 1]} : vector<16x128xf32> to vector<16x32xf32>
    %402 = arith.negf %401 : vector<16x32xf32>
    %403 = math.exp %402 : vector<16x32xf32>
    %cst_100 = arith.constant 1.000000e+00 : f32
    %404 = vector.broadcast %cst_100 : f32 to vector<16x32xf32>
    %405 = arith.addf %404, %403 : vector<16x32xf32>
    %406 = arith.divf %404, %405 : vector<16x32xf32>
    %407 = arith.mulf %398, %381 : vector<16x32xf32>
    %408 = arith.mulf %392, %400 : vector<16x32xf32>
    %409 = arith.addf %407, %408 : vector<16x32xf32>
    %410 = math.tanh %409 : vector<16x32xf32>
    %411 = arith.mulf %406, %410 : vector<16x32xf32>
    %c104 = arith.constant 104 : index
    %c0_101 = arith.constant 0 : index
    %412 = vector.load %arg2[%c104, %c0_101] : memref<224x128xf32, #tpu.memory_space<vmem>>, vector<32x128xf32>
    %cst_102 = arith.constant 0.000000e+00 : f32
    %413 = vector.broadcast %cst_102 : f32 to vector<16x32xf32>
    %cst_103 = arith.constant 0.000000e+00 : f32
    %414 = vector.broadcast %cst_103 : f32 to vector<16x32xf32>
    %415 = vector.extract_strided_slice %296 {offsets = [48, 0], sizes = [16, 128], strides = [1, 1]} : vector<64x128xf32> to vector<16x128xf32>
    %cst_104 = arith.constant dense<0.000000e+00> : vector<16x128xf32>
    %416 = tpu.matmul %413, %412, %cst_104 {dimension_numbers = #tpu.dot_dimension_numbers<[1], [0], [0], [1], [0, 0, 1, 1], [], []>} : vector<16x32xf32>, vector<32x128xf32>, vector<16x128xf32> -> vector<16x128xf32>
    %417 = arith.addf %415, %416 : vector<16x128xf32>
    %418 = vector.extract_strided_slice %417 {offsets = [0, 0], sizes = [16, 32], strides = [1, 1]} : vector<16x128xf32> to vector<16x32xf32>
    %419 = arith.negf %418 : vector<16x32xf32>
    %420 = math.exp %419 : vector<16x32xf32>
    %cst_105 = arith.constant 1.000000e+00 : f32
    %421 = vector.broadcast %cst_105 : f32 to vector<16x32xf32>
    %422 = arith.addf %421, %420 : vector<16x32xf32>
    %423 = arith.divf %421, %422 : vector<16x32xf32>
    %424 = vector.extract_strided_slice %417 {offsets = [0, 32], sizes = [16, 32], strides = [1, 1]} : vector<16x128xf32> to vector<16x32xf32>
    %425 = arith.negf %424 : vector<16x32xf32>
    %426 = math.exp %425 : vector<16x32xf32>
    %cst_106 = arith.constant 1.000000e+00 : f32
    %427 = vector.broadcast %cst_106 : f32 to vector<16x32xf32>
    %428 = arith.addf %427, %426 : vector<16x32xf32>
    %429 = arith.divf %427, %428 : vector<16x32xf32>
    %430 = vector.extract_strided_slice %417 {offsets = [0, 64], sizes = [16, 32], strides = [1, 1]} : vector<16x128xf32> to vector<16x32xf32>
    %431 = math.tanh %430 : vector<16x32xf32>
    %432 = vector.extract_strided_slice %417 {offsets = [0, 96], sizes = [16, 32], strides = [1, 1]} : vector<16x128xf32> to vector<16x32xf32>
    %433 = arith.negf %432 : vector<16x32xf32>
    %434 = math.exp %433 : vector<16x32xf32>
    %cst_107 = arith.constant 1.000000e+00 : f32
    %435 = vector.broadcast %cst_107 : f32 to vector<16x32xf32>
    %436 = arith.addf %435, %434 : vector<16x32xf32>
    %437 = arith.divf %435, %436 : vector<16x32xf32>
    %438 = arith.mulf %429, %414 : vector<16x32xf32>
    %439 = arith.mulf %423, %431 : vector<16x32xf32>
    %440 = arith.addf %438, %439 : vector<16x32xf32>
    %441 = math.tanh %440 : vector<16x32xf32>
    %442 = arith.mulf %437, %441 : vector<16x32xf32>
    %443 = vector.extract_strided_slice %296 {offsets = [32, 0], sizes = [16, 128], strides = [1, 1]} : vector<64x128xf32> to vector<16x128xf32>
    %cst_108 = arith.constant dense<0.000000e+00> : vector<16x128xf32>
    %444 = tpu.matmul %442, %412, %cst_108 {dimension_numbers = #tpu.dot_dimension_numbers<[1], [0], [0], [1], [0, 0, 1, 1], [], []>} : vector<16x32xf32>, vector<32x128xf32>, vector<16x128xf32> -> vector<16x128xf32>
    %445 = arith.addf %443, %444 : vector<16x128xf32>
    %446 = vector.extract_strided_slice %445 {offsets = [0, 0], sizes = [16, 32], strides = [1, 1]} : vector<16x128xf32> to vector<16x32xf32>
    %447 = arith.negf %446 : vector<16x32xf32>
    %448 = math.exp %447 : vector<16x32xf32>
    %cst_109 = arith.constant 1.000000e+00 : f32
    %449 = vector.broadcast %cst_109 : f32 to vector<16x32xf32>
    %450 = arith.addf %449, %448 : vector<16x32xf32>
    %451 = arith.divf %449, %450 : vector<16x32xf32>
    %452 = vector.extract_strided_slice %445 {offsets = [0, 32], sizes = [16, 32], strides = [1, 1]} : vector<16x128xf32> to vector<16x32xf32>
    %453 = arith.negf %452 : vector<16x32xf32>
    %454 = math.exp %453 : vector<16x32xf32>
    %cst_110 = arith.constant 1.000000e+00 : f32
    %455 = vector.broadcast %cst_110 : f32 to vector<16x32xf32>
    %456 = arith.addf %455, %454 : vector<16x32xf32>
    %457 = arith.divf %455, %456 : vector<16x32xf32>
    %458 = vector.extract_strided_slice %445 {offsets = [0, 64], sizes = [16, 32], strides = [1, 1]} : vector<16x128xf32> to vector<16x32xf32>
    %459 = math.tanh %458 : vector<16x32xf32>
    %460 = vector.extract_strided_slice %445 {offsets = [0, 96], sizes = [16, 32], strides = [1, 1]} : vector<16x128xf32> to vector<16x32xf32>
    %461 = arith.negf %460 : vector<16x32xf32>
    %462 = math.exp %461 : vector<16x32xf32>
    %cst_111 = arith.constant 1.000000e+00 : f32
    %463 = vector.broadcast %cst_111 : f32 to vector<16x32xf32>
    %464 = arith.addf %463, %462 : vector<16x32xf32>
    %465 = arith.divf %463, %464 : vector<16x32xf32>
    %466 = arith.mulf %457, %440 : vector<16x32xf32>
    %467 = arith.mulf %451, %459 : vector<16x32xf32>
    %468 = arith.addf %466, %467 : vector<16x32xf32>
    %469 = math.tanh %468 : vector<16x32xf32>
    %470 = arith.mulf %465, %469 : vector<16x32xf32>
    %471 = vector.extract_strided_slice %296 {offsets = [16, 0], sizes = [16, 128], strides = [1, 1]} : vector<64x128xf32> to vector<16x128xf32>
    %cst_112 = arith.constant dense<0.000000e+00> : vector<16x128xf32>
    %472 = tpu.matmul %470, %412, %cst_112 {dimension_numbers = #tpu.dot_dimension_numbers<[1], [0], [0], [1], [0, 0, 1, 1], [], []>} : vector<16x32xf32>, vector<32x128xf32>, vector<16x128xf32> -> vector<16x128xf32>
    %473 = arith.addf %471, %472 : vector<16x128xf32>
    %474 = vector.extract_strided_slice %473 {offsets = [0, 0], sizes = [16, 32], strides = [1, 1]} : vector<16x128xf32> to vector<16x32xf32>
    %475 = arith.negf %474 : vector<16x32xf32>
    %476 = math.exp %475 : vector<16x32xf32>
    %cst_113 = arith.constant 1.000000e+00 : f32
    %477 = vector.broadcast %cst_113 : f32 to vector<16x32xf32>
    %478 = arith.addf %477, %476 : vector<16x32xf32>
    %479 = arith.divf %477, %478 : vector<16x32xf32>
    %480 = vector.extract_strided_slice %473 {offsets = [0, 32], sizes = [16, 32], strides = [1, 1]} : vector<16x128xf32> to vector<16x32xf32>
    %481 = arith.negf %480 : vector<16x32xf32>
    %482 = math.exp %481 : vector<16x32xf32>
    %cst_114 = arith.constant 1.000000e+00 : f32
    %483 = vector.broadcast %cst_114 : f32 to vector<16x32xf32>
    %484 = arith.addf %483, %482 : vector<16x32xf32>
    %485 = arith.divf %483, %484 : vector<16x32xf32>
    %486 = vector.extract_strided_slice %473 {offsets = [0, 64], sizes = [16, 32], strides = [1, 1]} : vector<16x128xf32> to vector<16x32xf32>
    %487 = math.tanh %486 : vector<16x32xf32>
    %488 = vector.extract_strided_slice %473 {offsets = [0, 96], sizes = [16, 32], strides = [1, 1]} : vector<16x128xf32> to vector<16x32xf32>
    %489 = arith.negf %488 : vector<16x32xf32>
    %490 = math.exp %489 : vector<16x32xf32>
    %cst_115 = arith.constant 1.000000e+00 : f32
    %491 = vector.broadcast %cst_115 : f32 to vector<16x32xf32>
    %492 = arith.addf %491, %490 : vector<16x32xf32>
    %493 = arith.divf %491, %492 : vector<16x32xf32>
    %494 = arith.mulf %485, %468 : vector<16x32xf32>
    %495 = arith.mulf %479, %487 : vector<16x32xf32>
    %496 = arith.addf %494, %495 : vector<16x32xf32>
    %497 = math.tanh %496 : vector<16x32xf32>
    %498 = arith.mulf %493, %497 : vector<16x32xf32>
    %499 = vector.extract_strided_slice %296 {offsets = [0, 0], sizes = [16, 128], strides = [1, 1]} : vector<64x128xf32> to vector<16x128xf32>
    %cst_116 = arith.constant dense<0.000000e+00> : vector<16x128xf32>
    %500 = tpu.matmul %498, %412, %cst_116 {dimension_numbers = #tpu.dot_dimension_numbers<[1], [0], [0], [1], [0, 0, 1, 1], [], []>} : vector<16x32xf32>, vector<32x128xf32>, vector<16x128xf32> -> vector<16x128xf32>
    %501 = arith.addf %499, %500 : vector<16x128xf32>
    %502 = vector.extract_strided_slice %501 {offsets = [0, 0], sizes = [16, 32], strides = [1, 1]} : vector<16x128xf32> to vector<16x32xf32>
    %503 = arith.negf %502 : vector<16x32xf32>
    %504 = math.exp %503 : vector<16x32xf32>
    %cst_117 = arith.constant 1.000000e+00 : f32
    %505 = vector.broadcast %cst_117 : f32 to vector<16x32xf32>
    %506 = arith.addf %505, %504 : vector<16x32xf32>
    %507 = arith.divf %505, %506 : vector<16x32xf32>
    %508 = vector.extract_strided_slice %501 {offsets = [0, 32], sizes = [16, 32], strides = [1, 1]} : vector<16x128xf32> to vector<16x32xf32>
    %509 = arith.negf %508 : vector<16x32xf32>
    %510 = math.exp %509 : vector<16x32xf32>
    %cst_118 = arith.constant 1.000000e+00 : f32
    %511 = vector.broadcast %cst_118 : f32 to vector<16x32xf32>
    %512 = arith.addf %511, %510 : vector<16x32xf32>
    %513 = arith.divf %511, %512 : vector<16x32xf32>
    %514 = vector.extract_strided_slice %501 {offsets = [0, 64], sizes = [16, 32], strides = [1, 1]} : vector<16x128xf32> to vector<16x32xf32>
    %515 = math.tanh %514 : vector<16x32xf32>
    %516 = vector.extract_strided_slice %501 {offsets = [0, 96], sizes = [16, 32], strides = [1, 1]} : vector<16x128xf32> to vector<16x32xf32>
    %517 = arith.negf %516 : vector<16x32xf32>
    %518 = math.exp %517 : vector<16x32xf32>
    %cst_119 = arith.constant 1.000000e+00 : f32
    %519 = vector.broadcast %cst_119 : f32 to vector<16x32xf32>
    %520 = arith.addf %519, %518 : vector<16x32xf32>
    %521 = arith.divf %519, %520 : vector<16x32xf32>
    %522 = arith.mulf %513, %496 : vector<16x32xf32>
    %523 = arith.mulf %507, %515 : vector<16x32xf32>
    %524 = arith.addf %522, %523 : vector<16x32xf32>
    %525 = math.tanh %524 : vector<16x32xf32>
    %526 = arith.mulf %521, %525 : vector<16x32xf32>
    %527 = tpu.concatenate %327, %355, %383, %411 in 0 : vector<16x32xf32>, vector<16x32xf32>, vector<16x32xf32>, vector<16x32xf32> -> vector<64x32xf32>
    %528 = tpu.concatenate %526, %498, %470, %442 in 0 : vector<16x32xf32>, vector<16x32xf32>, vector<16x32xf32>, vector<16x32xf32> -> vector<64x32xf32>
    %c136 = arith.constant 136 : index
    %c0_120 = arith.constant 0 : index
    %529 = vector.load %arg2[%c136, %c0_120] : memref<224x128xf32, #tpu.memory_space<vmem>>, vector<32x1xf32>
    %cst_121 = arith.constant dense<0.000000e+00> : vector<64x1xf32>
    %530 = tpu.matmul %527, %529, %cst_121 {dimension_numbers = #tpu.dot_dimension_numbers<[1], [0], [0], [1], [0, 0, 1, 1], [], []>} : vector<64x32xf32>, vector<32x1xf32>, vector<64x1xf32> -> vector<64x1xf32>
    %c168 = arith.constant 168 : index
    %c0_122 = arith.constant 0 : index
    %531 = vector.load %arg2[%c168, %c0_122] : memref<224x128xf32, #tpu.memory_space<vmem>>, vector<32x1xf32>
    %cst_123 = arith.constant dense<0.000000e+00> : vector<64x1xf32>
    %532 = tpu.matmul %528, %531, %cst_123 {dimension_numbers = #tpu.dot_dimension_numbers<[1], [0], [0], [1], [0, 0, 1, 1], [], []>} : vector<64x32xf32>, vector<32x1xf32>, vector<64x1xf32> -> vector<64x1xf32>
    %533 = arith.addf %530, %532 : vector<64x1xf32>
    %c3 = arith.constant 3 : index
    %c0_124 = arith.constant 0 : index
    %534 = vector.load %arg3[%c3, %c0_124] : memref<16x128xf32, #tpu.memory_space<vmem>>, vector<1x1xf32>
    %535 = vector.broadcast %534 : vector<1x1xf32> to vector<64x1xf32>
    %536 = arith.addf %533, %535 : vector<64x1xf32>
    %537 = vector.extract_strided_slice %536 {offsets = [0, 0], sizes = [16, 1], strides = [1, 1]} : vector<64x1xf32> to vector<16x1xf32>
    %538 = vector.extract_strided_slice %536 {offsets = [16, 0], sizes = [16, 1], strides = [1, 1]} : vector<64x1xf32> to vector<16x1xf32>
    %539 = vector.extract_strided_slice %536 {offsets = [32, 0], sizes = [16, 1], strides = [1, 1]} : vector<64x1xf32> to vector<16x1xf32>
    %540 = vector.extract_strided_slice %536 {offsets = [48, 0], sizes = [16, 1], strides = [1, 1]} : vector<64x1xf32> to vector<16x1xf32>
    %541 = arith.maximumf %537, %538 : vector<16x1xf32>
    %542 = arith.maximumf %541, %539 : vector<16x1xf32>
    %543 = arith.maximumf %542, %540 : vector<16x1xf32>
    %544 = arith.subf %537, %543 : vector<16x1xf32>
    %545 = math.exp %544 : vector<16x1xf32>
    %546 = arith.subf %538, %543 : vector<16x1xf32>
    %547 = math.exp %546 : vector<16x1xf32>
    %548 = arith.subf %539, %543 : vector<16x1xf32>
    %549 = math.exp %548 : vector<16x1xf32>
    %550 = arith.subf %540, %543 : vector<16x1xf32>
    %551 = math.exp %550 : vector<16x1xf32>
    %552 = arith.addf %545, %547 : vector<16x1xf32>
    %553 = arith.addf %552, %549 : vector<16x1xf32>
    %554 = arith.addf %553, %551 : vector<16x1xf32>
    %555 = tpu.reciprocal %554 {approx = true} : vector<16x1xf32> -> vector<16x1xf32>
    %556 = vector.broadcast %545 : vector<16x1xf32> to vector<16x16xf32>
    %557 = arith.mulf %556, %6 : vector<16x16xf32>
    %558 = vector.broadcast %547 : vector<16x1xf32> to vector<16x16xf32>
    %559 = arith.mulf %558, %99 : vector<16x16xf32>
    %560 = arith.addf %557, %559 : vector<16x16xf32>
    %561 = vector.broadcast %549 : vector<16x1xf32> to vector<16x16xf32>
    %562 = arith.mulf %561, %192 : vector<16x16xf32>
    %563 = arith.addf %560, %562 : vector<16x16xf32>
    %564 = vector.broadcast %551 : vector<16x1xf32> to vector<16x16xf32>
    %565 = arith.mulf %564, %285 : vector<16x16xf32>
    %566 = arith.addf %563, %565 : vector<16x16xf32>
    %567 = vector.broadcast %555 : vector<16x1xf32> to vector<16x16xf32>
    %568 = arith.mulf %566, %567 : vector<16x16xf32>
    %c200 = arith.constant 200 : index
    %c0_125 = arith.constant 0 : index
    %569 = vector.load %arg2[%c200, %c0_125] : memref<224x128xf32, #tpu.memory_space<vmem>>, vector<16x8xf32>
    %cst_126 = arith.constant dense<0.000000e+00> : vector<16x8xf32>
    %570 = tpu.matmul %568, %569, %cst_126 {dimension_numbers = #tpu.dot_dimension_numbers<[1], [0], [0], [1], [0, 0, 1, 1], [], []>} : vector<16x16xf32>, vector<16x8xf32>, vector<16x8xf32> -> vector<16x8xf32>
    %c4 = arith.constant 4 : index
    %c0_127 = arith.constant 0 : index
    %571 = vector.load %arg3[%c4, %c0_127] : memref<16x128xf32, #tpu.memory_space<vmem>>, vector<1x8xf32>
    %572 = vector.broadcast %571 : vector<1x8xf32> to vector<16x8xf32>
    %573 = arith.addf %570, %572 : vector<16x8xf32>
    %cst_128 = arith.constant 0.000000e+00 : f32
    %574 = vector.broadcast %cst_128 : f32 to vector<16x8xf32>
    %575 = arith.cmpf oge, %573, %574 : vector<16x8xf32>
    %cst_129 = arith.constant 0.00999999977 : f32
    %576 = vector.broadcast %cst_129 : f32 to vector<16x8xf32>
    %577 = arith.mulf %576, %573 : vector<16x8xf32>
    %578 = arith.select %575, %573, %577 : vector<16x8xi1>, vector<16x8xf32>
    %c12 = arith.constant 12 : index
    %c0_130 = arith.constant 0 : index
    %579 = vector.load %arg3[%c12, %c0_130] : memref<16x128xf32, #tpu.memory_space<vmem>>, vector<1x8xf32>
    %580 = vector.broadcast %579 : vector<1x8xf32> to vector<16x8xf32>
    %581 = arith.mulf %578, %580 : vector<16x8xf32>
    %c13 = arith.constant 13 : index
    %c0_131 = arith.constant 0 : index
    %582 = vector.load %arg3[%c13, %c0_131] : memref<16x128xf32, #tpu.memory_space<vmem>>, vector<1x8xf32>
    %583 = vector.broadcast %582 : vector<1x8xf32> to vector<16x8xf32>
    %584 = arith.addf %581, %583 : vector<16x8xf32>
    %c216 = arith.constant 216 : index
    %c0_132 = arith.constant 0 : index
    %585 = vector.load %arg2[%c216, %c0_132] : memref<224x128xf32, #tpu.memory_space<vmem>>, vector<8x128xf32>
    %cst_133 = arith.constant dense<0.000000e+00> : vector<16x128xf32>
    %586 = tpu.matmul %584, %585, %cst_133 {dimension_numbers = #tpu.dot_dimension_numbers<[1], [0], [0], [1], [0, 0, 1, 1], [], []>} : vector<16x8xf32>, vector<8x128xf32>, vector<16x128xf32> -> vector<16x128xf32>
    %c5 = arith.constant 5 : index
    %c0_134 = arith.constant 0 : index
    %587 = vector.load %arg3[%c5, %c0_134] : memref<16x128xf32, #tpu.memory_space<vmem>>, vector<1x128xf32>
    %588 = vector.broadcast %587 : vector<1x128xf32> to vector<16x128xf32>
    %589 = arith.addf %586, %588 : vector<16x128xf32>
    %c0_135 = arith.constant 0 : index
    %c0_136 = arith.constant 0 : index
    %590 = vector.load %arg4[%c0_135, %c0_136] : memref<16x128xf32, #tpu.memory_space<vmem>>, vector<16x128xf32>
    tpu.vector_store %arg4[%c0_135, %c0_136], %589 {strides = array<i32>} : memref<16x128xf32, #tpu.memory_space<vmem>>, vector<16x128xf32>,
    return
  }
}

</mosaic_0001>

<bundles_post_ra>
// kernel: tpu_custom_call.1
= control target key start
LH: loop header
LB: loop body
LE: loop exit
PB: predicated region body
PF: predicated region fallthrough
CT: control target
= control target key end

     0   :  { %9 = vsyncpa [#allocation3], 0  ;;  %s5544_s0 = inlined_call_operand.vmem [shape: f32[16,3], index: 0, kind: input, shape index: {}]   ;;  %s5545_s1 = inlined_call_operand.hbm [shape: f32[3,16,16], index: 1, kind: input, shape index: {}]   ;;  %s5546_s2 = inlined_call_operand.hbm [shape: f32[224,128], index: 2, kind: input, shape index: {}]   ;;  %s5547_s3 = inlined_call_operand.vmem [shape: f32[16,128], index: 3, kind: input, shape index: {}]   ;;  %s5548_s4 = inlined_call_operand.hbm [shape: f32[16,128], index: 4, kind: output, shape index: {}]  }
   0x1   :  { %10 = vsyncpa [#allocation6], 0 }
   0x2   :  { %11 = vsyncpa [#allocation4], 0  ;;  %s4906_s15 = smov [#allocation2]   ;;  %s4834_s19 = scalar_lea.hbm %s5545_s1, 768 }
   0x3   :  { %s19_s16 = sshll.u32 %s4906_s15, 4  ;;  %p4835_p0 = scmp.ne.s32.totalorder %s5545_s1, %s4834_s19  ;;  %s20_s16 = int_to_ptr.vmem [resolvable:$true] %s19_s16 }
   0x4   :  { %p4838_p1 = scmp.lt.u32.totalorder %s4834_s19, %s5545_s1 }
   0x6   :  { %p4840_p2 = pnand %p4838_p1, %p4835_p0 }
   0x8   :  { %4843 = shalt.err (!%p4840_p2)
}
   0x9   :  { %s4844_s24 = scalar_lea.vmem %s20_s16, 768  ;;  %p4849_p4 = scmp.lt.s32.totalorder %s20_s16, %s20_s16 }
   0xa   :  { %p4845_p3 = scmp.ne.s32.totalorder %s20_s16, %s4844_s24  ;;  %p4850_p5 = scmp.lt.s32.totalorder %s4844_s24, %s4844_s24 }
   0xc   :  { %p4851_p6 = por %p4850_p5, %p4849_p4 }
   0xe   :  { %p4852_p7 = pnand %p4851_p6, %p4845_p3 }
  0x10   :  { %4855 = shalt.err (!%p4852_p7)
}
  0x11   :  { %s4907_s25 = smov 128   ;;  %s4908_s26 = smov 8  }
  0x12   :  { %25 = dma.hbm_to_vmem [thread:$0]  %s5545_s1, 768, %s20_s16, [#allocation3], %s4907_s25, %s4907_s25, %s4908_s26  }
  0x13   :  { %s4909_s29 = smov [#allocation5]   ;;  %s4856_s7 = scalar_lea.hbm %s5546_s2, 3584 }
  0x14   :  { %s31_s30 = sshll.u32 %s4909_s29, 4  ;;  %p4857_p8 = scmp.ne.s32.totalorder %s5546_s2, %s4856_s7  ;;  %s32_s30 = int_to_ptr.vmem [resolvable:$true] %s31_s30 }
  0x15   :  { %p4860_p9 = scmp.lt.u32.totalorder %s4856_s7, %s5546_s2 }
  0x17   :  { %p4862_p10 = pnand %p4860_p9, %p4857_p8 }
  0x19   :  { %4865 = shalt.err (!%p4862_p10)
}
  0x1a   :  { %s4866_s12 = scalar_lea.vmem %s32_s30, 3584  ;;  %p4871_p12 = scmp.lt.s32.totalorder %s32_s30, %s32_s30 }
  0x1b   :  { %p4867_p11 = scmp.ne.s32.totalorder %s32_s30, %s4866_s12  ;;  %p4872_p13 = scmp.lt.s32.totalorder %s4866_s12, %s4866_s12 }
  0x1d   :  { %p4873_p0 = por %p4872_p13, %p4871_p12 }
  0x1f   :  { %p4874_p1 = pnand %p4873_p0, %p4867_p11 }
  0x21   :  { %4877 = shalt.err (!%p4874_p1)
}
  0x22   :  { %37 = dma.hbm_to_vmem [thread:$0]  %s5546_s2, 3584, %s32_s30, [#allocation6], %s4907_s25, %s4907_s25, %s4908_s26  }
  0x23   :  { %4900 = dma.done.wait [#allocation3], 768  }
  0x24   :  { %4901 = vsyncadd [#allocation3], 4294966528 }
  0x25   :  { %4902 = dma.done.wait [#allocation6], 3584  }
  0x26   :  { %4903 = vsyncadd [#allocation6], 4294963712  ;;  %vm56_vm0 = vcmask 1042432   ;;  %vm49_vm1 = vcmask 23552   ;;  %v48_v0 = vld [vmem:[#allocation5] sm:$0x7]  ;;  %v196_v18 = vlaneseq }
  0x27   :  { %v46_v1 = vld [vmem:[%s5544_s0] sm:$0xff]  ;;  %v47_v2 = vld [vmem:[%s5544_s0 + $0x8] sm:$0xff]  ;;  %4100 = vmatprep.subr.msk.mxu0 %vm56_vm0, %v48_v0  ;;  %v4910_v3 = vmov 51   ;;  %v4911_v4 = vmov 52   ;;  %s4912_s2 = smov 80   ;;  %s4913_s18 = smov 79  }
  0x28   :  { %4102 = vmatprep.mubr.msk.f32.mxu0 %vm49_vm1, %v46_v1  ;;  %4101 = vmatpush3.msk.msra.mxu0 %vm56_vm0, %v48_v0  ;;  %s4914_s0 = smov 78   ;;  %v4915_v9 = vmov 53   ;;  %v197_v20 = vshrl.u32 %v196_v18, 7  ;;  %v147_v29 = vld [vmem:[#allocation2 + $0x8] sm:$0xff]  ;;  %v146_v30 = vld [vmem:[#allocation2] sm:$0xff]  ;;  %vm210_vm4 = vcmask 130048  }
  0x29   :  { %4103 = vmatmul.mubr.msk.f32.vlgmr.msra.gmra.mrb[0].mxu0 %vm49_vm1, %v47_v2  ;;  %4565 = vset.pattern.permute.xlu0 %v4910_v3  ;;  %s4916_s19 = smov 112   ;;  %s4917_s20 = smov 74  }
  0x2a   :  { %4564 = vset.pattern.permute.xlu1 %v4911_v4  ;;  %v5025_v23 = vsub.s32 0, %v197_v20  ;;  %s4918_s21 = smov 96   ;;  %s4919_s6 = smov 70  }
  0x2b   :  { %s4920_s1 = smov 58   ;;  %s4922_s17 = smov 64  }
  0x2c   :  { %s4925_s29 = smov [#allocation7]  }
  0x2d   :  { %s3838_s30 = sshll.u32 %s4925_s29, 4  ;;  %s3839_s30 = int_to_ptr.vmem [resolvable:$true] %s3838_s30 }
  0x2e   :  { %s4878_s5 = scalar_lea.vmem %s3839_s30, 256  ;;  %p4883_p3 = scmp.lt.s32.totalorder %s3839_s30, %s3839_s30 }
  0x2f   :  { %p4879_p2 = scmp.ne.s32.totalorder %s3839_s30, %s4878_s5  ;;  %p4884_p4 = scmp.lt.s32.totalorder %s4878_s5, %s4878_s5 }
  0x31   :  { %p4885_p5 = por %p4884_p4, %p4883_p3 }
  0x33   :  { %p4886_p6 = pnand %p4885_p5, %p4879_p2 }
  0xfc   :  { %v4989_v5 = vpop.f32.mrb[0].mxu0 }
  0xfd   :  { %152 = vrot.lane.b32.xlu1 %v4989_v5, %s4912_s2  ;;  %v4993_v6 = vpop.f32.mrb[1].mxu0 }
  0xfe   :  { %233 = vrot.lane.b32.xlu0 %v4993_v6, %s4913_s18  ;;  %v4999_v7 = vpack.i.bf16 %v4989_v5, %v4993_v6  ;;  %v5003_v8 = vpack.c.bf16 %v4989_v5, %v4993_v6 }
 0x101   :  { %485 = vrot.lane.b32.xlu1 %v4989_v5, %s4914_s0 }
 0x102   :  { %235 = vrot.lane.b32.xlu0 %v4989_v5, %s4913_s18 }
 0x105   :  { %150 = vrot.lane.b32.xlu1 %v4993_v6, %s4912_s2 }
 0x106   :  { %193 = vperm.xlu0 %4565, %v4989_v5  }
 0x109   :  { %276 = vperm.xlu1 %4564, %v4989_v5  }
 0x10a   :  { %483 = vrot.lane.b32.xlu0 %v4993_v6, %s4914_s0 }
 0x10b   :  { %4567 = vset.pattern.permute.xlu0 %v4911_v4 }
 0x10d   :  { %4566 = vset.pattern.permute.xlu1 %v4915_v9 }
 0x10e   :  { %526 = vperm.xlu1 %4566, %v4989_v5   ;;  %272 = vperm.xlu0 %4567, %v4993_v6  }
 0x112   :  { %4568 = vset.pattern.permute.xlu1 %v4910_v3 }
 0x113   :  { %189 = vperm.xlu1 %4568, %v4993_v6  }
 0x117   :  { %4569 = vset.pattern.permute.xlu1 %v4915_v9 }
 0x118   :  { %522 = vperm.xlu1 %4569, %v4993_v6  }
 0x16f   :  { %v153_v10 = vpop.permute.xlu1 %152 }
 0x170   :  { %v234_v11 = vpop.permute.xlu0 %233 }
 0x171   :  { %239 = vxpose.xlu0.b32.start [1/2] (short) (narrow) %v234_v11, 8 }
 0x173   :  { %v486_v12 = vpop.permute.xlu1 %485 }
 0x174   :  { %v236_v13 = vpop.permute.xlu0 %235 }
 0x175   :  { %240 = vxpose.xlu0.b32.end [2/2] (short) (narrow) %v236_v13, 8 }
 0x177   :  { %v151_v14 = vpop.permute.xlu1 %150 }
 0x178   :  { %156 = vxpose.xlu1.b32.start [1/2] (short) (narrow) %v151_v14, 8 }
 0x17c   :  { %157 = vxpose.xlu1.b32.end [2/2] (short) (narrow) %v153_v10, 8 }
 0x185   :  { %v194_v15 = vpop.permute.xlu0 %193 }
 0x188   :  { %v277_v17 = vpop.permute.xlu1 %276 }
 0x189   :  { %v484_v16 = vpop.permute.xlu0 %483 }
 0x18a   :  { %489 = vxpose.xlu0.b32.start [1/2] (short) (narrow) %v484_v16, 8 }
 0x18d   :  { %v527_v19 = vpop.permute.xlu1 %526  ;;  %v273_v21 = vpop.permute.xlu0 %272 }
 0x18e   :  { %490 = vxpose.xlu0.b32.end [2/2] (short) (narrow) %v486_v12, 8 }
 0x192   :  { %v190_v22 = vpop.permute.xlu1 %189 }
 0x197   :  { %v523_v26 = vpop.permute.xlu1 %522 }
 0x19a   :  { %4580 = vset.pattern.permute.xlu1 %v4911_v4 }
 0x1b7   :  { %4581 = vset.pattern.permute.xlu0 %v4910_v3 }
 0x1f1   :  { %v255_v24 = vpop.trf.xlu0 }
 0x1f2   :  { %v282_v25 = vrot.slane %v255_v24, %v5025_v23 }
 0x1f4   :  { %v283_v27 = vadd.f32 %v282_v25, %v273_v21  ;;  %v284_v28 = vadd.f32 %v282_v25, %v277_v17 }
 0x1f6   :  { %vm286_vm2 = vcmp.ge.f32.partialorder %v284_v28, 0.0  ;;  %v288_v31 = vmul.f32 0.2, %v284_v28  ;;  %vm285_vm3 = vcmp.ge.f32.partialorder %v283_v27, 0.0  ;;  %v287_v32 = vmul.f32 0.2, %v283_v27 }
 0x1f8   :  { %v172_v33 = vpop.trf.xlu1  ;;  %v290_v34 = vsel %vm286_vm2, %v284_v28, %v288_v31  ;;  %v289_v35 = vsel %vm285_vm3, %v283_v27, %v287_v32 }
 0x1f9   :  { %v199_v36 = vrot.slane %v172_v33, %v5025_v23  ;;  %v292_v37 = vadd.f32 %v290_v34, %v147_v29  ;;  %v291_v38 = vadd.f32 %v289_v35, %v146_v30 }
 0x1fb   :  { %v200_v39 = vadd.f32 %v199_v36, %v190_v22  ;;  %v201_v40 = vadd.f32 %v199_v36, %v194_v15  ;;  %v296_v41 = vsel %vm210_vm4, %v292_v37, -inf  ;;  %v293_v42 = vsel %vm210_vm4, %v291_v38, -inf }
 0x1fc   :  { %297 = vmax.xlane.f32.xlu1 %v296_v41  ;;  %294 = vmax.xlane.f32.xlu0 %v293_v42 }
 0x1fd   :  { %vm202_vm5 = vcmp.ge.f32.partialorder %v200_v39, 0.0  ;;  %v204_v43 = vmul.f32 0.2, %v200_v39  ;;  %vm203_vm6 = vcmp.ge.f32.partialorder %v201_v40, 0.0  ;;  %v205_v44 = vmul.f32 0.2, %v201_v40 }
 0x1ff   :  { %v206_v45 = vsel %vm202_vm5, %v200_v39, %v204_v43  ;;  %v207_v46 = vsel %vm203_vm6, %v201_v40, %v205_v44 }
 0x200   :  { %v208_v47 = vadd.f32 %v206_v45, %v146_v30  ;;  %v209_v48 = vadd.f32 %v207_v46, %v147_v29 }
 0x202   :  { %v211_v49 = vsel %vm210_vm4, %v208_v47, -inf  ;;  %v214_v50 = vsel %vm210_vm4, %v209_v48, -inf }
 0x203   :  { %212 = vmax.xlane.f32.xlu1 %v211_v49  ;;  %215 = vmax.xlane.f32.xlu0 %v214_v50 }
 0x20a   :  { %v505_v51 = vpop.trf.xlu0 }
 0x20b   :  { %v532_v52 = vrot.slane %v505_v51, %v5025_v23 }
 0x20d   :  { %v533_v53 = vadd.f32 %v532_v52, %v523_v26  ;;  %v534_v54 = vadd.f32 %v532_v52, %v527_v19 }
 0x20f   :  { %vm536_vm7 = vcmp.ge.f32.partialorder %v534_v54, 0.0  ;;  %v538_v55 = vmul.f32 0.2, %v534_v54  ;;  %vm535_vm8 = vcmp.ge.f32.partialorder %v533_v53, 0.0  ;;  %v537_v56 = vmul.f32 0.2, %v533_v53 }
 0x211   :  { %v540_v57 = vsel %vm536_vm7, %v534_v54, %v538_v55  ;;  %v539_v58 = vsel %vm535_vm8, %v533_v53, %v537_v56 }
 0x212   :  { %v542_v59 = vadd.f32 %v540_v57, %v147_v29  ;;  %v541_v60 = vadd.f32 %v539_v58, %v146_v30 }
 0x214   :  { %v546_v61 = vsel %vm210_vm4, %v542_v59, -inf  ;;  %v543_v62 = vsel %vm210_vm4, %v541_v60, -inf }
 0x215   :  { %547 = vmax.xlane.f32.xlu0 %v546_v61  ;;  %544 = vmax.xlane.f32.xlu1 %v543_v62  ;;  %v682_v62 = vld [vmem:[#allocation5 + $0x8] sm:$0xff] }
 0x289   :  { %v298_v63 = vpop.xlane.xlu1 %297  ;;  %v295_v0 = vpop.xlane.xlu0 %294 }
 0x28a   :  { %v300_v1 = vsub.f32 %v292_v37, %v298_v63  ;;  %v299_v2 = vsub.f32 %v291_v38, %v295_v0  ;;  %v683_v63 = vld [vmem:[#allocation5 + $0x10] sm:$0xff] }
 0x28b   :  { %v4366_v0 = vpack.c.bf16 %v683_v63, %v682_v62 }
 0x28c   :  { %v303_v10 = vmul.f32 1.442695, %v300_v1  ;;  %v301_v11 = vmul.f32 1.442695, %v299_v2 }
 0x28d   :  { %4367 = vmatprep.subr.bf16.mxu0 %v4366_v0 }
 0x28e   :  { %4614 = vpow2.f32 %v303_v10  ;;  %4369 = vmatpush3.bf16.msra.mxu0 %v4366_v0  ;;  %v3861_v10 = vld [vmem:[%s5547_s3 + $0x6] ss:$0 sm:$0xff] }
 0x28f   :  { %4616 = vpow2.f32 %v301_v11 }
 0x290   :  { %v213_v12 = vpop.xlane.xlu1 %212  ;;  %v216_v13 = vpop.xlane.xlu0 %215 }
 0x291   :  { %v217_v14 = vsub.f32 %v208_v47, %v213_v12  ;;  %v218_v15 = vsub.f32 %v209_v48, %v216_v13  ;;  %v3862_v13 = vld [vmem:[%s5547_s3 + $0x7] ss:$0 sm:$0xff] }
 0x293   :  { %v219_v16 = vmul.f32 1.442695, %v217_v14  ;;  %v221_v17 = vmul.f32 1.442695, %v218_v15 }
 0x295   :  { %4618 = vpow2.f32 %v219_v16 }
 0x296   :  { %4620 = vpow2.f32 %v221_v17 }
 0x298   :  { %v4615_v18 = vpop.eup %4614 }
 0x299   :  { %v4617_v19 = vpop.eup %4616  ;;  %v308_v20 = vsel %vm210_vm4, %v4615_v18, 0.0 }
 0x29a   :  { %309 = vadd.xlane.f32.xlu0 %v308_v20  ;;  %v305_v21 = vsel %vm210_vm4, %v4617_v19, 0.0 }
 0x29b   :  { %306 = vadd.xlane.f32.xlu1 %v305_v21 }
 0x29f   :  { %v4619_v22 = vpop.eup %4618 }
 0x2a0   :  { %v4621_v24 = vpop.eup %4620  ;;  %v223_v25 = vsel %vm210_vm4, %v4619_v22, 0.0 }
 0x2a1   :  { %224 = vadd.xlane.f32.xlu1 %v223_v25  ;;  %v226_v26 = vsel %vm210_vm4, %v4621_v24, 0.0 }
 0x2a2   :  { %227 = vadd.xlane.f32.xlu0 %v226_v26  ;;  %v545_v27 = vpop.xlane.xlu1 %544  ;;  %v548_v28 = vpop.xlane.xlu0 %547 }
 0x2a3   :  { %v549_v29 = vsub.f32 %v541_v60, %v545_v27  ;;  %v550_v30 = vsub.f32 %v542_v59, %v548_v28 }
 0x2a5   :  { %v551_v31 = vmul.f32 1.442695, %v549_v29  ;;  %v553_v32 = vmul.f32 1.442695, %v550_v30 }
 0x2a7   :  { %4622 = vpow2.f32 %v551_v31 }
 0x2a8   :  { %4624 = vpow2.f32 %v553_v32 }
 0x2b1   :  { %v4623_v33 = vpop.eup %4622 }
 0x2b2   :  { %v4625_v34 = vpop.eup %4624  ;;  %v555_v35 = vsel %vm210_vm4, %v4623_v33, 0.0 }
 0x2b3   :  { %556 = vadd.xlane.f32.xlu1 %v555_v35  ;;  %v558_v36 = vsel %vm210_vm4, %v4625_v34, 0.0 }
 0x2b4   :  { %559 = vadd.xlane.f32.xlu0 %v558_v36 }
 0x2c4   :  { %4571 = vrot.lane.b32.xlu1 %v4999_v7, %s4916_s19 }
 0x2c8   :  { %654 = vrot.lane.b32.xlu1 %v4993_v6, %s4917_s20 }
 0x2ca   :  { %4576 = vrot.lane.b32.xlu0 %v4999_v7, %s4918_s21 }
 0x2cc   :  { %656 = vrot.lane.b32.xlu1 %v4989_v5, %s4917_s20 }
 0x327   :  { %v310_v40 = vpop.xlane.xlu0 %309 }
 0x328   :  { %v307_v37 = vpop.xlane.xlu1 %306 }
 0x329   :  { %4626 = vrcp.f32 %v307_v37 }
 0x32a   :  { %4628 = vrcp.f32 %v310_v40 }
 0x32e   :  { %v225_v41 = vpop.xlane.xlu1 %224 }
 0x32f   :  { %v228_v42 = vpop.xlane.xlu0 %227  ;;  %4630 = vrcp.f32 %v225_v41 }
 0x330   :  { %4632 = vrcp.f32 %v228_v42 }
 0x333   :  { %v4627_v38 = vpop.eup %4626 }
 0x334   :  { %v313_v39 = vmul.f32 %v4627_v38, %v4617_v19  ;;  %v4629_v49 = vpop.eup %4628 }
 0x335   :  { %v314_v53 = vmul.f32 %v4629_v49, %v4615_v18 }
 0x336   :  { %4109 = vmatprep.mubr.msk.f32.mxu1 %vm210_vm4, %v313_v39 }
 0x339   :  { %v4631_v50 = vpop.eup %4630 }
 0x33a   :  { %v231_v54 = vmul.f32 %v4631_v50, %v4619_v22  ;;  %v4633_v56 = vpop.eup %4632 }
 0x33b   :  { %v232_v58 = vmul.f32 %v4633_v56, %v4621_v24 }
 0x340   :  { %v557_v43 = vpop.xlane.xlu1 %556 }
 0x341   :  { %v560_v44 = vpop.xlane.xlu0 %559  ;;  %4634 = vrcp.f32 %v557_v43 }
 0x342   :  { %4636 = vrcp.f32 %v560_v44 }
 0x344   :  { %v4572_v45 = vpop.permute.xlu1 %4571 }
 0x345   :  { %v4574_v46 = vunpack.i.h.bf16 %v4572_v45  ;;  %v4573_v47 = vunpack.i.l.bf16 %v4572_v45  ;;  %v4577_v7 = vpop.permute.xlu0 %4576 }
 0x346   :  { %v4579_v51 = vunpack.i.h.bf16 %v4577_v7  ;;  %v4578_v52 = vunpack.i.l.bf16 %v4577_v7  ;;  %v766_v7 = vld [vmem:[#allocation2 + $0x10] sm:$0xff] }
 0x347   :  { %v4354_v48 = vpack.c.bf16 %v4574_v46, %v4573_v47  ;;  %v767_v46 = vld [vmem:[#allocation2 + $0x18] sm:$0xff] }
 0x348   :  { %v4362_v55 = vpack.c.bf16 %v4579_v51, %v4578_v52 }
 0x349   :  { %4355 = vmatprep.subr.bf16.mxu1 %v4354_v48 }
 0x34a   :  { %4357 = vmatpush3.bf16.msra.mxu1 %v4354_v48 }
 0x34b   :  { %4359 = vmatprep.subr.bf16.mxu1 %v5003_v8  ;;  %v4635_v57 = vpop.eup %4634 }
 0x34c   :  { %v563_v59 = vmul.f32 %v4635_v57, %v4623_v33  ;;  %v4637_v60 = vpop.eup %4636 }
 0x34d   :  { %4110 = vmatmul.mubr.msk.f32.vlgmr.msra.gmra.mrb[0].mxu1 %vm210_vm4, %v314_v53  ;;  %v564_v61 = vmul.f32 %v4637_v60, %v4625_v34 }
 0x34e   :  { %4361 = vmatpush3.bf16.msra.mxu1 %v5003_v8  ;;  %4116 = vmatprep.mubr.msk.f32.mxu1 %vm210_vm4, %v231_v54  ;;  %v655_v8 = vpop.permute.xlu1 %654 }
 0x34f   :  { %4363 = vmatprep.subr.bf16.mxu1 %v4362_v55 }
 0x352   :  { %v657_v1 = vpop.permute.xlu1 %656 }
 0x355   :  { %4117 = vmatmul.mubr.msk.f32.vlgmr.msra.gmra.mrb[0].mxu1 %vm210_vm4, %v232_v58 }
 0x356   :  { %4365 = vmatpush3.bf16.msra.mxu1 %v4362_v55  ;;  %4123 = vmatprep.mubr.msk.f32.mxu1 %vm210_vm4, %v563_v59 }
 0x35d   :  { %4124 = vmatmul.mubr.msk.f32.vlgmr.msra.gmra.mrb[0].mxu1 %vm210_vm4, %v564_v61 }
 0x430   :  { %v4125_v2 = vpop.f32.mrb[0].mxu1 }
 0x431   :  { %v661_v11 = vadd.f32 %v4125_v2, %v657_v1  ;;  %v643_v12 = vpop.f32.mrb[1].mxu1 }
 0x432   :  { %v660_v14 = vadd.f32 %v655_v8, %v643_v12 }
 0x433   :  { %v668_v15 = vmul.f32 %v3861_v10, %v661_v11 }
 0x434   :  { %v667_v16 = vmul.f32 %v3861_v10, %v660_v14 }
 0x435   :  { %v675_v17 = vadd.f32 %v3862_v13, %v668_v15 }
 0x436   :  { %v674_v18 = vadd.f32 %v3862_v13, %v667_v16 }
 0x437   :  { %v679_v19 = vmul.f32 0.01, %v675_v17  ;;  %vm677_vm10 = vcmp.ge.f32.partialorder %v675_v17, 0.0 }
 0x438   :  { %vm676_vm9 = vcmp.ge.f32.partialorder %v674_v18, 0.0  ;;  %v678_v20 = vmul.f32 0.01, %v674_v18 }
 0x439   :  { %v5066_v22 = vsel %vm677_vm10, %v675_v17, %v679_v19 }
 0x43a   :  { %v5062_v21 = vsel %vm676_vm9, %v674_v18, %v678_v20 }
 0x43b   :  { %4130 = vmatprep.mubr.msk.f32.mxu0 %vm210_vm4, %v5062_v21 }
 0x43c   :  { %4131 = vmatmul.mubr.msk.f32.vlgmr.msra.gmra.mrb[2].mxu0 %vm210_vm4, %v5066_v22 }
 0x50f   :  { %v4132_v24 = vpop.f32.mrb[2].mxu0 }
 0x510   :  { %854 = vrot.lane.b32.xlu1 %v4132_v24, %s4913_s18  ;;  %v756_v25 = vpop.f32.mrb[3].mxu0 }
 0x511   :  { %852 = vrot.lane.b32.xlu0 %v756_v25, %s4913_s18  ;;  %v5072_v26 = vpack.i.bf16 %v4132_v24, %v756_v25  ;;  %v5074_v27 = vpack.c.bf16 %v4132_v24, %v756_v25 }
 0x514   :  { %772 = vrot.lane.b32.xlu1 %v4132_v24, %s4912_s2 }
 0x515   :  { %770 = vrot.lane.b32.xlu0 %v756_v25, %s4912_s2 }
 0x518   :  { %1104 = vrot.lane.b32.xlu1 %v4132_v24, %s4914_s0 }
 0x519   :  { %813 = vperm.xlu0 %4581, %v4132_v24  }
 0x51c   :  { %895 = vperm.xlu1 %4580, %v4132_v24  }
 0x51d   :  { %1102 = vrot.lane.b32.xlu0 %v756_v25, %s4914_s0 }
 0x51e   :  { %4583 = vset.pattern.permute.xlu0 %v4911_v4 }
 0x520   :  { %4582 = vset.pattern.permute.xlu1 %v4915_v9 }
 0x521   :  { %1145 = vperm.xlu1 %4582, %v4132_v24   ;;  %891 = vperm.xlu0 %4583, %v756_v25  }
 0x525   :  { %4584 = vset.pattern.permute.xlu1 %v4910_v3 }
 0x526   :  { %809 = vperm.xlu1 %4584, %v756_v25  }
 0x52a   :  { %4585 = vset.pattern.permute.xlu1 %v4915_v9 }
 0x52b   :  { %1141 = vperm.xlu1 %4585, %v756_v25  }
 0x582   :  { %v855_v29 = vpop.permute.xlu1 %854 }
 0x583   :  { %v853_v28 = vpop.permute.xlu0 %852 }
 0x584   :  { %858 = vxpose.xlu0.b32.start [1/2] (short) (narrow) %v853_v28, 8 }
 0x586   :  { %v773_v31 = vpop.permute.xlu1 %772 }
 0x587   :  { %v771_v30 = vpop.permute.xlu0 %770 }
 0x588   :  { %859 = vxpose.xlu0.b32.end [2/2] (short) (narrow) %v855_v29, 8  ;;  %776 = vxpose.xlu1.b32.start [1/2] (short) (narrow) %v771_v30, 8 }
 0x58a   :  { %v1105_v34 = vpop.permute.xlu1 %1104 }
 0x58c   :  { %777 = vxpose.xlu1.b32.end [2/2] (short) (narrow) %v773_v31, 8 }
 0x598   :  { %v814_v32 = vpop.permute.xlu0 %813 }
 0x59b   :  { %v896_v35 = vpop.permute.xlu1 %895 }
 0x59c   :  { %v1103_v33 = vpop.permute.xlu0 %1102 }
 0x59d   :  { %1108 = vxpose.xlu0.b32.start [1/2] (short) (narrow) %v1103_v33, 8 }
 0x5a0   :  { %v1146_v36 = vpop.permute.xlu1 %1145  ;;  %v892_v38 = vpop.permute.xlu0 %891 }
 0x5a1   :  { %1109 = vxpose.xlu0.b32.end [2/2] (short) (narrow) %v1105_v34, 8 }
 0x5a5   :  { %v810_v37 = vpop.permute.xlu1 %809 }
 0x5aa   :  { %4596 = vset.pattern.permute.xlu1 %v4911_v4  ;;  %v1142_v39 = vpop.permute.xlu1 %1141 }
 0x5ca   :  { %4597 = vset.pattern.permute.xlu0 %v4910_v3 }
 0x604   :  { %v874_v40 = vpop.trf.xlu0 }
 0x605   :  { %v901_v41 = vrot.slane %v874_v40, %v5025_v23 }
 0x607   :  { %v902_v42 = vadd.f32 %v901_v41, %v892_v38  ;;  %v903_v43 = vadd.f32 %v901_v41, %v896_v35 }
 0x608   :  { %v792_v44 = vpop.trf.xlu1 }
 0x609   :  { %v819_v45 = vrot.slane %v792_v44, %v5025_v23  ;;  %vm905_vm11 = vcmp.ge.f32.partialorder %v903_v43, 0.0  ;;  %v907_v47 = vmul.f32 0.2, %v903_v43  ;;  %vm904_vm12 = vcmp.ge.f32.partialorder %v902_v42, 0.0 }
 0x60a   :  { %v906_v48 = vmul.f32 0.2, %v902_v42 }
 0x60b   :  { %v820_v49 = vadd.f32 %v819_v45, %v810_v37  ;;  %v821_v50 = vadd.f32 %v819_v45, %v814_v32  ;;  %v909_v51 = vsel %vm905_vm11, %v903_v43, %v907_v47 }
 0x60c   :  { %v911_v52 = vadd.f32 %v909_v51, %v767_v46  ;;  %v908_v53 = vsel %vm904_vm12, %v902_v42, %v906_v48  ;;  %vm2184_vm12 = vcmask 261120  }
 0x60d   :  { %v910_v54 = vadd.f32 %v908_v53, %v766_v7  ;;  %vm822_vm13 = vcmp.ge.f32.partialorder %v820_v49, 0.0  ;;  %v824_v55 = vmul.f32 0.2, %v820_v49  ;;  %vm823_vm14 = vcmp.ge.f32.partialorder %v821_v50, 0.0 }
 0x60e   :  { %v915_v56 = vsel %vm210_vm4, %v911_v52, -inf  ;;  %v825_v57 = vmul.f32 0.2, %v821_v50 }
 0x60f   :  { %916 = vmax.xlane.f32.xlu1 %v915_v56  ;;  %v912_v58 = vsel %vm210_vm4, %v910_v54, -inf  ;;  %v826_v59 = vsel %vm822_vm13, %v820_v49, %v824_v55 }
 0x610   :  { %913 = vmax.xlane.f32.xlu0 %v912_v58  ;;  %v828_v60 = vadd.f32 %v826_v59, %v766_v7  ;;  %v827_v61 = vsel %vm823_vm14, %v821_v50, %v825_v57 }
 0x611   :  { %v829_v62 = vadd.f32 %v827_v61, %v767_v46 }
 0x612   :  { %v830_v63 = vsel %vm210_vm4, %v828_v60, -inf }
 0x613   :  { %831 = vmax.xlane.f32.xlu1 %v830_v63  ;;  %v833_v0 = vsel %vm210_vm4, %v829_v62, -inf }
 0x614   :  { %834 = vmax.xlane.f32.xlu0 %v833_v0 }
 0x61d   :  { %v1124_v8 = vpop.trf.xlu0 }
 0x61e   :  { %v1151_v1 = vrot.slane %v1124_v8, %v5025_v23 }
 0x620   :  { %v1152_v2 = vadd.f32 %v1151_v1, %v1142_v39  ;;  %v1153_v10 = vadd.f32 %v1151_v1, %v1146_v36 }
 0x622   :  { %vm1155_vm15 = vcmp.ge.f32.partialorder %v1153_v10, 0.0  ;;  %v1157_v11 = vmul.f32 0.2, %v1153_v10  ;;  %vm1154_vm0 = vcmp.ge.f32.partialorder %v1152_v2, 0.0  ;;  %v1156_v12 = vmul.f32 0.2, %v1152_v2 }
 0x624   :  { %v1159_v13 = vsel %vm1155_vm15, %v1153_v10, %v1157_v11  ;;  %v1158_v14 = vsel %vm1154_vm0, %v1152_v2, %v1156_v12 }
 0x625   :  { %v1161_v15 = vadd.f32 %v1159_v13, %v767_v46  ;;  %v1160_v16 = vadd.f32 %v1158_v14, %v766_v7 }
 0x627   :  { %v1165_v17 = vsel %vm210_vm4, %v1161_v15, -inf  ;;  %v1162_v18 = vsel %vm210_vm4, %v1160_v16, -inf }
 0x628   :  { %1166 = vmax.xlane.f32.xlu0 %v1165_v17  ;;  %1163 = vmax.xlane.f32.xlu1 %v1162_v18 }
 0x69c   :  { %v917_v19 = vpop.xlane.xlu1 %916 }
 0x69d   :  { %v919_v20 = vsub.f32 %v911_v52, %v917_v19  ;;  %v914_v24 = vpop.xlane.xlu0 %913 }
 0x69e   :  { %v918_v25 = vsub.f32 %v910_v54, %v914_v24  ;;  %v1296_v24 = vld [vmem:[#allocation5 + $0x20] sm:$0xff] }
 0x69f   :  { %v922_v28 = vmul.f32 1.442695, %v919_v20  ;;  %v1295_v20 = vld [vmem:[#allocation5 + $0x18] sm:$0xff] }
 0x6a0   :  { %v920_v29 = vmul.f32 1.442695, %v918_v25  ;;  %v832_v30 = vpop.xlane.xlu1 %831  ;;  %v4382_v25 = vpack.c.bf16 %v1296_v24, %v1295_v20 }
 0x6a1   :  { %4638 = vpow2.f32 %v922_v28  ;;  %v836_v31 = vsub.f32 %v828_v60, %v832_v30  ;;  %v835_v32 = vpop.xlane.xlu0 %834  ;;  %v3871_v28 = vld [vmem:[%s5547_s3 + $0x8] ss:$0 sm:$0xff] }
 0x6a2   :  { %4640 = vpow2.f32 %v920_v29  ;;  %v837_v33 = vsub.f32 %v829_v62, %v835_v32  ;;  %4383 = vmatprep.subr.bf16.mxu1 %v4382_v25 }
 0x6a3   :  { %v838_v34 = vmul.f32 1.442695, %v836_v31  ;;  %4385 = vmatpush3.bf16.msra.mxu1 %v4382_v25  ;;  %v3872_v31 = vld [vmem:[%s5547_s3 + $0x9] ss:$0 sm:$0xff] }
 0x6a4   :  { %v840_v35 = vmul.f32 1.442695, %v837_v33 }
 0x6a5   :  { %4642 = vpow2.f32 %v838_v34 }
 0x6a6   :  { %4644 = vpow2.f32 %v840_v35 }
 0x6ab   :  { %v4639_v36 = vpop.eup %4638 }
 0x6ac   :  { %v4641_v37 = vpop.eup %4640  ;;  %v927_v38 = vsel %vm210_vm4, %v4639_v36, 0.0 }
 0x6ad   :  { %928 = vadd.xlane.f32.xlu0 %v927_v38  ;;  %v924_v39 = vsel %vm210_vm4, %v4641_v37, 0.0 }
 0x6ae   :  { %925 = vadd.xlane.f32.xlu1 %v924_v39 }
 0x6af   :  { %v4643_v40 = vpop.eup %4642 }
 0x6b0   :  { %v4645_v41 = vpop.eup %4644  ;;  %v842_v42 = vsel %vm210_vm4, %v4643_v40, 0.0 }
 0x6b1   :  { %v845_v43 = vsel %vm210_vm4, %v4645_v41, 0.0 }
 0x6b2   :  { %843 = vadd.xlane.f32.xlu1 %v842_v42  ;;  %846 = vadd.xlane.f32.xlu0 %v845_v43 }
 0x6b5   :  { %v1164_v44 = vpop.xlane.xlu1 %1163  ;;  %v1167_v45 = vpop.xlane.xlu0 %1166 }
 0x6b6   :  { %v1168_v46 = vsub.f32 %v1160_v16, %v1164_v44  ;;  %v1169_v47 = vsub.f32 %v1161_v15, %v1167_v45 }
 0x6b8   :  { %v1170_v7 = vmul.f32 1.442695, %v1168_v46  ;;  %v1172_v48 = vmul.f32 1.442695, %v1169_v47 }
 0x6ba   :  { %4646 = vpow2.f32 %v1170_v7 }
 0x6bb   :  { %4648 = vpow2.f32 %v1172_v48 }
 0x6c4   :  { %v4647_v49 = vpop.eup %4646 }
 0x6c5   :  { %v4649_v50 = vpop.eup %4648  ;;  %v1174_v51 = vsel %vm210_vm4, %v4647_v49, 0.0 }
 0x6c6   :  { %1175 = vadd.xlane.f32.xlu1 %v1174_v51  ;;  %v1177_v52 = vsel %vm210_vm4, %v4649_v50, 0.0 }
 0x6c7   :  { %1178 = vadd.xlane.f32.xlu0 %v1177_v52 }
 0x6d7   :  { %4587 = vrot.lane.b32.xlu1 %v5072_v26, %s4916_s19 }
 0x6dd   :  { %4592 = vrot.lane.b32.xlu0 %v5072_v26, %s4918_s21 }
 0x73a   :  { %v929_v56 = vpop.xlane.xlu0 %928 }
 0x73b   :  { %v926_v53 = vpop.xlane.xlu1 %925 }
 0x73c   :  { %4650 = vrcp.f32 %v926_v53 }
 0x73d   :  { %4652 = vrcp.f32 %v929_v56 }
 0x73f   :  { %v844_v57 = vpop.xlane.xlu1 %843  ;;  %v847_v58 = vpop.xlane.xlu0 %846 }
 0x740   :  { %4654 = vrcp.f32 %v844_v57 }
 0x741   :  { %4656 = vrcp.f32 %v847_v58 }
 0x746   :  { %v4651_v54 = vpop.eup %4650 }
 0x747   :  { %v932_v55 = vmul.f32 %v4651_v54, %v4641_v37  ;;  %v4653_v8 = vpop.eup %4652 }
 0x748   :  { %v933_v11 = vmul.f32 %v4653_v8, %v4639_v36 }
 0x749   :  { %4137 = vmatprep.mubr.msk.f32.mxu0 %vm210_vm4, %v932_v55 }
 0x74a   :  { %v4655_v1 = vpop.eup %4654 }
 0x74b   :  { %v850_v12 = vmul.f32 %v4655_v1, %v4643_v40  ;;  %v4657_v14 = vpop.eup %4656 }
 0x74c   :  { %v851_v16 = vmul.f32 %v4657_v14, %v4645_v41 }
 0x753   :  { %v1176_v59 = vpop.xlane.xlu1 %1175 }
 0x754   :  { %v1179_v60 = vpop.xlane.xlu0 %1178  ;;  %4658 = vrcp.f32 %v1176_v59 }
 0x755   :  { %4660 = vrcp.f32 %v1179_v60 }
 0x757   :  { %v4588_v61 = vpop.permute.xlu1 %4587 }
 0x758   :  { %v4590_v62 = vunpack.i.h.bf16 %v4588_v61  ;;  %v4589_v63 = vunpack.i.l.bf16 %v4588_v61  ;;  %v4593_v0 = vpop.permute.xlu0 %4592  ;;  %v1379_v61 = vld [vmem:[#allocation2 + $0x20] sm:$0xff] }
 0x759   :  { %v4595_v2 = vunpack.i.h.bf16 %v4593_v0  ;;  %v4594_v10 = vunpack.i.l.bf16 %v4593_v0 }
 0x75a   :  { %v4370_v26 = vpack.c.bf16 %v4590_v62, %v4589_v63  ;;  %v1380_v62 = vld [vmem:[#allocation2 + $0x28] sm:$0xff] }
 0x75b   :  { %v4378_v13 = vpack.c.bf16 %v4595_v2, %v4594_v10 }
 0x75c   :  { %4371 = vmatprep.subr.bf16.mxu0 %v4370_v26 }
 0x75d   :  { %4373 = vmatpush3.bf16.msra.mxu0 %v4370_v26 }
 0x75e   :  { %4375 = vmatprep.subr.bf16.mxu0 %v5074_v27  ;;  %v4659_v15 = vpop.eup %4658 }
 0x75f   :  { %v1182_v17 = vmul.f32 %v4659_v15, %v4647_v49  ;;  %v4661_v18 = vpop.eup %4660 }
 0x760   :  { %4138 = vmatmul.mubr.msk.f32.vlgmr.msra.gmra.mrb[4].mxu0 %vm210_vm4, %v933_v11  ;;  %v1183_v19 = vmul.f32 %v4661_v18, %v4649_v50 }
 0x761   :  { %4377 = vmatpush3.bf16.msra.mxu0 %v5074_v27  ;;  %4144 = vmatprep.mubr.msk.f32.mxu0 %vm210_vm4, %v850_v12 }
 0x762   :  { %4379 = vmatprep.subr.bf16.mxu0 %v4378_v13 }
 0x768   :  { %4145 = vmatmul.mubr.msk.f32.vlgmr.msra.gmra.mrb[4].mxu0 %vm210_vm4, %v851_v16 }
 0x769   :  { %4381 = vmatpush3.bf16.msra.mxu0 %v4378_v13  ;;  %4151 = vmatprep.mubr.msk.f32.mxu0 %vm210_vm4, %v1182_v17 }
 0x770   :  { %4152 = vmatmul.mubr.msk.f32.vlgmr.msra.gmra.mrb[4].mxu0 %vm210_vm4, %v1183_v19 }
 0x843   :  { %v4153_v27 = vpop.f32.mrb[4].mxu0 }
 0x844   :  { %v1274_v29 = vadd.f32 %v4153_v27, %v5066_v22  ;;  %v1262_v30 = vpop.f32.mrb[5].mxu0 }
 0x845   :  { %v1273_v32 = vadd.f32 %v1262_v30, %v5062_v21 }
 0x846   :  { %v1281_v33 = vmul.f32 %v3871_v28, %v1274_v29 }
 0x847   :  { %v1280_v34 = vmul.f32 %v3871_v28, %v1273_v32 }
 0x848   :  { %v1288_v35 = vadd.f32 %v3872_v31, %v1281_v33 }
 0x849   :  { %v1287_v36 = vadd.f32 %v3872_v31, %v1280_v34 }
 0x84a   :  { %v1292_v37 = vmul.f32 0.01, %v1288_v35  ;;  %vm1290_vm2 = vcmp.ge.f32.partialorder %v1288_v35, 0.0 }
 0x84b   :  { %vm1289_vm1 = vcmp.ge.f32.partialorder %v1287_v36, 0.0  ;;  %v1291_v38 = vmul.f32 0.01, %v1287_v36 }
 0x84c   :  { %v5125_v40 = vsel %vm1290_vm2, %v1288_v35, %v1292_v37 }
 0x84d   :  { %v5121_v39 = vsel %vm1289_vm1, %v1287_v36, %v1291_v38 }
 0x84e   :  { %4158 = vmatprep.mubr.msk.f32.mxu1 %vm210_vm4, %v5121_v39 }
 0x84f   :  { %4159 = vmatmul.mubr.msk.f32.vlgmr.msra.gmra.mrb[2].mxu1 %vm210_vm4, %v5125_v40 }
 0x922   :  { %v4160_v41 = vpop.f32.mrb[2].mxu1 }
 0x923   :  { %1467 = vrot.lane.b32.xlu1 %v4160_v41, %s4913_s18  ;;  %v1369_v42 = vpop.f32.mrb[3].mxu1 }
 0x924   :  { %1383 = vrot.lane.b32.xlu0 %v1369_v42, %s4912_s2  ;;  %v5131_v43 = vpack.i.bf16 %v4160_v41, %v1369_v42  ;;  %v5133_v44 = vpack.c.bf16 %v4160_v41, %v1369_v42 }
 0x927   :  { %1465 = vrot.lane.b32.xlu1 %v1369_v42, %s4913_s18 }
 0x928   :  { %1426 = vperm.xlu0 %4597, %v4160_v41  }
 0x92b   :  { %1385 = vrot.lane.b32.xlu1 %v4160_v41, %s4912_s2  ;;  %s4923_s2 = smov 32  }
 0x92c   :  { %1715 = vrot.lane.b32.xlu0 %v1369_v42, %s4914_s0 }
 0x92d   :  { %4599 = vset.pattern.permute.xlu0 %v4911_v4 }
 0x92f   :  { %1717 = vrot.lane.b32.xlu1 %v4160_v41, %s4914_s0 }
 0x930   :  { %1504 = vperm.xlu0 %4599, %v1369_v42  }
 0x933   :  { %1508 = vperm.xlu1 %4596, %v4160_v41  }
 0x937   :  { %4598 = vset.pattern.permute.xlu1 %v4915_v9 }
 0x938   :  { %1758 = vperm.xlu1 %4598, %v4160_v41  }
 0x93c   :  { %4600 = vset.pattern.permute.xlu1 %v4910_v3 }
 0x93d   :  { %1422 = vperm.xlu1 %4600, %v1369_v42  }
 0x941   :  { %4601 = vset.pattern.permute.xlu1 %v4915_v9 }
 0x942   :  { %1754 = vperm.xlu1 %4601, %v1369_v42  }
 0x995   :  { %v1468_v45 = vpop.permute.xlu1 %1467 }
 0x996   :  { %v1384_v46 = vpop.permute.xlu0 %1383 }
 0x997   :  { %1389 = vxpose.xlu1.b32.start [1/2] (short) (narrow) %v1384_v46, 8 }
 0x999   :  { %v1466_v47 = vpop.permute.xlu1 %1465 }
 0x99a   :  { %1471 = vxpose.xlu0.b32.start [1/2] (short) (narrow) %v1466_v47, 8 }
 0x99d   :  { %v1386_v7 = vpop.permute.xlu1 %1385 }
 0x99e   :  { %1472 = vxpose.xlu0.b32.end [2/2] (short) (narrow) %v1468_v45, 8  ;;  %1390 = vxpose.xlu1.b32.end [2/2] (short) (narrow) %v1386_v7, 8 }
 0x9a1   :  { %v1718_v49 = vpop.permute.xlu1 %1717 }
 0x9a7   :  { %v1427_v4 = vpop.permute.xlu0 %1426 }
 0x9ab   :  { %v1716_v48 = vpop.permute.xlu0 %1715 }
 0x9ac   :  { %1721 = vxpose.xlu0.b32.start [1/2] (short) (narrow) %v1716_v48, 8 }
 0x9af   :  { %v1505_v52 = vpop.permute.xlu0 %1504 }
 0x9b0   :  { %1722 = vxpose.xlu0.b32.end [2/2] (short) (narrow) %v1718_v49, 8 }
 0x9b2   :  { %v1509_v50 = vpop.permute.xlu1 %1508 }
 0x9b7   :  { %v1759_v51 = vpop.permute.xlu1 %1758 }
 0x9bc   :  { %v1423_v3 = vpop.permute.xlu1 %1422 }
 0x9c1   :  { %v1755_v53 = vpop.permute.xlu1 %1754 }
 0xa1a   :  { %v1487_v9 = vpop.trf.xlu0  ;;  %v1405_v54 = vpop.trf.xlu1 }
 0xa1b   :  { %v1514_v55 = vrot.slane %v1487_v9, %v5025_v23  ;;  %v1432_v56 = vrot.slane %v1405_v54, %v5025_v23 }
 0xa1d   :  { %v1515_v57 = vadd.f32 %v1514_v55, %v1505_v52  ;;  %v1516_v58 = vadd.f32 %v1514_v55, %v1509_v50  ;;  %v1433_v59 = vadd.f32 %v1432_v56, %v1423_v3  ;;  %v1434_v60 = vadd.f32 %v1432_v56, %v1427_v4 }
 0xa1f   :  { %vm1517_vm3 = vcmp.ge.f32.partialorder %v1515_v57, 0.0  ;;  %v1519_v63 = vmul.f32 0.2, %v1515_v57  ;;  %vm1518_vm5 = vcmp.ge.f32.partialorder %v1516_v58, 0.0  ;;  %v1520_v0 = vmul.f32 0.2, %v1516_v58 }
 0xa20   :  { %vm1436_vm6 = vcmp.ge.f32.partialorder %v1434_v60, 0.0  ;;  %v1438_v26 = vmul.f32 0.2, %v1434_v60  ;;  %vm1435_vm7 = vcmp.ge.f32.partialorder %v1433_v59, 0.0  ;;  %v1437_v8 = vmul.f32 0.2, %v1433_v59 }
 0xa21   :  { %v1521_v1 = vsel %vm1517_vm3, %v1515_v57, %v1519_v63  ;;  %v1522_v2 = vsel %vm1518_vm5, %v1516_v58, %v1520_v0 }
 0xa22   :  { %v1523_v10 = vadd.f32 %v1521_v1, %v1379_v61  ;;  %v1524_v11 = vadd.f32 %v1522_v2, %v1380_v62  ;;  %v1440_v12 = vsel %vm1436_vm6, %v1434_v60, %v1438_v26  ;;  %v1439_v13 = vsel %vm1435_vm7, %v1433_v59, %v1437_v8 }
 0xa23   :  { %v1442_v16 = vadd.f32 %v1440_v12, %v1380_v62  ;;  %v1441_v17 = vadd.f32 %v1439_v13, %v1379_v61 }
 0xa24   :  { %v1525_v14 = vsel %vm210_vm4, %v1523_v10, -inf  ;;  %v1528_v15 = vsel %vm210_vm4, %v1524_v11, -inf }
 0xa25   :  { %1526 = vmax.xlane.f32.xlu0 %v1525_v14  ;;  %1529 = vmax.xlane.f32.xlu1 %v1528_v15  ;;  %v1446_v18 = vsel %vm210_vm4, %v1442_v16, -inf  ;;  %v1443_v19 = vsel %vm210_vm4, %v1441_v17, -inf }
 0xa29   :  { %1447 = vmax.xlane.f32.xlu0 %v1446_v18  ;;  %1444 = vmax.xlane.f32.xlu1 %v1443_v19 }
 0xa2c   :  { %v1737_v20 = vpop.trf.xlu0 }
 0xa2d   :  { %v1764_v24 = vrot.slane %v1737_v20, %v5025_v23 }
 0xa2f   :  { %v1765_v25 = vadd.f32 %v1764_v24, %v1755_v53  ;;  %v1766_v27 = vadd.f32 %v1764_v24, %v1759_v51 }
 0xa31   :  { %vm1768_vm8 = vcmp.ge.f32.partialorder %v1766_v27, 0.0  ;;  %v1770_v28 = vmul.f32 0.2, %v1766_v27  ;;  %vm1767_vm9 = vcmp.ge.f32.partialorder %v1765_v25, 0.0  ;;  %v1769_v29 = vmul.f32 0.2, %v1765_v25 }
 0xa33   :  { %v1772_v30 = vsel %vm1768_vm8, %v1766_v27, %v1770_v28  ;;  %v1771_v31 = vsel %vm1767_vm9, %v1765_v25, %v1769_v29 }
 0xa34   :  { %v1774_v32 = vadd.f32 %v1772_v30, %v1380_v62  ;;  %v1773_v33 = vadd.f32 %v1771_v31, %v1379_v61 }
 0xa36   :  { %v1778_v34 = vsel %vm210_vm4, %v1774_v32, -inf  ;;  %v1775_v35 = vsel %vm210_vm4, %v1773_v33, -inf }
 0xa37   :  { %1779 = vmax.xlane.f32.xlu0 %v1778_v34  ;;  %1776 = vmax.xlane.f32.xlu1 %v1775_v35 }
 0xab2   :  { %v1527_v36 = vpop.xlane.xlu0 %1526  ;;  %v1530_v37 = vpop.xlane.xlu1 %1529 }
 0xab3   :  { %v1531_v38 = vsub.f32 %v1523_v10, %v1527_v36  ;;  %v1532_v23 = vsub.f32 %v1524_v11, %v1530_v37 }
 0xab5   :  { %v1533_v41 = vmul.f32 1.442695, %v1531_v38  ;;  %v1535_v42 = vmul.f32 1.442695, %v1532_v23  ;;  %v3882_v38 = vld [vmem:[%s5547_s3 + $0xb] ss:$0 sm:$0xff] }
 0xab6   :  { %v1448_v45 = vpop.xlane.xlu0 %1447  ;;  %v1445_v46 = vpop.xlane.xlu1 %1444 }
 0xab7   :  { %4662 = vpow2.f32 %v1533_v41  ;;  %v1450_v47 = vsub.f32 %v1442_v16, %v1448_v45  ;;  %v1449_v7 = vsub.f32 %v1441_v17, %v1445_v46  ;;  %v1922_v45 = vld [vmem:[#allocation5 + $0x28] sm:$0xff]  ;;  %v1923_v46 = vld [vmem:[#allocation5 + $0x30] sm:$0xff] }
 0xab8   :  { %4664 = vpow2.f32 %v1535_v42 }
 0xab9   :  { %v1453_v4 = vmul.f32 1.442695, %v1450_v47  ;;  %v1451_v48 = vmul.f32 1.442695, %v1449_v7  ;;  %v4398_v7 = vpack.c.bf16 %v1923_v46, %v1922_v45 }
 0xabb   :  { %4666 = vpow2.f32 %v1453_v4  ;;  %4399 = vmatprep.subr.bf16.mxu0 %v4398_v7 }
 0xabc   :  { %4668 = vpow2.f32 %v1451_v48  ;;  %4401 = vmatpush3.bf16.msra.mxu0 %v4398_v7 }
 0xac1   :  { %v4663_v49 = vpop.eup %4662 }
 0xac2   :  { %v4665_v50 = vpop.eup %4664  ;;  %v1537_v51 = vsel %vm210_vm4, %v4663_v49, 0.0 }
 0xac3   :  { %1538 = vadd.xlane.f32.xlu1 %v1537_v51  ;;  %v1540_v3 = vsel %vm210_vm4, %v4665_v50, 0.0 }
 0xac4   :  { %1541 = vadd.xlane.f32.xlu0 %v1540_v3  ;;  %v1780_v52 = vpop.xlane.xlu0 %1779  ;;  %v1777_v53 = vpop.xlane.xlu1 %1776  ;;  %v3854_v3 = vld [vmem:[%s5547_s3] ss:$0 sm:$0xff] }
 0xac5   :  { %v4667_v9 = vpop.eup %4666  ;;  %v1782_v54 = vsub.f32 %v1774_v32, %v1780_v52  ;;  %v1781_v55 = vsub.f32 %v1773_v33, %v1777_v53 }
 0xac6   :  { %v4669_v56 = vpop.eup %4668  ;;  %v1458_v57 = vsel %vm210_vm4, %v4667_v9, 0.0 }
 0xac7   :  { %v1785_v58 = vmul.f32 1.442695, %v1782_v54  ;;  %v1783_v59 = vmul.f32 1.442695, %v1781_v55  ;;  %v1455_v60 = vsel %vm210_vm4, %v4669_v56, 0.0  ;;  %v2069_v54 = vld [vmem:[#allocation5 + $0x40] sm:$0xff] }
 0xac8   :  { %1459 = vadd.xlane.f32.xlu0 %v1458_v57  ;;  %1456 = vadd.xlane.f32.xlu1 %v1455_v60  ;;  %v2181_v57 = vld [vmem:[#allocation5 + $0x50] sm:$0xff] }
 0xac9   :  { %4670 = vpow2.f32 %v1785_v58 }
 0xaca   :  { %4672 = vpow2.f32 %v1783_v59 }
 0xad3   :  { %v4671_v61 = vpop.eup %4670 }
 0xad4   :  { %v4673_v62 = vpop.eup %4672  ;;  %v1790_v63 = vsel %vm210_vm4, %v4671_v61, 0.0 }
 0xad5   :  { %1791 = vadd.xlane.f32.xlu0 %v1790_v63  ;;  %v1787_v0 = vsel %vm210_vm4, %v4673_v62, 0.0 }
 0xad6   :  { %1788 = vadd.xlane.f32.xlu1 %v1787_v0 }
 0xae7   :  { %4603 = vrot.lane.b32.xlu1 %v5131_v43, %s4916_s19 }
 0xaeb   :  { %1912 = vrot.lane.b32.xlu1 %v5121_v39, %s4919_s6  ;;  %4608 = vrot.lane.b32.xlu0 %v5131_v43, %s4918_s21 }
 0xaef   :  { %1914 = vrot.lane.b32.xlu1 %v5125_v40, %s4919_s6 }
 0xb50   :  { %v1539_v26 = vpop.xlane.xlu1 %1538 }
 0xb51   :  { %4674 = vrcp.f32 %v1539_v26  ;;  %v1542_v8 = vpop.xlane.xlu0 %1541 }
 0xb52   :  { %4676 = vrcp.f32 %v1542_v8 }
 0xb55   :  { %v1460_v10 = vpop.xlane.xlu0 %1459  ;;  %v1457_v11 = vpop.xlane.xlu1 %1456 }
 0xb56   :  { %4678 = vrcp.f32 %v1457_v11 }
 0xb57   :  { %4680 = vrcp.f32 %v1460_v10 }
 0xb5b   :  { %v4675_v1 = vpop.eup %4674 }
 0xb5c   :  { %v1545_v2 = vmul.f32 %v4675_v1, %v4663_v49  ;;  %v4677_v18 = vpop.eup %4676  ;;  %v2718_v1 = vld [vmem:[#allocation5 + $0x68] sm:$0xff] }
 0xb5d   :  { %v1546_v25 = vmul.f32 %v4677_v18, %v4665_v50 }
 0xb5e   :  { %4165 = vmatprep.mubr.msk.f32.mxu1 %vm210_vm4, %v1545_v2  ;;  %v2719_v2 = vld [vmem:[#allocation5 + $0x70] sm:$0xff] }
 0xb60   :  { %v4679_v19 = vpop.eup %4678 }
 0xb61   :  { %v1463_v27 = vmul.f32 %v4679_v19, %v4669_v56  ;;  %v4681_v29 = vpop.eup %4680  ;;  %v2180_v56 = vld [vmem:[#allocation5 + $0x48] sm:$0xff] }
 0xb62   :  { %v1792_v12 = vpop.xlane.xlu0 %1791  ;;  %v1464_v31 = vmul.f32 %v4681_v29, %v4667_v9  ;;  %v2068_v9 = vld [vmem:[#allocation5 + $0x38] sm:$0xff]  ;;  %v5200_v58 = vpack.c.bf16 %v2181_v57, %v2180_v56 }
 0xb63   :  { %v1789_v13 = vpop.xlane.xlu1 %1788  ;;  %v4402_v55 = vpack.c.bf16 %v2069_v54, %v2068_v9 }
 0xb64   :  { %4682 = vrcp.f32 %v1789_v13  ;;  %4407 = vmatprep.subr.bf16.mxu0 %v5200_v58  ;;  %v2183_v13 = vld [vmem:[#allocation5 + $0x60] sm:$0xff] }
 0xb65   :  { %4684 = vrcp.f32 %v1792_v12  ;;  %v2182_v12 = vld [vmem:[#allocation5 + $0x58] sm:$0xff] }
 0xb66   :  { %v4609_v43 = vpop.permute.xlu0 %4608 }
 0xb67   :  { %v4604_v14 = vpop.permute.xlu1 %4603  ;;  %v4611_v20 = vunpack.i.h.bf16 %v4609_v43  ;;  %v4610_v24 = vunpack.i.l.bf16 %v4609_v43 }
 0xb68   :  { %v4606_v15 = vunpack.i.h.bf16 %v4604_v14  ;;  %v4605_v16 = vunpack.i.l.bf16 %v4604_v14  ;;  %v2720_v14 = vld [vmem:[#allocation5 + $0x78] sm:$0xff] }
 0xb69   :  { %v4394_v28 = vpack.c.bf16 %v4611_v20, %v4610_v24  ;;  %v4921_v24 = vmov 0.0  }
 0xb6a   :  { %v4386_v17 = vpack.c.bf16 %v4606_v15, %v4605_v16  ;;  %v2721_v15 = vld [vmem:[#allocation5 + $0x80] sm:$0xff] }
 0xb6b   :  { %v1913_v52 = vpop.permute.xlu1 %1912  ;;  %v5226_v18 = vpack.c.bf16 %v2721_v15, %v2720_v14 }
 0xb6c   :  { %4387 = vmatprep.subr.bf16.mxu1 %v4386_v17 }
 0xb6d   :  { %4389 = vmatpush3.bf16.msra.mxu1 %v4386_v17  ;;  %v5224_v17 = vpack.c.bf16 %v2183_v13, %v2182_v12 }
 0xb6e   :  { %4391 = vmatprep.subr.bf16.mxu1 %v5133_v44  ;;  %v4683_v30 = vpop.eup %4682 }
 0xb6f   :  { %v1795_v32 = vmul.f32 %v4683_v30, %v4673_v62  ;;  %v4685_v33 = vpop.eup %4684  ;;  %v1915_v53 = vpop.permute.xlu1 %1914 }
 0xb70   :  { %4166 = vmatmul.mubr.msk.f32.vlgmr.msra.gmra.mrb[4].mxu1 %vm210_vm4, %v1546_v25  ;;  %v1796_v34 = vmul.f32 %v4685_v33, %v4671_v61 }
 0xb71   :  { %4393 = vmatpush3.bf16.msra.mxu1 %v5133_v44  ;;  %4172 = vmatprep.mubr.msk.f32.mxu1 %vm210_vm4, %v1463_v27  ;;  %v3881_v44 = vld [vmem:[%s5547_s3 + $0xa] ss:$0 sm:$0xff] }
 0xb72   :  { %4395 = vmatprep.subr.bf16.mxu1 %v4394_v28 }
 0xb78   :  { %4173 = vmatmul.mubr.msk.f32.vlgmr.msra.gmra.mrb[4].mxu1 %vm210_vm4, %v1464_v31 }
 0xb79   :  { %4397 = vmatpush3.bf16.msra.mxu1 %v4394_v28  ;;  %4179 = vmatprep.mubr.msk.f32.mxu1 %vm210_vm4, %v1795_v32  ;;  %v5267_v32 = vld [vmem:[%s5547_s3 + $0x2] ss:$0 sm:$0xff] }
 0xb7a   :  { %4490 = vmatprep.subr.bf16.mxu1 %v4398_v7 }
 0xb80   :  { %4180 = vmatmul.mubr.msk.f32.vlgmr.msra.gmra.mrb[4].mxu1 %vm210_vm4, %v1796_v34 }
 0xb81   :  { %4491 = vmatpush3.bf16.msra.mxu1 %v4398_v7 }
 0xb82   :  { %4403 = vmatprep.subr.bf16.mxu1 %v4402_v55 }
 0xc53   :  { %v4181_v35 = vpop.f32.mrb[4].mxu1 }
 0xc54   :  { %v1887_v36 = vadd.f32 %v4181_v35, %v5125_v40  ;;  %v1875_v37 = vpop.f32.mrb[5].mxu1 }
 0xc55   :  { %v1886_v23 = vadd.f32 %v1875_v37, %v5121_v39 }
 0xc56   :  { %v1894_v41 = vmul.f32 %v3881_v44, %v1887_v36 }
 0xc57   :  { %v1893_v42 = vmul.f32 %v3881_v44, %v1886_v23  ;;  %v5273_v44 = vld [vmem:[%s5547_s3 + $0x1] ss:$0 sm:$0xff] }
 0xc58   :  { %v1901_v47 = vadd.f32 %v3882_v38, %v1894_v41 }
 0xc59   :  { %v1900_v4 = vadd.f32 %v3882_v38, %v1893_v42 }
 0xc5a   :  { %vm1903_vm10 = vcmp.ge.f32.partialorder %v1901_v47, 0.0  ;;  %v1905_v48 = vmul.f32 0.01, %v1901_v47 }
 0xc5b   :  { %vm1902_vm11 = vcmp.ge.f32.partialorder %v1900_v4, 0.0  ;;  %v1904_v49 = vmul.f32 0.01, %v1900_v4 }
 0xc5c   :  { %v5182_v50 = vsel %vm1903_vm10, %v1901_v47, %v1905_v48 }
 0xc5d   :  { %1920 = vrot.lane.b32.xlu1 %v5182_v50, %s4919_s6  ;;  %v5186_v51 = vsel %vm1902_vm11, %v1900_v4, %v1904_v49 }
 0xc5e   :  { %1918 = vrot.lane.b32.xlu0 %v5186_v51, %s4919_s6 }
 0xc61   :  { %1908 = vrot.lane.b32.xlu1 %v5062_v21, %s4919_s6 }
 0xc62   :  { %141 = vrot.lane.b32.xlu0 %v3854_v3, %s4919_s6 }
 0xc65   :  { %1939 = vrot.lane.b32.xlu1 %v1913_v52, %s4920_s1 }
 0xc66   :  { %1910 = vrot.lane.b32.xlu0 %v5066_v22, %s4919_s6 }
 0xc6a   :  { %1941 = vrot.lane.b32.xlu0 %v1915_v53, %s4920_s1 }
 0xccf   :  { %v1921_v59 = vpop.permute.xlu1 %1920 }
 0xcd0   :  { %1945 = vrot.lane.b32.xlu0 %v1921_v59, %s4920_s1  ;;  %v1919_v60 = vpop.permute.xlu0 %1918 }
 0xcd1   :  { %1943 = vrot.lane.b32.xlu1 %v1919_v60, %s4920_s1 }
 0xcd3   :  { %v1909_v61 = vpop.permute.xlu1 %1908 }
 0xcd4   :  { %v142_v62 = vpop.permute.xlu0 %141 }
 0xcd5   :  { %v5206_v63 = vadd.f32 %v142_v62, %v4993_v6  ;;  %v5209_v0 = vadd.f32 %v4989_v5, %v142_v62  ;;  %v5218_v6 = vpack.c.bf16 %v2719_v2, %v2718_v1 }
 0xcd7   :  { %v1940_v26 = vpop.permute.xlu1 %1939  ;;  %1933 = vrot.lane.b32.xlu0 %v5209_v0, %s4920_s1  ;;  %1931 = vrot.lane.b32.xlu1 %v5206_v63, %s4920_s1 }
 0xcd8   :  { %4192 = vmatprep.mubr.msk.f32.mxu1 %vm210_vm4, %v1940_v26  ;;  %v1911_v8 = vpop.permute.xlu0 %1910 }
 0xcdb   :  { %1935 = vrot.lane.b32.xlu1 %v1909_v61, %s4920_s1  ;;  %1937 = vrot.lane.b32.xlu0 %v1911_v8, %s4920_s1 }
 0xcdc   :  { %v1942_v5 = vpop.permute.xlu0 %1941 }
 0xcdd   :  { %4193 = vmatmul.mubr.msk.f32.vlgmr.msra.gmra.mrb[6].mxu1 %vm210_vm4, %v1942_v5 }
 0xcde   :  { %4405 = vmatpush3.bf16.msra.mxu1 %v4402_v55 }
 0xcdf   :  { %4439 = vmatprep.subr.bf16.mxu1 %v5218_v6 }
 0xd42   :  { %v1946_v11 = vpop.permute.xlu0 %1945 }
 0xd43   :  { %v1944_v10 = vpop.permute.xlu1 %1943 }
 0xd44   :  { %4195 = vmatprep.mubr.msk.f32.mxu1 %vm210_vm4, %v1944_v10 }
 0xd45   :  { %4196 = vmatmul.mubr.msk.f32.gmra.mrb[8].mxu1 %vm210_vm4, %v1946_v11 }
 0xd49   :  { %v1932_v16 = vpop.permute.xlu1 %1931  ;;  %v1934_v43 = vpop.permute.xlu0 %1933 }
 0xd4a   :  { %4186 = vmatprep.mubr.msk.f32.mxu0 %vm210_vm4, %v1932_v16  ;;  %4202 = vmatprep.mubr.msk.f32.mxu1 %vm210_vm4, %v1932_v16 }
 0xd4b   :  { %4187 = vmatmul.mubr.msk.f32.vlgmr.msra.gmra.mrb[6].mxu0 %vm210_vm4, %v1934_v43  ;;  %4203 = vmatmul.mubr.msk.f32.vlgmr.msra.gmra.mrb[10].mxu1 %vm210_vm4, %v1934_v43 }
 0xd4c   :  { %4409 = vmatpush3.bf16.msra.mxu0 %v5200_v58  ;;  %4441 = vmatpush3.bf16.msra.mxu1 %v5218_v6 }
 0xd4d   :  { %v1936_v19 = vpop.permute.xlu1 %1935  ;;  %v1938_v20 = vpop.permute.xlu0 %1937  ;;  %4411 = vmatprep.subr.bf16.mxu0 %v5224_v17  ;;  %4443 = vmatprep.subr.bf16.mxu1 %v5226_v18 }
 0xd4e   :  { %4189 = vmatprep.mubr.msk.f32.mxu0 %vm210_vm4, %v1936_v19  ;;  %4205 = vmatprep.mubr.msk.f32.mxu1 %vm210_vm4, %v1936_v19 }
 0xd4f   :  { %4190 = vmatmul.mubr.msk.f32.gmra.mrb[8].mxu0 %vm210_vm4, %v1938_v20  ;;  %4206 = vmatmul.mubr.msk.f32.gmra.mrb[12].mxu1 %vm210_vm4, %v1938_v20 }
 0xd50   :  { %4208 = vmatprep.mubr.msk.f32.mxu1 %vm210_vm4, %v1940_v26  ;;  %4413 = vmatpush3.bf16.msra.mxu0 %v5224_v17 }
 0xd51   :  { %4222 = vmatprep.mubr.f32.mxu0 %v4921_v24  ;;  %4445 = vmatpush3.bf16.msra.mxu1 %v5226_v18 }
 0xd52   :  { %4447 = vmatprep.subr.bf16.mxu1 %v5218_v6  ;;  %4415 = vmatprep.subr.bf16.mxu0 %v5200_v58 }
 0xd53   :  { %4209 = vmatmul.mubr.msk.f32.gmra.mrb[14].mxu1 %vm210_vm4, %v1942_v5  ;;  %4223 = vmatmul.mubr.f32.vlgmr.msra.gmra.mrb[6].mxu0 %v4921_v24 }
 0xd54   :  { %4211 = vmatprep.mubr.msk.f32.mxu1 %vm210_vm4, %v1944_v10  ;;  %4417 = vmatpush3.bf16.msra.mxu0 %v5200_v58 }
 0xd55   :  { %4419 = vmatprep.subr.bf16.mxu0 %v5224_v17 }
 0xd57   :  { %4212 = vmatmul.mubr.msk.f32.gmra.mrb[16].mxu1 %vm210_vm4, %v1946_v11 }
 0xd58   :  { %4266 = vmatprep.mubr.f32.mxu1 %v4921_v24  ;;  %4421 = vmatpush3.bf16.msra.mxu0 %v5224_v17 }
 0xd59   :  { %4423 = vmatprep.subr.bf16.mxu0 %v5200_v58 }
 0xd5f   :  { %4267 = vmatmul.mubr.f32.vlgmr.msra.gmra.mrb[16].mxu1 %v4921_v24 }
 0xd60   :  { %4449 = vmatpush3.bf16.msra.mxu1 %v5218_v6 }
 0xd61   :  { %4451 = vmatprep.subr.bf16.mxu1 %v5226_v18 }
 0xd64   :  { %4453 = vmatpush3.bf16.msra.mxu1 %v5226_v18 }
 0xd65   :  { %4455 = vmatprep.subr.bf16.mxu1 %v5218_v6 }
 0xdb0   :  { %v5256_v25 = vpop.f32.mrb[6].mxu1 }
 0xdb1   :  { %v5258_v27 = vpop.f32.mrb[7].mxu1 }
 0xe18   :  { %v5260_v28 = vpop.f32.mrb[8].mxu1 }
 0xe19   :  { %v5262_v29 = vpop.f32.mrb[9].mxu1 }
 0xe26   :  { %v4224_v30 = vpop.f32.mrb[6].mxu0 }
 0xe27   :  { %v2254_v31 = vpop.f32.mrb[7].mxu0  ;;  %v4492_v37 = vadd.f32 %v4224_v30, %v5273_v44 }
 0xe28   :  { %v4493_v38 = vadd.f32 %v5273_v44, %v2254_v31 }
 0xe29   :  { %v3902_v7 = vmul.f32 -1.442695, %v4492_v37 }
 0xe2a   :  { %v3901_v4 = vmul.f32 -1.442695, %v4493_v38 }
 0xe32   :  { %v4268_v33 = vpop.f32.mrb[16].mxu1 }
 0xe33   :  { %v4510_v34 = vadd.f32 %v4268_v33, %v5267_v32  ;;  %v2788_v35 = vpop.f32.mrb[17].mxu1 }
 0xe34   :  { %v4511_v36 = vadd.f32 %v5267_v32, %v2788_v35 }
 0xe35   :  { %4686 = vtanh.f32 %v4510_v34  ;;  %v3916_v46 = vmul.f32 -1.442695, %v4510_v34 }
 0xe36   :  { %4688 = vtanh.f32 %v4511_v36  ;;  %v3915_v47 = vmul.f32 -1.442695, %v4511_v36 }
 0xe37   :  { %4690 = vtanh.f32 %v4492_v37 }
 0xe38   :  { %4692 = vtanh.f32 %v4493_v38 }
 0xe39   :  { %4694 = vpow2.f32 %v3916_v46 }
 0xe3a   :  { %4696 = vpow2.f32 %v3915_v47 }
 0xe3b   :  { %4698 = vpow2.f32 %v3902_v7 }
 0xe3c   :  { %4700 = vpow2.f32 %v3901_v4 }
 0xe3f   :  { %v4687_v23 = vpop.eup %4686 }
 0xe40   :  { %v4689_v41 = vpop.eup %4688  ;;  %2819 = vrot.lane.b32.xlu0 %v4687_v23, %s4922_s17 }
 0xe41   :  { %2817 = vrot.lane.b32.xlu1 %v4689_v41, %s4922_s17  ;;  %v4691_v42 = vpop.eup %4690 }
 0xe42   :  { %v4693_v45 = vpop.eup %4692 }
 0xe43   :  { %v4695_v48 = vpop.eup %4694 }
 0xe44   :  { %2285 = vrot.lane.b32.xlu0 %v4691_v42, %s4922_s17  ;;  %v4697_v49 = vpop.eup %4696  ;;  %v2806_v3 = vadd.f32 1.0, %v4695_v48 }
 0xe45   :  { %2283 = vrot.lane.b32.xlu1 %v4693_v45, %s4922_s17  ;;  %v4699_v52 = vpop.eup %4698  ;;  %v2805_v53 = vadd.f32 1.0, %v4697_v49 }
 0xe46   :  { %v4701_v9 = vpop.eup %4700  ;;  %v2272_v54 = vadd.f32 1.0, %v4699_v52  ;;  %4702 = vrcp.f32 %v2806_v3 }
 0xe47   :  { %v2271_v55 = vadd.f32 1.0, %v4701_v9  ;;  %4704 = vrcp.f32 %v2805_v53 }
 0xe48   :  { %4706 = vrcp.f32 %v2272_v54 }
 0xe49   :  { %4708 = vrcp.f32 %v2271_v55 }
 0xe50   :  { %v4703_v56 = vpop.eup %4702 }
 0xe51   :  { %v4705_v59 = vpop.eup %4704  ;;  %v2814_v11 = vmul.f32 0.0, %v4703_v56 }
 0xe52   :  { %v4707_v26 = vpop.eup %4706  ;;  %v2813_v13 = vmul.f32 0.0, %v4705_v59 }
 0xe53   :  { %v4709_v1 = vpop.eup %4708  ;;  %v2280_v43 = vmul.f32 0.0, %v4707_v26 }
 0xe54   :  { %v2279_v20 = vmul.f32 0.0, %v4709_v1 }
 0xeb2   :  { %v2820_v57 = vpop.permute.xlu0 %2819 }
 0xeb3   :  { %v2824_v60 = vmul.f32 %v4703_v56, %v2820_v57  ;;  %v2818_v61 = vpop.permute.xlu1 %2817 }
 0xeb4   :  { %v2823_v62 = vmul.f32 %v4705_v59, %v2818_v61 }
 0xeb5   :  { %2829 = vrot.lane.b32.xlu0 %v2824_v60, %s4923_s2 }
 0xeb6   :  { %v2286_v8 = vpop.permute.xlu0 %2285  ;;  %2827 = vrot.lane.b32.xlu1 %v2823_v62, %s4923_s2 }
 0xeb7   :  { %v2290_v2 = vmul.f32 %v4707_v26, %v2286_v8  ;;  %v2284_v5 = vpop.permute.xlu1 %2283 }
 0xeb8   :  { %v2289_v10 = vmul.f32 %v4709_v1, %v2284_v5 }
 0xeb9   :  { %2295 = vrot.lane.b32.xlu0 %v2290_v2, %s4923_s2 }
 0xeba   :  { %2293 = vrot.lane.b32.xlu1 %v2289_v10, %s4923_s2 }
 0xf27   :  { %v2830_v12 = vpop.permute.xlu0 %2829 }
 0xf28   :  { %v5286_v14 = vadd.f32 %v2830_v12, %v2814_v11  ;;  %v2828_v15 = vpop.permute.xlu1 %2827 }
 0xf29   :  { %v5288_v16 = vadd.f32 %v2828_v15, %v2813_v13 }
 0xf2a   :  { %4710 = vtanh.f32 %v5286_v14 }
 0xf2b   :  { %4712 = vtanh.f32 %v5288_v16  ;;  %v2296_v19 = vpop.permute.xlu0 %2295 }
 0xf2c   :  { %v5292_v24 = vadd.f32 %v2296_v19, %v2280_v43  ;;  %v2294_v30 = vpop.permute.xlu1 %2293 }
 0xf2d   :  { %v5294_v31 = vadd.f32 %v2294_v30, %v2279_v20 }
 0xf2e   :  { %4714 = vtanh.f32 %v5292_v24 }
 0xf2f   :  { %4716 = vtanh.f32 %v5294_v31 }
 0xf34   :  { %v4711_v33 = vpop.eup %4710 }
 0xf35   :  { %v4713_v34 = vpop.eup %4712  ;;  %2841 = vrot.lane.b32.xlu0 %v4711_v33, %s4922_s17 }
 0xf36   :  { %2839 = vrot.lane.b32.xlu1 %v4713_v34, %s4922_s17 }
 0xf38   :  { %v4715_v35 = vpop.eup %4714 }
 0xf39   :  { %v4717_v36 = vpop.eup %4716  ;;  %2307 = vrot.lane.b32.xlu0 %v4715_v35, %s4922_s17 }
 0xf3a   :  { %2305 = vrot.lane.b32.xlu1 %v4717_v36, %s4922_s17 }
 0xfa7   :  { %v2842_v37 = vpop.permute.xlu0 %2841 }
 0xfa8   :  { %v2846_v38 = vmul.f32 %v4703_v56, %v2842_v37  ;;  %v2840_v23 = vpop.permute.xlu1 %2839 }
 0xfa9   :  { %v2845_v41 = vmul.f32 %v4705_v59, %v2840_v23 }
 0xfaa   :  { %2851 = vrot.lane.b32.xlu0 %v2846_v38, %s4923_s2 }
 0xfab   :  { %v2308_v42 = vpop.permute.xlu0 %2307  ;;  %2849 = vrot.lane.b32.xlu1 %v2845_v41, %s4923_s2 }
 0xfac   :  { %v2312_v45 = vmul.f32 %v4707_v26, %v2308_v42  ;;  %v2306_v46 = vpop.permute.xlu1 %2305 }
 0xfad   :  { %v2311_v47 = vmul.f32 %v4709_v1, %v2306_v46 }
 0xfae   :  { %2317 = vrot.lane.b32.xlu0 %v2312_v45, %s4923_s2 }
 0xfaf   :  { %2315 = vrot.lane.b32.xlu1 %v2311_v47, %s4923_s2 }
0x101c   :  { %v5306_v7 = vpop.permute.xlu0 %2851 }
0x101d   :  { %v5308_v4 = vpop.permute.xlu1 %2849 }
0x101e   :  { %4277 = vmatprep.mubr.msk.f32.mxu1 %vm2184_vm12, %v5308_v4 }
0x101f   :  { %4278 = vmatmul.mubr.msk.f32.vlgmr.msra.gmra.mrb[14].mxu1 %vm2184_vm12, %v5306_v7 }
0x1020   :  { %4457 = vmatpush3.bf16.msra.mxu1 %v5218_v6  ;;  %v5318_v49 = vpop.permute.xlu0 %2317 }
0x1021   :  { %v5315_v48 = vpop.permute.xlu1 %2315  ;;  %4459 = vmatprep.subr.bf16.mxu1 %v5226_v18 }
0x1022   :  { %4233 = vmatprep.mubr.msk.f32.mxu0 %vm2184_vm12, %v5315_v48 }
0x1023   :  { %4234 = vmatmul.mubr.msk.f32.vlgmr.msra.gmra.mrb[8].mxu0 %vm2184_vm12, %v5318_v49 }
0x1024   :  { %4425 = vmatpush3.bf16.msra.mxu0 %v5200_v58  ;;  %4461 = vmatpush3.bf16.msra.mxu1 %v5226_v18 }
0x1025   :  { %4427 = vmatprep.subr.bf16.mxu0 %v5224_v17  ;;  %4463 = vmatprep.subr.bf16.mxu1 %v5218_v6 }
0x1028   :  { %4429 = vmatpush3.bf16.msra.mxu0 %v5224_v17 }
0x1029   :  { %4431 = vmatprep.subr.bf16.mxu0 %v5200_v58 }
0x10f2   :  { %v4279_v3 = vpop.f32.mrb[14].mxu1 }
0x10f3   :  { %v4508_v52 = vadd.f32 %v4279_v3, %v5267_v32  ;;  %v2923_v53 = vpop.f32.mrb[15].mxu1 }
0x10f4   :  { %v4509_v9 = vadd.f32 %v5267_v32, %v2923_v53 }
0x10f5   :  { %4718 = vtanh.f32 %v4508_v52  ;;  %v3920_v26 = vmul.f32 -1.442695, %v4508_v52 }
0x10f6   :  { %4720 = vtanh.f32 %v4509_v9  ;;  %v4235_v54 = vpop.f32.mrb[8].mxu0  ;;  %v3919_v8 = vmul.f32 -1.442695, %v4509_v9 }
0x10f7   :  { %v4494_v55 = vadd.f32 %v4235_v54, %v5273_v44  ;;  %v2389_v56 = vpop.f32.mrb[9].mxu0 }
0x10f8   :  { %v4495_v57 = vadd.f32 %v5273_v44, %v2389_v56 }
0x10f9   :  { %4722 = vtanh.f32 %v4494_v55  ;;  %v3906_v1 = vmul.f32 -1.442695, %v4494_v55 }
0x10fa   :  { %4724 = vtanh.f32 %v4495_v57  ;;  %v3905_v2 = vmul.f32 -1.442695, %v4495_v57 }
0x10fb   :  { %4726 = vpow2.f32 %v3920_v26 }
0x10fc   :  { %4728 = vpow2.f32 %v3919_v8 }
0x10fd   :  { %4730 = vpow2.f32 %v3906_v1 }
0x10fe   :  { %4732 = vpow2.f32 %v3905_v2 }
0x10ff   :  { %v4719_v59 = vpop.eup %4718 }
0x1100   :  { %v4721_v60 = vpop.eup %4720  ;;  %2954 = vrot.lane.b32.xlu0 %v4719_v59, %s4922_s17 }
0x1101   :  { %2952 = vrot.lane.b32.xlu1 %v4721_v60, %s4922_s17 }
0x1103   :  { %v4723_v61 = vpop.eup %4722 }
0x1104   :  { %v4725_v62 = vpop.eup %4724  ;;  %2420 = vrot.lane.b32.xlu0 %v4723_v61, %s4922_s17 }
0x1105   :  { %2418 = vrot.lane.b32.xlu1 %v4725_v62, %s4922_s17  ;;  %v4727_v5 = vpop.eup %4726 }
0x1106   :  { %v4729_v10 = vpop.eup %4728  ;;  %v2941_v11 = vadd.f32 1.0, %v4727_v5 }
0x1107   :  { %v4731_v12 = vpop.eup %4730  ;;  %v2940_v13 = vadd.f32 1.0, %v4729_v10 }
0x1108   :  { %v4733_v15 = vpop.eup %4732  ;;  %4734 = vrcp.f32 %v2941_v11  ;;  %v2407_v43 = vadd.f32 1.0, %v4731_v12 }
0x1109   :  { %4736 = vrcp.f32 %v2940_v13  ;;  %v2406_v19 = vadd.f32 1.0, %v4733_v15 }
0x110a   :  { %4738 = vrcp.f32 %v2407_v43 }
0x110b   :  { %4740 = vrcp.f32 %v2406_v19 }
0x1112   :  { %v4735_v20 = vpop.eup %4734 }
0x1113   :  { %v4737_v33 = vpop.eup %4736  ;;  %v2949_v46 = vmul.f32 %v4735_v20, %v5286_v14 }
0x1114   :  { %v4739_v37 = vpop.eup %4738  ;;  %v2948_v3 = vmul.f32 %v4737_v33, %v5288_v16 }
0x1115   :  { %v4741_v23 = vpop.eup %4740  ;;  %v2415_v54 = vmul.f32 %v4739_v37, %v5292_v24 }
0x1116   :  { %v2414_v56 = vmul.f32 %v4741_v23, %v5294_v31 }
0x1172   :  { %v2955_v30 = vpop.permute.xlu0 %2954 }
0x1173   :  { %v2959_v34 = vmul.f32 %v4735_v20, %v2955_v30  ;;  %v2953_v35 = vpop.permute.xlu1 %2952  ;;  %v2055_v30 = vadd.f32 %v5256_v25, %v5273_v44 }
0x1174   :  { %v2958_v36 = vmul.f32 %v4737_v33, %v2953_v35 }
0x1175   :  { %2964 = vrot.lane.b32.xlu0 %v2959_v34, %s4923_s2 }
0x1176   :  { %v2421_v38 = vpop.permute.xlu0 %2420  ;;  %2962 = vrot.lane.b32.xlu1 %v2958_v36, %s4923_s2 }
0x1177   :  { %v2425_v41 = vmul.f32 %v4739_v37, %v2421_v38  ;;  %v2419_v42 = vpop.permute.xlu1 %2418 }
0x1178   :  { %v2424_v45 = vmul.f32 %v4741_v23, %v2419_v42 }
0x1179   :  { %2430 = vrot.lane.b32.xlu0 %v2425_v41, %s4923_s2 }
0x117a   :  { %2428 = vrot.lane.b32.xlu1 %v2424_v45, %s4923_s2 }
0x11e7   :  { %v2965_v47 = vpop.permute.xlu0 %2964 }
0x11e8   :  { %v5344_v52 = vadd.f32 %v2965_v47, %v2949_v46  ;;  %v2963_v53 = vpop.permute.xlu1 %2962 }
0x11e9   :  { %v5346_v9 = vadd.f32 %v2963_v53, %v2948_v3 }
0x11ea   :  { %4742 = vtanh.f32 %v5344_v52 }
0x11eb   :  { %4744 = vtanh.f32 %v5346_v9  ;;  %v2431_v55 = vpop.permute.xlu0 %2430 }
0x11ec   :  { %v5352_v57 = vadd.f32 %v2431_v55, %v2415_v54  ;;  %v2429_v14 = vpop.permute.xlu1 %2428 }
0x11ed   :  { %v5354_v59 = vadd.f32 %v2429_v14, %v2414_v56 }
0x11ee   :  { %4746 = vtanh.f32 %v5352_v57 }
0x11ef   :  { %4748 = vtanh.f32 %v5354_v59 }
0x11f4   :  { %v4743_v16 = vpop.eup %4742 }
0x11f5   :  { %v4745_v60 = vpop.eup %4744  ;;  %2976 = vrot.lane.b32.xlu0 %v4743_v16, %s4922_s17 }
0x11f6   :  { %2974 = vrot.lane.b32.xlu1 %v4745_v60, %s4922_s17 }
0x11f8   :  { %v4747_v24 = vpop.eup %4746 }
0x11f9   :  { %v4749_v61 = vpop.eup %4748  ;;  %2442 = vrot.lane.b32.xlu0 %v4747_v24, %s4922_s17 }
0x11fa   :  { %2440 = vrot.lane.b32.xlu1 %v4749_v61, %s4922_s17 }
0x1267   :  { %v2977_v31 = vpop.permute.xlu0 %2976 }
0x1268   :  { %v2981_v62 = vmul.f32 %v4735_v20, %v2977_v31  ;;  %v2975_v26 = vpop.permute.xlu1 %2974 }
0x1269   :  { %v2980_v8 = vmul.f32 %v4737_v33, %v2975_v26  ;;  %v2050_v33 = vadd.f32 %v5273_v44, %v5258_v27 }
0x126a   :  { %2986 = vrot.lane.b32.xlu0 %v2981_v62, %s4923_s2 }
0x126b   :  { %v2443_v1 = vpop.permute.xlu0 %2442  ;;  %2984 = vrot.lane.b32.xlu1 %v2980_v8, %s4923_s2 }
0x126c   :  { %v2447_v2 = vmul.f32 %v4739_v37, %v2443_v1  ;;  %v2441_v5 = vpop.permute.xlu1 %2440 }
0x126d   :  { %v2446_v10 = vmul.f32 %v4741_v23, %v2441_v5 }
0x126e   :  { %2452 = vrot.lane.b32.xlu0 %v2447_v2, %s4923_s2 }
0x126f   :  { %2450 = vrot.lane.b32.xlu1 %v2446_v10, %s4923_s2 }
0x12dc   :  { %v5366_v11 = vpop.permute.xlu0 %2986 }
0x12dd   :  { %v5368_v12 = vpop.permute.xlu1 %2984 }
0x12de   :  { %4288 = vmatprep.mubr.msk.f32.mxu1 %vm2184_vm12, %v5368_v12 }
0x12df   :  { %4289 = vmatmul.mubr.msk.f32.vlgmr.msra.gmra.mrb[12].mxu1 %vm2184_vm12, %v5366_v11 }
0x12e0   :  { %4465 = vmatpush3.bf16.msra.mxu1 %v5218_v6  ;;  %v5378_v15 = vpop.permute.xlu0 %2452 }
0x12e1   :  { %v5375_v13 = vpop.permute.xlu1 %2450  ;;  %4467 = vmatprep.subr.bf16.mxu1 %v5226_v18 }
0x12e2   :  { %4244 = vmatprep.mubr.msk.f32.mxu0 %vm2184_vm12, %v5375_v13 }
0x12e3   :  { %4245 = vmatmul.mubr.msk.f32.vlgmr.msra.gmra.mrb[10].mxu0 %vm2184_vm12, %v5378_v15 }
0x12e4   :  { %4433 = vmatpush3.bf16.msra.mxu0 %v5200_v58  ;;  %4469 = vmatpush3.bf16.msra.mxu1 %v5226_v18 }
0x12e5   :  { %4435 = vmatprep.subr.bf16.mxu0 %v5224_v17 }
0x12e8   :  { %4437 = vmatpush3.bf16.msra.mxu0 %v5224_v17 }
0x13b2   :  { %v4290_v6 = vpop.f32.mrb[12].mxu1 }
0x13b3   :  { %v4506_v43 = vadd.f32 %v4290_v6, %v5267_v32  ;;  %v3058_v19 = vpop.f32.mrb[13].mxu1 }
0x13b4   :  { %v4507_v20 = vadd.f32 %v5267_v32, %v3058_v19 }
0x13b5   :  { %4750 = vtanh.f32 %v4506_v43  ;;  %v3924_v25 = vmul.f32 -1.442695, %v4506_v43 }
0x13b6   :  { %4752 = vtanh.f32 %v4507_v20  ;;  %v4246_v58 = vpop.f32.mrb[10].mxu0  ;;  %v3923_v27 = vmul.f32 -1.442695, %v4507_v20 }
0x13b7   :  { %v2534_v18 = vadd.f32 %v4246_v58, %v2055_v30  ;;  %v2524_v34 = vpop.f32.mrb[11].mxu0 }
0x13b8   :  { %v2533_v35 = vadd.f32 %v2524_v34, %v2050_v33 }
0x13b9   :  { %4754 = vtanh.f32 %v2534_v18  ;;  %v3910_v23 = vmul.f32 -1.442695, %v2534_v18 }
0x13ba   :  { %4756 = vtanh.f32 %v2533_v35  ;;  %v3909_v41 = vmul.f32 -1.442695, %v2533_v35 }
0x13bb   :  { %4758 = vpow2.f32 %v3924_v25 }
0x13bc   :  { %4760 = vpow2.f32 %v3923_v27 }
0x13bd   :  { %4762 = vpow2.f32 %v3910_v23 }
0x13be   :  { %4764 = vpow2.f32 %v3909_v41 }
0x13bf   :  { %v4751_v17 = vpop.eup %4750 }
0x13c0   :  { %v4753_v36 = vpop.eup %4752  ;;  %3089 = vrot.lane.b32.xlu0 %v4751_v17, %s4922_s17 }
0x13c1   :  { %3087 = vrot.lane.b32.xlu1 %v4753_v36, %s4922_s17 }
0x13c3   :  { %v4755_v37 = vpop.eup %4754 }
0x13c4   :  { %v4757_v38 = vpop.eup %4756  ;;  %2555 = vrot.lane.b32.xlu0 %v4755_v37, %s4922_s17 }
0x13c5   :  { %2553 = vrot.lane.b32.xlu1 %v4757_v38, %s4922_s17  ;;  %v4759_v42 = vpop.eup %4758 }
0x13c6   :  { %v4761_v45 = vpop.eup %4760  ;;  %v3076_v46 = vadd.f32 1.0, %v4759_v42 }
0x13c7   :  { %v4763_v47 = vpop.eup %4762  ;;  %v3075_v3 = vadd.f32 1.0, %v4761_v45 }
0x13c8   :  { %v4765_v53 = vpop.eup %4764  ;;  %4766 = vrcp.f32 %v3076_v46  ;;  %v2542_v54 = vadd.f32 1.0, %v4763_v47 }
0x13c9   :  { %4768 = vrcp.f32 %v3075_v3  ;;  %v2541_v55 = vadd.f32 1.0, %v4765_v53 }
0x13ca   :  { %4770 = vrcp.f32 %v2542_v54 }
0x13cb   :  { %4772 = vrcp.f32 %v2541_v55 }
0x13d2   :  { %v4767_v56 = vpop.eup %4766 }
0x13d3   :  { %v4769_v16 = vpop.eup %4768  ;;  %v3084_v5 = vmul.f32 %v4767_v56, %v5344_v52 }
0x13d4   :  { %v4771_v31 = vpop.eup %4770  ;;  %v3083_v6 = vmul.f32 %v4769_v16, %v5346_v9 }
0x13d5   :  { %v4773_v26 = vpop.eup %4772  ;;  %v2550_v30 = vmul.f32 %v4771_v31, %v5352_v57 }
0x13d6   :  { %v2549_v58 = vmul.f32 %v4773_v26, %v5354_v59 }
0x1432   :  { %v3090_v14 = vpop.permute.xlu0 %3089 }
0x1433   :  { %v3094_v60 = vmul.f32 %v4767_v56, %v3090_v14  ;;  %v3088_v24 = vpop.permute.xlu1 %3087  ;;  %v2060_v14 = vadd.f32 %v5273_v44, %v5262_v29 }
0x1434   :  { %v3093_v61 = vmul.f32 %v4769_v16, %v3088_v24 }
0x1435   :  { %3099 = vrot.lane.b32.xlu0 %v3094_v60, %s4923_s2 }
0x1436   :  { %v2556_v62 = vpop.permute.xlu0 %2555  ;;  %3097 = vrot.lane.b32.xlu1 %v3093_v61, %s4923_s2 }
0x1437   :  { %v2560_v8 = vmul.f32 %v4771_v31, %v2556_v62  ;;  %v2554_v1 = vpop.permute.xlu1 %2553 }
0x1438   :  { %v2559_v2 = vmul.f32 %v4773_v26, %v2554_v1 }
0x1439   :  { %2565 = vrot.lane.b32.xlu0 %v2560_v8, %s4923_s2 }
0x143a   :  { %2563 = vrot.lane.b32.xlu1 %v2559_v2, %s4923_s2 }
0x14a7   :  { %v3100_v10 = vpop.permute.xlu0 %3099 }
0x14a8   :  { %v5404_v43 = vadd.f32 %v3100_v10, %v3084_v5  ;;  %v3098_v19 = vpop.permute.xlu1 %3097 }
0x14a9   :  { %v5406_v20 = vadd.f32 %v3098_v19, %v3083_v6 }
0x14aa   :  { %4774 = vtanh.f32 %v5404_v43 }
0x14ab   :  { %4776 = vtanh.f32 %v5406_v20  ;;  %v2566_v33 = vpop.permute.xlu0 %2565 }
0x14ac   :  { %v5412_v18 = vadd.f32 %v2566_v33, %v2550_v30  ;;  %v2564_v52 = vpop.permute.xlu1 %2563 }
0x14ad   :  { %v5414_v34 = vadd.f32 %v2564_v52, %v2549_v58 }
0x14ae   :  { %4778 = vtanh.f32 %v5412_v18 }
0x14af   :  { %4780 = vtanh.f32 %v5414_v34 }
0x14b4   :  { %v4775_v9 = vpop.eup %4774 }
0x14b5   :  { %v4777_v35 = vpop.eup %4776  ;;  %3111 = vrot.lane.b32.xlu0 %v4775_v9, %s4922_s17 }
0x14b6   :  { %3109 = vrot.lane.b32.xlu1 %v4777_v35, %s4922_s17 }
0x14b8   :  { %v4779_v57 = vpop.eup %4778 }
0x14b9   :  { %v4781_v17 = vpop.eup %4780  ;;  %2577 = vrot.lane.b32.xlu0 %v4779_v57, %s4922_s17 }
0x14ba   :  { %2575 = vrot.lane.b32.xlu1 %v4781_v17, %s4922_s17 }
0x1527   :  { %v3112_v59 = vpop.permute.xlu0 %3111 }
0x1528   :  { %v3116_v36 = vmul.f32 %v4767_v56, %v3112_v59  ;;  %v3110_v37 = vpop.permute.xlu1 %3109  ;;  %v2065_v56 = vadd.f32 %v5260_v28, %v5273_v44 }
0x1529   :  { %v3115_v38 = vmul.f32 %v4769_v16, %v3110_v37 }
0x152a   :  { %3121 = vrot.lane.b32.xlu0 %v3116_v36, %s4923_s2 }
0x152b   :  { %v2578_v25 = vpop.permute.xlu0 %2577  ;;  %3119 = vrot.lane.b32.xlu1 %v3115_v38, %s4923_s2 }
0x152c   :  { %v2582_v27 = vmul.f32 %v4771_v31, %v2578_v25  ;;  %v2576_v23 = vpop.permute.xlu1 %2575 }
0x152d   :  { %v2581_v41 = vmul.f32 %v4773_v26, %v2576_v23 }
0x152e   :  { %2587 = vrot.lane.b32.xlu0 %v2582_v27, %s4923_s2 }
0x152f   :  { %2585 = vrot.lane.b32.xlu1 %v2581_v41, %s4923_s2 }
0x159c   :  { %v5426_v42 = vpop.permute.xlu0 %3121 }
0x159d   :  { %v5428_v45 = vpop.permute.xlu1 %3119 }
0x159e   :  { %4299 = vmatprep.mubr.msk.f32.mxu1 %vm2184_vm12, %v5428_v45 }
0x159f   :  { %4300 = vmatmul.mubr.msk.f32.vlgmr.msra.gmra.mrb[10].mxu1 %vm2184_vm12, %v5426_v42 }
0x15a0   :  { %v5436_v47 = vpop.permute.xlu0 %2587 }
0x15a1   :  { %v5434_v46 = vpop.permute.xlu1 %2585 }
0x15a2   :  { %4255 = vmatprep.mubr.msk.f32.mxu0 %vm2184_vm12, %v5434_v46 }
0x15a3   :  { %4256 = vmatmul.mubr.msk.f32.vlgmr.msra.gmra.mrb[12].mxu0 %vm2184_vm12, %v5436_v47 }
0x1672   :  { %v4301_v3 = vpop.f32.mrb[10].mxu1 }
0x1673   :  { %v4504_v53 = vadd.f32 %v4301_v3, %v5267_v32  ;;  %v3193_v54 = vpop.f32.mrb[11].mxu1 }
0x1674   :  { %v4505_v55 = vadd.f32 %v5267_v32, %v3193_v54 }
0x1675   :  { %4782 = vtanh.f32 %v4504_v53  ;;  %v3928_v28 = vmul.f32 -1.442695, %v4504_v53 }
0x1676   :  { %4784 = vtanh.f32 %v4505_v55  ;;  %v4257_v16 = vpop.f32.mrb[12].mxu0  ;;  %v3927_v29 = vmul.f32 -1.442695, %v4505_v55 }
0x1677   :  { %v2669_v60 = vadd.f32 %v4257_v16, %v2065_v56  ;;  %v2659_v24 = vpop.f32.mrb[13].mxu0 }
0x1678   :  { %v2668_v61 = vadd.f32 %v2659_v24, %v2060_v14 }
0x1679   :  { %4786 = vtanh.f32 %v2669_v60  ;;  %v3914_v44 = vmul.f32 -1.442695, %v2669_v60 }
0x167a   :  { %4788 = vtanh.f32 %v2668_v61  ;;  %v3913_v8 = vmul.f32 -1.442695, %v2668_v61 }
0x167b   :  { %4790 = vpow2.f32 %v3928_v28 }
0x167c   :  { %4792 = vpow2.f32 %v3927_v29 }
0x167d   :  { %4794 = vpow2.f32 %v3914_v44  ;;  %v3252_v44 = vld [vmem:[#allocation5 + $0x88] sm:$0xff] }
0x167e   :  { %4796 = vpow2.f32 %v3913_v8  ;;  %v3253_v8 = vld [vmem:[#allocation5 + $0x90] sm:$0xff] }
0x167f   :  { %v4783_v31 = vpop.eup %4782 }
0x1680   :  { %v4785_v62 = vpop.eup %4784  ;;  %3224 = vrot.lane.b32.xlu0 %v4783_v31, %s4922_s17  ;;  %v3256_v31 = vld [vmem:[#allocation5 + $0xa8] sm:$0xff] }
0x1681   :  { %3222 = vrot.lane.b32.xlu1 %v4785_v62, %s4922_s17  ;;  %v3258_v62 = vld [vmem:[#allocation5 + $0xb8] sm:$0xff] }
0x1683   :  { %v4787_v32 = vpop.eup %4786 }
0x1684   :  { %v4789_v26 = vpop.eup %4788  ;;  %2690 = vrot.lane.b32.xlu0 %v4787_v32, %s4922_s17 }
0x1685   :  { %2688 = vrot.lane.b32.xlu1 %v4789_v26, %s4922_s17  ;;  %v4791_v1 = vpop.eup %4790 }
0x1686   :  { %v4793_v2 = vpop.eup %4792  ;;  %v3211_v5 = vadd.f32 1.0, %v4791_v1  ;;  %v4478_v1 = vpack.c.bf16 %v3253_v8, %v3252_v44 }
0x1687   :  { %v4795_v10 = vpop.eup %4794  ;;  %v3210_v6 = vadd.f32 1.0, %v4793_v2 }
0x1688   :  { %v4797_v19 = vpop.eup %4796  ;;  %4798 = vrcp.f32 %v3211_v5  ;;  %v2677_v30 = vadd.f32 1.0, %v4795_v10 }
0x1689   :  { %4800 = vrcp.f32 %v3210_v6  ;;  %v2676_v33 = vadd.f32 1.0, %v4797_v19 }
0x168a   :  { %4802 = vrcp.f32 %v2677_v30 }
0x168b   :  { %4804 = vrcp.f32 %v2676_v33 }
0x1692   :  { %v4799_v58 = vpop.eup %4798 }
0x1693   :  { %v4801_v9 = vpop.eup %4800  ;;  %v3219_v23 = vmul.f32 %v4799_v58, %v5404_v43  ;;  %v3257_v43 = vld [vmem:[#allocation5 + $0xb0] sm:$0xff] }
0x1694   :  { %v4803_v59 = vpop.eup %4802  ;;  %v3218_v3 = vmul.f32 %v4801_v9, %v5406_v20  ;;  %v4470_v32 = vpack.c.bf16 %v3257_v43, %v3256_v31  ;;  %v3259_v20 = vld [vmem:[#allocation5 + $0xc0] sm:$0xff] }
0x1695   :  { %v4805_v37 = vpop.eup %4804  ;;  %v2685_v56 = vmul.f32 %v4803_v59, %v5412_v18  ;;  %v4474_v26 = vpack.c.bf16 %v3259_v20, %v3258_v62 }
0x1696   :  { %v2684_v16 = vmul.f32 %v4805_v37, %v5414_v34  ;;  %4471 = vmatprep.subr.bf16.mxu0 %v4470_v32 }
0x1697   :  { %4473 = vmatpush3.bf16.msra.mxu0 %v4470_v32 }
0x1698   :  { %4475 = vmatprep.subr.bf16.mxu0 %v4474_v26 }
0x169b   :  { %4477 = vmatpush3.bf16.msra.mxu0 %v4474_v26 }
0x169c   :  { %4479 = vmatprep.subr.bf16.mxu0 %v4478_v1 }
0x16f2   :  { %v3225_v52 = vpop.permute.xlu0 %3224 }
0x16f3   :  { %v3229_v35 = vmul.f32 %v4799_v58, %v3225_v52  ;;  %v3223_v57 = vpop.permute.xlu1 %3222 }
0x16f4   :  { %v3228_v17 = vmul.f32 %v4801_v9, %v3223_v57  ;;  %v3255_v57 = vld [vmem:[#allocation5 + $0xa0] sm:$0xff] }
0x16f5   :  { %3234 = vrot.lane.b32.xlu0 %v3229_v35, %s4923_s2  ;;  %v3254_v35 = vld [vmem:[#allocation5 + $0x98] sm:$0xff] }
0x16f6   :  { %v2691_v36 = vpop.permute.xlu0 %2690  ;;  %3232 = vrot.lane.b32.xlu1 %v3228_v17, %s4923_s2 }
0x16f7   :  { %v2695_v38 = vmul.f32 %v4803_v59, %v2691_v36  ;;  %v2689_v25 = vpop.permute.xlu1 %2688  ;;  %v4482_v36 = vpack.c.bf16 %v3255_v57, %v3254_v35 }
0x16f8   :  { %v2694_v27 = vmul.f32 %v4805_v37, %v2689_v25 }
0x16f9   :  { %2700 = vrot.lane.b32.xlu0 %v2695_v38, %s4923_s2 }
0x16fa   :  { %2698 = vrot.lane.b32.xlu1 %v2694_v27, %s4923_s2 }
0x1767   :  { %v3235_v41 = vpop.permute.xlu0 %3234 }
0x1768   :  { %v3239_v53 = vadd.f32 %v3235_v41, %v3219_v23  ;;  %v3233_v54 = vpop.permute.xlu1 %3232 }
0x1769   :  { %v3238_v55 = vadd.f32 %v3233_v54, %v3218_v3 }
0x176a   :  { %4806 = vtanh.f32 %v3239_v53 }
0x176b   :  { %4808 = vtanh.f32 %v3238_v55  ;;  %v2701_v14 = vpop.permute.xlu0 %2700 }
0x176c   :  { %v2705_v60 = vadd.f32 %v2701_v14, %v2685_v56  ;;  %v2699_v24 = vpop.permute.xlu1 %2698 }
0x176d   :  { %v2704_v61 = vadd.f32 %v2699_v24, %v2684_v16 }
0x176e   :  { %4810 = vtanh.f32 %v2705_v60 }
0x176f   :  { %4812 = vtanh.f32 %v2704_v61 }
0x1774   :  { %v4807_v28 = vpop.eup %4806 }
0x1775   :  { %v4809_v18 = vpop.eup %4808  ;;  %3246 = vrot.lane.b32.xlu0 %v4807_v28, %s4922_s17 }
0x1776   :  { %3244 = vrot.lane.b32.xlu1 %v4809_v18, %s4922_s17 }
0x1778   :  { %v4811_v34 = vpop.eup %4810 }
0x1779   :  { %v4813_v29 = vpop.eup %4812  ;;  %2712 = vrot.lane.b32.xlu0 %v4811_v34, %s4922_s17 }
0x177a   :  { %2710 = vrot.lane.b32.xlu1 %v4813_v29, %s4922_s17 }
0x17e7   :  { %v3247_v2 = vpop.permute.xlu0 %3246 }
0x17e8   :  { %v3251_v5 = vmul.f32 %v4799_v58, %v3247_v2  ;;  %v3245_v10 = vpop.permute.xlu1 %3244 }
0x17e9   :  { %v3250_v6 = vmul.f32 %v4801_v9, %v3245_v10 }
0x17ea   :  { %3264 = vrot.lane.b32.xlu0 %v3251_v5, %s4923_s2 }
0x17eb   :  { %v2713_v19 = vpop.permute.xlu0 %2712  ;;  %3262 = vrot.lane.b32.xlu1 %v3250_v6, %s4923_s2 }
0x17ec   :  { %v2717_v30 = vmul.f32 %v4803_v59, %v2713_v19  ;;  %v2711_v33 = vpop.permute.xlu1 %2710 }
0x17ed   :  { %v2716_v52 = vmul.f32 %v4805_v37, %v2711_v33 }
0x17ee   :  { %3379 = vrot.lane.b32.xlu0 %v2717_v30, %s4923_s2 }
0x17ef   :  { %3377 = vrot.lane.b32.xlu1 %v2716_v52, %s4923_s2 }
0x185c   :  { %v3265_v38 = vpop.permute.xlu0 %3264 }
0x185d   :  { %v3263_v17 = vpop.permute.xlu1 %3262 }
0x185e   :  { %4310 = vmatprep.mubr.msk.f32.mxu0 %vm2184_vm12, %v3263_v17 }
0x185f   :  { %4311 = vmatmul.mubr.msk.f32.vlgmr.msra.gmra.mrb[14].mxu0 %vm2184_vm12, %v3265_v38 }
0x1860   :  { %4313 = vmatprep.mubr.msk.f32.mxu0 %vm2184_vm12, %v5428_v45  ;;  %4481 = vmatpush3.bf16.msra.mxu0 %v4478_v1 }
0x1861   :  { %4483 = vmatprep.subr.bf16.mxu0 %v4482_v36 }
0x1863   :  { %4314 = vmatmul.mubr.msk.f32.gmra.mrb[16].mxu0 %vm2184_vm12, %v5426_v42 }
0x1864   :  { %4316 = vmatprep.mubr.msk.f32.mxu0 %vm2184_vm12, %v5368_v12  ;;  %4485 = vmatpush3.bf16.msra.mxu0 %v4482_v36  ;;  %v3945_v12 = vld [vmem:[%s5547_s3 + $0x3] ss:$0 sm:$0xff] }
0x1867   :  { %4317 = vmatmul.mubr.msk.f32.gmra.mrb[18].mxu0 %vm2184_vm12, %v5366_v11  ;;  %v3378_v11 = vpop.permute.xlu1 %3377 }
0x1868   :  { %4319 = vmatprep.mubr.msk.f32.mxu0 %vm2184_vm12, %v5308_v4  ;;  %v4924_v4 = vmov 0  }
0x1869   :  { %4613 = vset.pattern.permute.xlu1 %v4924_v4  ;;  %4612 = vset.pattern.permute.xlu0 %v4924_v4 }
0x186b   :  { %4320 = vmatmul.mubr.msk.f32.gmra.mrb[20].mxu0 %vm2184_vm12, %v5306_v7  ;;  %v3380_v7 = vpop.permute.xlu0 %3379 }
0x186c   :  { %4330 = vmatprep.mubr.msk.f32.mxu0 %vm2184_vm12, %v5315_v48 }
0x186f   :  { %4331 = vmatmul.mubr.msk.f32.vlgmr.msra.gmra.mrb[14].mxu0 %vm2184_vm12, %v5318_v49 }
0x1870   :  { %4333 = vmatprep.mubr.msk.f32.mxu0 %vm2184_vm12, %v5375_v13 }
0x1873   :  { %4334 = vmatmul.mubr.msk.f32.gmra.mrb[16].mxu0 %vm2184_vm12, %v5378_v15 }
0x1874   :  { %4336 = vmatprep.mubr.msk.f32.mxu0 %vm2184_vm12, %v5434_v46 }
0x1877   :  { %4337 = vmatmul.mubr.msk.f32.gmra.mrb[18].mxu0 %vm2184_vm12, %v5436_v47 }
0x1878   :  { %4339 = vmatprep.mubr.msk.f32.mxu0 %vm2184_vm12, %v3378_v11 }
0x187b   :  { %4340 = vmatmul.mubr.msk.f32.gmra.mrb[20].mxu0 %vm2184_vm12, %v3380_v7 }
0x1942   :  { %v4332_v48 = vpop.f32.mrb[14].mxu0 }
0x1943   :  { %v3451_v49 = vpop.f32.mrb[15].mxu0  ;;  %v3496_v15 = vadd.f32 %v4332_v48, %v3945_v12 }
0x1944   :  { %v3495_v46 = vadd.f32 %v3945_v12, %v3451_v49 }
0x1946   :  { %v4335_v13 = vpop.f32.mrb[16].mxu0 }
0x1947   :  { %v3498_v42 = vadd.f32 %v4335_v13, %v3945_v12  ;;  %v3461_v45 = vpop.f32.mrb[17].mxu0 }
0x1948   :  { %v3497_v47 = vadd.f32 %v3945_v12, %v3461_v45 }
0x1949   :  { %v3504_v58 = vmax.f32 %v3496_v15, %v3498_v42 }
0x194a   :  { %v3503_v9 = vmax.f32 %v3495_v46, %v3497_v47  ;;  %v4338_v59 = vpop.f32.mrb[18].mxu0 }
0x194b   :  { %v3500_v37 = vadd.f32 %v4338_v59, %v3945_v12  ;;  %v3471_v25 = vpop.f32.mrb[19].mxu0 }
0x194c   :  { %v3499_v27 = vadd.f32 %v3945_v12, %v3471_v25 }
0x194d   :  { %v3506_v23 = vmax.f32 %v3504_v58, %v3500_v37 }
0x194e   :  { %v3505_v41 = vmax.f32 %v3503_v9, %v3499_v27  ;;  %v4341_v3 = vpop.f32.mrb[20].mxu0 }
0x194f   :  { %v3502_v53 = vadd.f32 %v4341_v3, %v3945_v12  ;;  %v3481_v54 = vpop.f32.mrb[21].mxu0 }
0x1950   :  { %v3501_v55 = vadd.f32 %v3945_v12, %v3481_v54 }
0x1951   :  { %v3508_v56 = vmax.f32 %v3506_v23, %v3502_v53 }
0x1952   :  { %v3507_v14 = vmax.f32 %v3505_v41, %v3501_v55 }
0x1953   :  { %v3510_v16 = vsub.f32 %v3496_v15, %v3508_v56  ;;  %v3516_v60 = vsub.f32 %v3498_v42, %v3508_v56  ;;  %v3522_v24 = vsub.f32 %v3500_v37, %v3508_v56  ;;  %v3528_v61 = vsub.f32 %v3502_v53, %v3508_v56  ;;  %v3631_v15 = vld [vmem:[#allocation5 + $0xc8] sm:$0xff]  ;;  %v3632_v42 = vld [vmem:[#allocation5 + $0xd0] sm:$0xff] }
0x1954   :  { %v3509_v31 = vsub.f32 %v3495_v46, %v3507_v14  ;;  %v3515_v43 = vsub.f32 %v3497_v47, %v3507_v14  ;;  %v3521_v62 = vsub.f32 %v3499_v27, %v3507_v14  ;;  %v3527_v32 = vsub.f32 %v3501_v55, %v3507_v14 }
0x1955   :  { %v3513_v20 = vmul.f32 1.442695, %v3510_v16  ;;  %v3519_v26 = vmul.f32 1.442695, %v3516_v60  ;;  %v3525_v28 = vmul.f32 1.442695, %v3522_v24  ;;  %v4486_v45 = vpack.c.bf16 %v3632_v42, %v3631_v15 }
0x1956   :  { %v3531_v18 = vmul.f32 1.442695, %v3528_v61  ;;  %v3511_v34 = vmul.f32 1.442695, %v3509_v31  ;;  %v3517_v29 = vmul.f32 1.442695, %v3515_v43 }
0x1957   :  { %4814 = vpow2.f32 %v3513_v20  ;;  %v3523_v44 = vmul.f32 1.442695, %v3521_v62  ;;  %v3529_v8 = vmul.f32 1.442695, %v3527_v32  ;;  %4487 = vmatprep.subr.bf16.mxu1 %v4486_v45  ;;  %v3946_v62 = vld [vmem:[%s5547_s3 + $0x4] ss:$0 sm:$0xff] }
0x1958   :  { %4816 = vpow2.f32 %v3519_v26  ;;  %4489 = vmatpush3.bf16.msra.mxu1 %v4486_v45 }
0x1959   :  { %4818 = vpow2.f32 %v3525_v28 }
0x195a   :  { %4820 = vpow2.f32 %v3531_v18 }
0x195b   :  { %4822 = vpow2.f32 %v3511_v34  ;;  %v3949_v34 = vld [vmem:[%s5547_s3 + $0xc] ss:$0 sm:$0xff] }
0x195c   :  { %4824 = vpow2.f32 %v3517_v29 }
0x195d   :  { %4826 = vpow2.f32 %v3523_v44 }
0x195e   :  { %4828 = vpow2.f32 %v3529_v8 }
0x1961   :  { %v4815_v1 = vpop.eup %4814 }
0x1962   :  { %v4817_v2 = vpop.eup %4816 }
0x1963   :  { %v4819_v5 = vpop.eup %4818  ;;  %v3534_v10 = vadd.f32 %v4817_v2, %v4815_v1  ;;  %3560 = vperm.xlu0 %4612, %v4817_v2  }
0x1964   :  { %v4821_v6 = vpop.eup %4820  ;;  %3582 = vperm.xlu1 %4613, %v4819_v5  }
0x1965   :  { %v4823_v19 = vpop.eup %4822  ;;  %v3536_v30 = vadd.f32 %v4819_v5, %v3534_v10 }
0x1966   :  { %v4825_v33 = vpop.eup %4824 }
0x1967   :  { %v4827_v52 = vpop.eup %4826  ;;  %v3538_v35 = vadd.f32 %v4821_v6, %v3536_v30  ;;  %v3533_v57 = vadd.f32 %v4825_v33, %v4823_v19 }
0x1968   :  { %v4829_v17 = vpop.eup %4828  ;;  %3555 = vperm.xlu1 %4613, %v4825_v33  }
0x1969   :  { %4830 = vrcp.f32 %v3538_v35  ;;  %v3535_v36 = vadd.f32 %v4827_v52, %v3533_v57  ;;  %3599 = vperm.xlu0 %4612, %v4829_v17  }
0x196b   :  { %v3537_v38 = vadd.f32 %v4829_v17, %v3535_v36 }
0x196c   :  { %3577 = vperm.xlu1 %4613, %v4827_v52  }
0x196d   :  { %4832 = vrcp.f32 %v3537_v38  ;;  %3543 = vperm.xlu0 %4612, %v4823_v19   ;;  %v3951_v19 = vld [vmem:[%s5547_s3 + $0x5] ss:$0 sm:$0xff] }
0x1970   :  { %3604 = vperm.xlu1 %4613, %v4821_v6  }
0x1973   :  { %v4831_v11 = vpop.eup %4830 }
0x1974   :  { %3548 = vperm.xlu1 %4613, %v4815_v1   ;;  %3626 = vperm.xlu0 %4612, %v4831_v11   ;;  %v3950_v1 = vld [vmem:[%s5547_s3 + $0xd] ss:$0 sm:$0xff] }
0x1977   :  { %v4833_v7 = vpop.eup %4832 }
0x1978   :  { %3621 = vperm.xlu0 %4612, %v4833_v7  }
0x19e2   :  { %v3561_v4 = vpop.permute.xlu0 %3560 }
0x19e3   :  { %v3583_v48 = vpop.permute.xlu1 %3582  ;;  %v3564_v49 = vmul.f32 %v3561_v4, %v5066_v22 }
0x19e4   :  { %v3586_v47 = vmul.f32 %v3583_v48, %v5125_v40 }
0x19e5   :  { %3569 = vrot.lane.b32.xlu1 %v3564_v49, %s4919_s6 }
0x19e7   :  { %v3556_v12 = vpop.permute.xlu1 %3555 }
0x19e8   :  { %v3563_v13 = vmul.f32 %v3556_v12, %v5062_v21  ;;  %v3600_v9 = vpop.permute.xlu0 %3599 }
0x19e9   :  { %v3607_v21 = vmul.f32 %v3600_v9, %v5186_v51 }
0x19ea   :  { %3567 = vrot.lane.b32.xlu1 %v3563_v13, %s4919_s6 }
0x19eb   :  { %v3578_v46 = vpop.permute.xlu1 %3577 }
0x19ec   :  { %v3585_v58 = vmul.f32 %v3578_v46, %v5121_v39  ;;  %v3544_v37 = vpop.permute.xlu0 %3543 }
0x19ed   :  { %v3551_v41 = vmul.f32 %v3544_v37, %v5206_v63 }
0x19ee   :  { %3591 = vrot.lane.b32.xlu1 %v3586_v47, %s4919_s6  ;;  %3589 = vrot.lane.b32.xlu0 %v3585_v58, %s4919_s6 }
0x19ef   :  { %v3605_v22 = vpop.permute.xlu1 %3604 }
0x19f0   :  { %v3608_v59 = vmul.f32 %v3605_v22, %v5182_v50 }
0x19f2   :  { %3613 = vrot.lane.b32.xlu1 %v3608_v59, %s4919_s6  ;;  %3611 = vrot.lane.b32.xlu0 %v3607_v21, %s4919_s6 }
0x19f3   :  { %v3549_v40 = vpop.permute.xlu1 %3548  ;;  %v3627_v25 = vpop.permute.xlu0 %3626 }
0x19f4   :  { %v3552_v3 = vmul.f32 %v3549_v40, %v5209_v0  ;;  %v3743_v0 = vld [vmem:[#allocation5 + $0xd8] sm:$0xff] }
0x19f5   :  { %4349 = vmatprep.subr.mxu1 %v3743_v0 }
0x19f7   :  { %v3622_v27 = vpop.permute.xlu0 %3621 }
0x1a57   :  { %v3570_v39 = vpop.permute.xlu1 %3569 }
0x1a58   :  { %v3574_v55 = vadd.f32 %v3570_v39, %v3552_v3 }
0x1a5c   :  { %v3568_v23 = vpop.permute.xlu1 %3567 }
0x1a5d   :  { %v3573_v51 = vadd.f32 %v3568_v23, %v3551_v41 }
0x1a60   :  { %v3592_v53 = vpop.permute.xlu1 %3591  ;;  %v3590_v54 = vpop.permute.xlu0 %3589 }
0x1a61   :  { %v3596_v56 = vadd.f32 %v3592_v53, %v3574_v55  ;;  %v3595_v50 = vadd.f32 %v3590_v54, %v3573_v51 }
0x1a64   :  { %v3614_v14 = vpop.permute.xlu1 %3613  ;;  %v3612_v16 = vpop.permute.xlu0 %3611 }
0x1a65   :  { %v3618_v60 = vadd.f32 %v3614_v14, %v3596_v56  ;;  %v3617_v24 = vadd.f32 %v3612_v16, %v3595_v50 }
0x1a67   :  { %v3630_v61 = vmul.f32 %v3627_v25, %v3618_v60  ;;  %v3629_v31 = vmul.f32 %v3622_v27, %v3617_v24 }
0x1a69   :  { %3642 = vrot.lane.b32.xlu1 %v3630_v61, %s4920_s1  ;;  %3640 = vrot.lane.b32.xlu0 %v3629_v31, %s4920_s1 }
0x1adb   :  { %v3643_v43 = vpop.permute.xlu1 %3642  ;;  %v3641_v63 = vpop.permute.xlu0 %3640 }
0x1adc   :  { %4346 = vmatprep.mubr.msk.f32.mxu1 %vm210_vm4, %v3641_v63 }
0x1add   :  { %4347 = vmatmul.mubr.msk.f32.vlgmr.msra.gmra.mrb[18].mxu1 %vm210_vm4, %v3643_v43  ;;  %vm3749_vm4 = vcmask 64512  }
0x1ade   :  { %4350 = vmatpush3.msra.mxu1 %v3743_v0 }
0x1bb0   :  { %v4348_v32 = vpop.f32.mrb[18].mxu1 }
0x1bb1   :  { %v3720_v20 = vadd.f32 %v4348_v32, %v3946_v62  ;;  %v3714_v26 = vpop.f32.mrb[19].mxu1 }
0x1bb2   :  { %v3715_v28 = vadd.f32 %v3946_v62, %v3714_v26 }
0x1bb3   :  { %vm3724_vm13 = vcmp.ge.f32.partialorder %v3720_v20, 0.0  ;;  %v3726_v18 = vmul.f32 0.01, %v3720_v20 }
0x1bb4   :  { %vm3723_vm14 = vcmp.ge.f32.partialorder %v3715_v28, 0.0  ;;  %v3725_v29 = vmul.f32 0.01, %v3715_v28 }
0x1bb5   :  { %v3728_v44 = vsel %vm3724_vm13, %v3720_v20, %v3726_v18 }
0x1bb6   :  { %v3735_v8 = vmul.f32 %v3949_v34, %v3728_v44  ;;  %v3727_v2 = vsel %vm3723_vm14, %v3715_v28, %v3725_v29 }
0x1bb7   :  { %v3734_v5 = vmul.f32 %v3949_v34, %v3727_v2 }
0x1bb8   :  { %v3742_v6 = vadd.f32 %v3950_v1, %v3735_v8 }
0x1bb9   :  { %v3741_v10 = vadd.f32 %v3950_v1, %v3734_v5 }
0x1bbb   :  { %4351 = vmatprep.mubr.msk.f32.mxu1 %vm3749_vm4, %v3741_v10 }
0x1bbc   :  { %4352 = vmatmul.mubr.msk.f32.vlgmr.msra.gmra.mrb[20].mxu1 %vm3749_vm4, %v3742_v6 }
0x1c8f   :  { %v4353_v30 = vpop.f32.mrb[20].mxu1 }
0x1c90   :  { %v3828_v33 = vadd.f32 %v4353_v30, %v3951_v19  ;;  %v3822_v52 = vpop.f32.mrb[21].mxu1 }
0x1c91   :  { %v3823_v35 = vadd.f32 %v3951_v19, %v3822_v52 }
0x1c92   :  { %3832 = vst [vmem:[#allocation7 + $0x8] sm:$0xff] %v3828_v33 }
0x1c93   :  { %3831 = vst [vmem:[#allocation7] sm:$0xff] %v3823_v35 }
0x1c94   :  { %4889 = shalt.err (!%p4886_p6)
}
0x1c95   :  { %s4890_s3 = scalar_lea.hbm %s5548_s4, 256 }
0x1c96   :  { %p4891_p7 = scmp.ne.s32.totalorder %s5548_s4, %s4890_s3  ;;  %p4894_p8 = scmp.lt.u32.totalorder %s4890_s3, %s5548_s4 }
0x1c98   :  { %p4896_p9 = pnand %p4894_p8, %p4891_p7 }
0x1c9a   :  { %4899 = shalt.err (!%p4896_p9)
}
0x1c9b   :  { %3844 = dma.vmem_to_hbm [thread:$0]  %s3839_s30, 256, %s5548_s4, [#allocation4], %s4907_s25, %s4907_s25, %s4908_s26  }
0x1c9c   :  { %4904 = dma.done.wait [#allocation4], 256  }
0x1c9d   :  { %4905 = vsyncadd [#allocation4], 4294967040 }
0x1c9e   :  { %3848 = vsyncpa [#allocation3], 1 }
0x1c9f   :  { %3849 = vsyncpa [#allocation6], 1 }
0x1ca0   :  { %3850 = vsyncpa [#allocation4], 1 }

</bundles_post_ra>
